<compile_context>
chip_gen: v5e
topology: v5e:2x2
jax: 0.10.0
libtpu: 0.0.40
codegen_flags: <defaults>
</compile_context>

<pallas_src>
from functools import partial

import jax
import jax.numpy as jnp
from jax import lax
from jax.experimental import pallas as pl
from jax.experimental.pallas import tpu as pltpu

LORA_PAD = 128  # pad 3*r up to one full lane tile so LoRA intermediates are lane-dense


# --------------------------------- kernel ------------------------------------

def _lora_attention_kernel(x_ref, wf_ref, bf_ref, wlo_ref, blo_ref, wp_ref, bp_ref,
                           out_ref, lora_ref, qkv_scr, o_scr, *, num_heads, head_dim):
    # x_ref: (1, N, C); weights are full-array VMEM tiles (bf16), biases f32;
    # out_ref: (1, N, C) f32; lora_ref: (1, N, 3C) bf16;
    # qkv_scr: (N, 3C + LORA_PAD) bf16 scratch; o_scr: (N, C) bf16 scratch.
    C = num_heads * head_dim
    x = x_ref[0].astype(jnp.bfloat16)                                   # (N, C)

    # ---- fused [qkv | LoRA-down] projection: single MXU pass over x ---------
    # The 1/sqrt(head_dim) scale is pre-folded into the q columns of wf/bf.
    qkv = jnp.dot(x, wf_ref[...], preferred_element_type=jnp.float32) + bf_ref[...]
    qkv_scr[...] = qkv.astype(jnp.bfloat16)        # stage in VMEM; bounds live ranges

    # ---- LoRA up-projection (block-diagonal; zero-padded rows are no-ops) ---
    # NOTE: per the reference forward, lora_qkv is NOT added to qkv; it is
    # emitted as a bf16 auxiliary output only.
    h = qkv_scr[:, 3 * C:]                                              # (N, LORA_PAD) bf16
    lora = jnp.dot(h, wlo_ref[...], preferred_element_type=jnp.float32) + blo_ref[...]
    lora_ref[0] = lora.astype(lora_ref.dtype)

    # ---- multi-head scaled-dot-product attention -----------------------------
    # TODO(synk): q_norm / k_norm are nn.Identity for the default timm Attention
    #             (qk_norm=False); the LayerNorm qk_norm variant is not implemented.
    # TODO(synk): attn_drop / proj_drop are inference mode only (p = 0).
    for hh in range(num_heads):                                          # static unroll
        lo = hh * head_dim
        q = qkv_scr[:, lo:lo + head_dim]                                 # pre-scaled, bf16
        k = qkv_scr[:, C + lo:C + lo + head_dim]
        v = qkv_scr[:, 2 * C + lo:2 * C + lo + head_dim]
        # q @ k^T without materializing a transpose: contract dim 1 of both.
        s = lax.dot_general(q, k, (((1,), (1,)), ((), ())),
                            preferred_element_type=jnp.float32)          # (N, N) f32
        s = s - jnp.max(s, axis=-1, keepdims=True)
        p = jnp.exp(s)
        denom = jnp.sum(p, axis=-1, keepdims=True)                       # >= 1
        pv = jnp.dot(p.astype(jnp.bfloat16), v, preferred_element_type=jnp.float32)
        # Deferred normalization: (N, hd) multiply + EUP reciprocal instead of
        # a (N, N) VPU divide per head.
        o_scr[:, lo:lo + head_dim] = (pv * pl.reciprocal(denom, approx=True)
                                      ).astype(o_scr.dtype)

    # ---- output projection: Linear(C, C) -------------------------------------
    y = jnp.dot(o_scr[...], wp_ref[...], preferred_element_type=jnp.float32) + bp_ref[...]
    out_ref[0] = y.astype(out_ref.dtype)


# ------------------------------ pallas wrapper --------------------------------

def lora_attention_forward(x, kp, *, num_heads, head_dim):
    """x: (B, N, C).  Returns (attention_out (B,N,C) f32, lora_qkv (B,N,3C) bf16)."""
    B, N, C = x.shape
    FC = kp["w_fused"].shape[1]                                     # 3C + LORA_PAD
    kern = partial(_lora_attention_kernel, num_heads=num_heads, head_dim=head_dim)
    out, lora_qkv = pl.pallas_call(
        kern,
        out_shape=(jax.ShapeDtypeStruct((B, N, C), x.dtype),
                   jax.ShapeDtypeStruct((B, N, 3 * C), jnp.bfloat16)),
        grid=(B,),
        in_specs=[
            pl.BlockSpec((1, N, C), lambda b: (b, 0, 0)),           # x
            pl.BlockSpec((C, FC), lambda b: (0, 0)),                # fused [W_qkv | W_lora_in]
            pl.BlockSpec((1, FC), lambda b: (0, 0)),                # fused bias
            pl.BlockSpec((LORA_PAD, 3 * C), lambda b: (0, 0)),      # LoRA up (block-diag)
            pl.BlockSpec((1, 3 * C), lambda b: (0, 0)),
            pl.BlockSpec((C, C), lambda b: (0, 0)),                 # W_proj
            pl.BlockSpec((1, C), lambda b: (0, 0)),                 # b_proj
        ],
        out_specs=(pl.BlockSpec((1, N, C), lambda b: (b, 0, 0)),
                   pl.BlockSpec((1, N, 3 * C), lambda b: (b, 0, 0))),
        scratch_shapes=[
            pltpu.VMEM((N, FC), jnp.bfloat16),                      # staged qkv | lora-h
            pltpu.VMEM((N, C), jnp.bfloat16),                       # merged head outputs
        ],
        compiler_params=pltpu.CompilerParams(dimension_semantics=("parallel",)),
    )(x, kp["w_fused"], kp["b_fused"], kp["w_lout"], kp["b_lout"],
      kp["w_proj"], kp["b_proj"])
    return out, lora_qkv


# ------------------------------ params ----------------------------------------

def init_params(key, dim, r):
    """Random weights in torch Linear convention (out, in).  Weights are rounded
    to bf16-exact values so kernel (bf16 MXU) and reference (f32) share them."""
    ks = jax.random.split(key, 16)

    def w(k, shape, sc=0.05):
        v = sc * jax.random.normal(k, shape, jnp.float32)
        return v.astype(jnp.bfloat16).astype(jnp.float32)

    def b(k, shape, sc=0.05):
        return sc * jax.random.normal(k, shape, jnp.float32)

    return dict(
        w_qkv=w(ks[0], (3 * dim, dim)), b_qkv=b(ks[1], (3 * dim,)),
        w_proj=w(ks[2], (dim, dim)), b_proj=b(ks[3], (dim,)),
        w_in_q=w(ks[4], (r, dim)), b_in_q=b(ks[5], (r,)),
        w_out_q=w(ks[6], (dim, r)), b_out_q=b(ks[7], (dim,)),
        w_in_k=w(ks[8], (r, dim)), b_in_k=b(ks[9], (r,)),
        w_out_k=w(ks[10], (dim, r)), b_out_k=b(ks[11], (dim,)),
        w_in_v=w(ks[12], (r, dim)), b_in_v=b(ks[13], (r,)),
        w_out_v=w(ks[14], (dim, r)), b_out_v=b(ks[15], (dim,)),
    )


def pack_kernel_params(p, *, dim, head_dim, r):
    """One-time host transform: fuse qkv + LoRA-down weights, fold the attention
    scale into the q columns, build the block-diagonal LoRA-up weight, cast
    weights to bf16 (biases stay f32)."""
    C = dim
    scale = head_dim ** -0.5

    w_qkv = p["w_qkv"].T                                            # (C, 3C)
    w_qkv = w_qkv.at[:, :C].multiply(scale)                         # fold scale into q
    b_qkv = p["b_qkv"].at[:C].multiply(scale)

    # LoRA down-projections side by side, zero-padded to a full 128-lane tile.
    w_lin = jnp.concatenate([p["w_in_q"].T, p["w_in_k"].T, p["w_in_v"].T], axis=1)
    w_lin = jnp.pad(w_lin, ((0, 0), (0, LORA_PAD - 3 * r)))         # (C, LORA_PAD)
    b_lin = jnp.pad(jnp.concatenate([p["b_in_q"], p["b_in_k"], p["b_in_v"]]),
                    (0, LORA_PAD - 3 * r))

    w_fused = jnp.concatenate([w_qkv, w_lin], axis=1)               # (C, 3C + LORA_PAD)
    b_fused = jnp.concatenate([b_qkv, b_lin])[None, :]

    # LoRA up-projections as a block-diagonal (LORA_PAD, 3C); padded rows are zero.
    w_lout = jnp.zeros((LORA_PAD, 3 * C), jnp.float32)
    w_lout = w_lout.at[0:r, 0:C].set(p["w_out_q"].T)
    w_lout = w_lout.at[r:2 * r, C:2 * C].set(p["w_out_k"].T)
    w_lout = w_lout.at[2 * r:3 * r, 2 * C:3 * C].set(p["w_out_v"].T)
    b_lout = jnp.concatenate([p["b_out_q"], p["b_out_k"], p["b_out_v"]])[None, :]

    return dict(
        w_fused=w_fused.astype(jnp.bfloat16), b_fused=b_fused.astype(jnp.float32),
        w_lout=w_lout.astype(jnp.bfloat16), b_lout=b_lout.astype(jnp.float32),
        w_proj=p["w_proj"].T.astype(jnp.bfloat16),
        b_proj=p["b_proj"][None, :].astype(jnp.float32),
    )


# ------------------------------ pure-JAX reference ----------------------------

def reference_forward(x, p, *, num_heads, head_dim):
    """f32 reference matching the PyTorch forward (eval mode)."""
    B, N, C = x.shape
    qkv = x @ p["w_qkv"].T + p["b_qkv"]
    lora = jnp.concatenate([
        (x @ p["w_in_q"].T + p["b_in_q"]) @ p["w_out_q"].T + p["b_out_q"],
        (x @ p["w_in_k"].T + p["b_in_k"]) @ p["w_out_k"].T + p["b_out_k"],
        (x @ p["w_in_v"].T + p["b_in_v"]) @ p["w_out_v"].T + p["b_out_v"],
    ], axis=-1)                                                     # computed, unused
    q, k, v = qkv[..., :C], qkv[..., C:2 * C], qkv[..., 2 * C:]

    def split(t):
        return t.reshape(B, N, num_heads, head_dim).transpose(0, 2, 1, 3)

    qh, kh, vh = split(q), split(k), split(v)
    s = (qh * head_dim ** -0.5) @ kh.transpose(0, 1, 3, 2)
    a = jax.nn.softmax(s, axis=-1)
    o = (a @ vh).transpose(0, 2, 1, 3).reshape(B, N, C)
    return o @ p["w_proj"].T + p["b_proj"], lora


# ----------------------------------- main -------------------------------------

if __name__ == "__main__":
    B, N = 2, 128                       # batch, sequence length
    num_heads, head_dim, r = 4, 32, 8   # dim = 128, LoRA rank 8
    dim = num_heads * head_dim

    key = jax.random.PRNGKey(0)
    kx, kp = jax.random.split(key)
    x = jax.random.normal(kx, (B, N, dim), jnp.float32)
    params = init_params(kp, dim, r)
    kparams = pack_kernel_params(params, dim=dim, head_dim=head_dim, r=r)

    out, lora = lora_attention_forward(x, kparams, num_heads=num_heads, head_dim=head_dim)
    out = jax.block_until_ready(out)
    lora = jax.block_until_ready(lora)

    ref_out, ref_lora = reference_forward(x, params, num_heads=num_heads, head_dim=head_dim)
    assert out.shape == (B, N, dim), out.shape
    assert lora.shape == (B, N, 3 * dim), lora.shape
    assert bool(jnp.all(jnp.isfinite(out)))
    # bf16 MXU operands -> loosened tolerance (per perf review).
    err = float(jnp.max(jnp.abs(out - ref_out)))
    assert jnp.allclose(out, ref_out, rtol=3e-2, atol=3e-2), err
    lora_f32 = lora.astype(jnp.float32)
    err_l = float(jnp.max(jnp.abs(lora_f32 - ref_lora)))
    assert jnp.allclose(lora_f32, ref_lora, rtol=3e-2, atol=3e-2), err_l
    print("KERNEL_OK")
</pallas_src>

<mosaic_0001>
module attributes {stable_mosaic.version = 11 : i64} {
  func.func @_lora_attention_kernel(%arg0: i32, %arg1: memref<1x128x128xf32, #tpu.memory_space<vmem>>, %arg2: memref<128x512xbf16, #tpu.memory_space<vmem>>, %arg3: memref<1x512xf32, #tpu.memory_space<vmem>>, %arg4: memref<128x384xbf16, #tpu.memory_space<vmem>>, %arg5: memref<1x384xf32, #tpu.memory_space<vmem>>, %arg6: memref<128x128xbf16, #tpu.memory_space<vmem>>, %arg7: memref<1x128xf32, #tpu.memory_space<vmem>>, %arg8: memref<1x128x128xf32, #tpu.memory_space<vmem>>, %arg9: memref<1x128x384xbf16, #tpu.memory_space<vmem>>, %arg10: memref<128x512xbf16, #tpu.memory_space<vmem>>, %arg11: memref<128x128xbf16, #tpu.memory_space<vmem>>) attributes {dimension_semantics = [#tpu.dimension_semantics<parallel>], iteration_bounds = array<i64: 2>, scalar_prefetch = 0 : i64, scratch_operands = 2 : i64, tpu.core_type = #tpu.core_type<tc>, window_params = [{transform_indices = @transform_0, window_bounds = array<i64: 1, 128, 128>}, {pipeline_mode = #tpu.pipeline_mode<synchronous>, transform_indices = @transform_1, window_bounds = array<i64: 128, 512>}, {pipeline_mode = #tpu.pipeline_mode<synchronous>, transform_indices = @transform_2, window_bounds = array<i64: 1, 512>}, {pipeline_mode = #tpu.pipeline_mode<synchronous>, transform_indices = @transform_3, window_bounds = array<i64: 128, 384>}, {pipeline_mode = #tpu.pipeline_mode<synchronous>, transform_indices = @transform_4, window_bounds = array<i64: 1, 384>}, {pipeline_mode = #tpu.pipeline_mode<synchronous>, transform_indices = @transform_5, window_bounds = array<i64: 128, 128>}, {pipeline_mode = #tpu.pipeline_mode<synchronous>, transform_indices = @transform_6, window_bounds = array<i64: 1, 128>}, {transform_indices = @transform_7, window_bounds = array<i64: 1, 128, 128>}, {transform_indices = @transform_8, window_bounds = array<i64: 1, 128, 384>}]} {
    %c0 = arith.constant 0 : index
    %c0_0 = arith.constant 0 : index
    %c0_1 = arith.constant 0 : index
    %0 = vector.load %arg1[%c0, %c0_0, %c0_1] : memref<1x128x128xf32, #tpu.memory_space<vmem>>, vector<1x128x128xf32>
    %1 = vector.shape_cast %0 : vector<1x128x128xf32> to vector<128x128xf32>
    %2 = arith.truncf %1 : vector<128x128xf32> to vector<128x128xbf16>
    %c0_2 = arith.constant 0 : index
    %c0_3 = arith.constant 0 : index
    %3 = vector.load %arg2[%c0_2, %c0_3] : memref<128x512xbf16, #tpu.memory_space<vmem>>, vector<128x512xbf16>
    %cst = arith.constant dense<0.000000e+00> : vector<128x512xf32>
    %4 = tpu.matmul %2, %3, %cst {dimension_numbers = #tpu.dot_dimension_numbers<[1], [0], [0], [1], [0, 0, 1, 1], [], []>} : vector<128x128xbf16>, vector<128x512xbf16>, vector<128x512xf32> -> vector<128x512xf32>
    %c0_4 = arith.constant 0 : index
    %c0_5 = arith.constant 0 : index
    %5 = vector.load %arg3[%c0_4, %c0_5] : memref<1x512xf32, #tpu.memory_space<vmem>>, vector<1x512xf32>
    %6 = vector.broadcast %5 : vector<1x512xf32> to vector<128x512xf32>
    %7 = arith.addf %4, %6 : vector<128x512xf32>
    %8 = arith.truncf %7 : vector<128x512xf32> to vector<128x512xbf16>
    %c0_6 = arith.constant 0 : index
    %c0_7 = arith.constant 0 : index
    %9 = vector.load %arg10[%c0_6, %c0_7] : memref<128x512xbf16, #tpu.memory_space<vmem>>, vector<128x512xbf16>
    tpu.vector_store %arg10[%c0_6, %c0_7], %8 {strides = array<i32>} : memref<128x512xbf16, #tpu.memory_space<vmem>>, vector<128x512xbf16>,
    %c0_8 = arith.constant 0 : index
    %c384 = arith.constant 384 : index
    %10 = vector.load %arg10[%c0_8, %c384] : memref<128x512xbf16, #tpu.memory_space<vmem>>, vector<128x128xbf16>
    %c0_9 = arith.constant 0 : index
    %c0_10 = arith.constant 0 : index
    %11 = vector.load %arg4[%c0_9, %c0_10] : memref<128x384xbf16, #tpu.memory_space<vmem>>, vector<128x384xbf16>
    %cst_11 = arith.constant dense<0.000000e+00> : vector<128x384xf32>
    %12 = tpu.matmul %10, %11, %cst_11 {dimension_numbers = #tpu.dot_dimension_numbers<[1], [0], [0], [1], [0, 0, 1, 1], [], []>} : vector<128x128xbf16>, vector<128x384xbf16>, vector<128x384xf32> -> vector<128x384xf32>
    %c0_12 = arith.constant 0 : index
    %c0_13 = arith.constant 0 : index
    %13 = vector.load %arg5[%c0_12, %c0_13] : memref<1x384xf32, #tpu.memory_space<vmem>>, vector<1x384xf32>
    %14 = vector.broadcast %13 : vector<1x384xf32> to vector<128x384xf32>
    %15 = arith.addf %12, %14 : vector<128x384xf32>
    %16 = arith.truncf %15 : vector<128x384xf32> to vector<128x384xbf16>
    %c0_14 = arith.constant 0 : index
    %c0_15 = arith.constant 0 : index
    %c0_16 = arith.constant 0 : index
    %17 = vector.load %arg9[%c0_14, %c0_15, %c0_16] : memref<1x128x384xbf16, #tpu.memory_space<vmem>>, vector<1x128x384xbf16>
    %18 = vector.shape_cast %17 : vector<1x128x384xbf16> to vector<128x384xbf16>
    %19 = vector.shape_cast %16 : vector<128x384xbf16> to vector<1x128x384xbf16>
    tpu.vector_store %arg9[%c0_14, %c0_15, %c0_16], %19 {strides = array<i32>} : memref<1x128x384xbf16, #tpu.memory_space<vmem>>, vector<1x128x384xbf16>,
    %c0_17 = arith.constant 0 : index
    %c0_18 = arith.constant 0 : index
    %20 = vector.load %arg10[%c0_17, %c0_18] : memref<128x512xbf16, #tpu.memory_space<vmem>>, vector<128x32xbf16>
    %c0_19 = arith.constant 0 : index
    %c128 = arith.constant 128 : index
    %21 = vector.load %arg10[%c0_19, %c128] : memref<128x512xbf16, #tpu.memory_space<vmem>>, vector<128x32xbf16>
    %c0_20 = arith.constant 0 : index
    %c256 = arith.constant 256 : index
    %22 = vector.load %arg10[%c0_20, %c256] : memref<128x512xbf16, #tpu.memory_space<vmem>>, vector<128x32xbf16>
    %cst_21 = arith.constant dense<0.000000e+00> : vector<128x128xf32>
    %23 = tpu.matmul %20, %21, %cst_21 {dimension_numbers = #tpu.dot_dimension_numbers<[1], [1], [0], [0], [0, 0, 1, 0], [], []>} : vector<128x32xbf16>, vector<128x32xbf16>, vector<128x128xf32> -> vector<128x128xf32>
    %cst_22 = arith.constant dense<0xFF800000> : vector<128xf32>
    %24 = vector.multi_reduction <maximumf>, %23, %cst_22 [1] : vector<128x128xf32> to vector<128xf32>
    %25 = vector.shape_cast %24 : vector<128xf32> to vector<128x1xf32>
    %26 = vector.broadcast %25 : vector<128x1xf32> to vector<128x128xf32>
    %27 = arith.subf %23, %26 : vector<128x128xf32>
    %28 = math.exp %27 : vector<128x128xf32>
    %cst_23 = arith.constant dense<0.000000e+00> : vector<128xf32>
    %29 = vector.multi_reduction <add>, %28, %cst_23 [1] : vector<128x128xf32> to vector<128xf32>
    %30 = vector.shape_cast %29 : vector<128xf32> to vector<128x1xf32>
    %31 = arith.truncf %28 : vector<128x128xf32> to vector<128x128xbf16>
    %cst_24 = arith.constant dense<0.000000e+00> : vector<128x32xf32>
    %32 = tpu.matmul %31, %22, %cst_24 {dimension_numbers = #tpu.dot_dimension_numbers<[1], [0], [0], [1], [0, 0, 1, 1], [], []>} : vector<128x128xbf16>, vector<128x32xbf16>, vector<128x32xf32> -> vector<128x32xf32>
    %33 = tpu.reciprocal %30 {approx = true} : vector<128x1xf32> -> vector<128x1xf32>
    %34 = vector.broadcast %33 : vector<128x1xf32> to vector<128x32xf32>
    %35 = arith.mulf %32, %34 : vector<128x32xf32>
    %36 = arith.truncf %35 : vector<128x32xf32> to vector<128x32xbf16>
    %c0_25 = arith.constant 0 : index
    %c0_26 = arith.constant 0 : index
    %37 = vector.load %arg11[%c0_25, %c0_26] : memref<128x128xbf16, #tpu.memory_space<vmem>>, vector<128x32xbf16>
    tpu.vector_store %arg11[%c0_25, %c0_26], %36 {strides = array<i32>} : memref<128x128xbf16, #tpu.memory_space<vmem>>, vector<128x32xbf16>,
    %c0_27 = arith.constant 0 : index
    %c32 = arith.constant 32 : index
    %38 = vector.load %arg10[%c0_27, %c32] : memref<128x512xbf16, #tpu.memory_space<vmem>>, vector<128x32xbf16>
    %c0_28 = arith.constant 0 : index
    %c160 = arith.constant 160 : index
    %39 = vector.load %arg10[%c0_28, %c160] : memref<128x512xbf16, #tpu.memory_space<vmem>>, vector<128x32xbf16>
    %c0_29 = arith.constant 0 : index
    %c288 = arith.constant 288 : index
    %40 = vector.load %arg10[%c0_29, %c288] : memref<128x512xbf16, #tpu.memory_space<vmem>>, vector<128x32xbf16>
    %cst_30 = arith.constant dense<0.000000e+00> : vector<128x128xf32>
    %41 = tpu.matmul %38, %39, %cst_30 {dimension_numbers = #tpu.dot_dimension_numbers<[1], [1], [0], [0], [0, 0, 1, 0], [], []>} : vector<128x32xbf16>, vector<128x32xbf16>, vector<128x128xf32> -> vector<128x128xf32>
    %cst_31 = arith.constant dense<0xFF800000> : vector<128xf32>
    %42 = vector.multi_reduction <maximumf>, %41, %cst_31 [1] : vector<128x128xf32> to vector<128xf32>
    %43 = vector.shape_cast %42 : vector<128xf32> to vector<128x1xf32>
    %44 = vector.broadcast %43 : vector<128x1xf32> to vector<128x128xf32>
    %45 = arith.subf %41, %44 : vector<128x128xf32>
    %46 = math.exp %45 : vector<128x128xf32>
    %cst_32 = arith.constant dense<0.000000e+00> : vector<128xf32>
    %47 = vector.multi_reduction <add>, %46, %cst_32 [1] : vector<128x128xf32> to vector<128xf32>
    %48 = vector.shape_cast %47 : vector<128xf32> to vector<128x1xf32>
    %49 = arith.truncf %46 : vector<128x128xf32> to vector<128x128xbf16>
    %cst_33 = arith.constant dense<0.000000e+00> : vector<128x32xf32>
    %50 = tpu.matmul %49, %40, %cst_33 {dimension_numbers = #tpu.dot_dimension_numbers<[1], [0], [0], [1], [0, 0, 1, 1], [], []>} : vector<128x128xbf16>, vector<128x32xbf16>, vector<128x32xf32> -> vector<128x32xf32>
    %51 = tpu.reciprocal %48 {approx = true} : vector<128x1xf32> -> vector<128x1xf32>
    %52 = vector.broadcast %51 : vector<128x1xf32> to vector<128x32xf32>
    %53 = arith.mulf %50, %52 : vector<128x32xf32>
    %54 = arith.truncf %53 : vector<128x32xf32> to vector<128x32xbf16>
    %c0_34 = arith.constant 0 : index
    %c32_35 = arith.constant 32 : index
    %55 = vector.load %arg11[%c0_34, %c32_35] : memref<128x128xbf16, #tpu.memory_space<vmem>>, vector<128x32xbf16>
    tpu.vector_store %arg11[%c0_34, %c32_35], %54 {strides = array<i32>} : memref<128x128xbf16, #tpu.memory_space<vmem>>, vector<128x32xbf16>,
    %c0_36 = arith.constant 0 : index
    %c64 = arith.constant 64 : index
    %56 = vector.load %arg10[%c0_36, %c64] : memref<128x512xbf16, #tpu.memory_space<vmem>>, vector<128x32xbf16>
    %c0_37 = arith.constant 0 : index
    %c192 = arith.constant 192 : index
    %57 = vector.load %arg10[%c0_37, %c192] : memref<128x512xbf16, #tpu.memory_space<vmem>>, vector<128x32xbf16>
    %c0_38 = arith.constant 0 : index
    %c320 = arith.constant 320 : index
    %58 = vector.load %arg10[%c0_38, %c320] : memref<128x512xbf16, #tpu.memory_space<vmem>>, vector<128x32xbf16>
    %cst_39 = arith.constant dense<0.000000e+00> : vector<128x128xf32>
    %59 = tpu.matmul %56, %57, %cst_39 {dimension_numbers = #tpu.dot_dimension_numbers<[1], [1], [0], [0], [0, 0, 1, 0], [], []>} : vector<128x32xbf16>, vector<128x32xbf16>, vector<128x128xf32> -> vector<128x128xf32>
    %cst_40 = arith.constant dense<0xFF800000> : vector<128xf32>
    %60 = vector.multi_reduction <maximumf>, %59, %cst_40 [1] : vector<128x128xf32> to vector<128xf32>
    %61 = vector.shape_cast %60 : vector<128xf32> to vector<128x1xf32>
    %62 = vector.broadcast %61 : vector<128x1xf32> to vector<128x128xf32>
    %63 = arith.subf %59, %62 : vector<128x128xf32>
    %64 = math.exp %63 : vector<128x128xf32>
    %cst_41 = arith.constant dense<0.000000e+00> : vector<128xf32>
    %65 = vector.multi_reduction <add>, %64, %cst_41 [1] : vector<128x128xf32> to vector<128xf32>
    %66 = vector.shape_cast %65 : vector<128xf32> to vector<128x1xf32>
    %67 = arith.truncf %64 : vector<128x128xf32> to vector<128x128xbf16>
    %cst_42 = arith.constant dense<0.000000e+00> : vector<128x32xf32>
    %68 = tpu.matmul %67, %58, %cst_42 {dimension_numbers = #tpu.dot_dimension_numbers<[1], [0], [0], [1], [0, 0, 1, 1], [], []>} : vector<128x128xbf16>, vector<128x32xbf16>, vector<128x32xf32> -> vector<128x32xf32>
    %69 = tpu.reciprocal %66 {approx = true} : vector<128x1xf32> -> vector<128x1xf32>
    %70 = vector.broadcast %69 : vector<128x1xf32> to vector<128x32xf32>
    %71 = arith.mulf %68, %70 : vector<128x32xf32>
    %72 = arith.truncf %71 : vector<128x32xf32> to vector<128x32xbf16>
    %c0_43 = arith.constant 0 : index
    %c64_44 = arith.constant 64 : index
    %73 = vector.load %arg11[%c0_43, %c64_44] : memref<128x128xbf16, #tpu.memory_space<vmem>>, vector<128x32xbf16>
    tpu.vector_store %arg11[%c0_43, %c64_44], %72 {strides = array<i32>} : memref<128x128xbf16, #tpu.memory_space<vmem>>, vector<128x32xbf16>,
    %c0_45 = arith.constant 0 : index
    %c96 = arith.constant 96 : index
    %74 = vector.load %arg10[%c0_45, %c96] : memref<128x512xbf16, #tpu.memory_space<vmem>>, vector<128x32xbf16>
    %c0_46 = arith.constant 0 : index
    %c224 = arith.constant 224 : index
    %75 = vector.load %arg10[%c0_46, %c224] : memref<128x512xbf16, #tpu.memory_space<vmem>>, vector<128x32xbf16>
    %c0_47 = arith.constant 0 : index
    %c352 = arith.constant 352 : index
    %76 = vector.load %arg10[%c0_47, %c352] : memref<128x512xbf16, #tpu.memory_space<vmem>>, vector<128x32xbf16>
    %cst_48 = arith.constant dense<0.000000e+00> : vector<128x128xf32>
    %77 = tpu.matmul %74, %75, %cst_48 {dimension_numbers = #tpu.dot_dimension_numbers<[1], [1], [0], [0], [0, 0, 1, 0], [], []>} : vector<128x32xbf16>, vector<128x32xbf16>, vector<128x128xf32> -> vector<128x128xf32>
    %cst_49 = arith.constant dense<0xFF800000> : vector<128xf32>
    %78 = vector.multi_reduction <maximumf>, %77, %cst_49 [1] : vector<128x128xf32> to vector<128xf32>
    %79 = vector.shape_cast %78 : vector<128xf32> to vector<128x1xf32>
    %80 = vector.broadcast %79 : vector<128x1xf32> to vector<128x128xf32>
    %81 = arith.subf %77, %80 : vector<128x128xf32>
    %82 = math.exp %81 : vector<128x128xf32>
    %cst_50 = arith.constant dense<0.000000e+00> : vector<128xf32>
    %83 = vector.multi_reduction <add>, %82, %cst_50 [1] : vector<128x128xf32> to vector<128xf32>
    %84 = vector.shape_cast %83 : vector<128xf32> to vector<128x1xf32>
    %85 = arith.truncf %82 : vector<128x128xf32> to vector<128x128xbf16>
    %cst_51 = arith.constant dense<0.000000e+00> : vector<128x32xf32>
    %86 = tpu.matmul %85, %76, %cst_51 {dimension_numbers = #tpu.dot_dimension_numbers<[1], [0], [0], [1], [0, 0, 1, 1], [], []>} : vector<128x128xbf16>, vector<128x32xbf16>, vector<128x32xf32> -> vector<128x32xf32>
    %87 = tpu.reciprocal %84 {approx = true} : vector<128x1xf32> -> vector<128x1xf32>
    %88 = vector.broadcast %87 : vector<128x1xf32> to vector<128x32xf32>
    %89 = arith.mulf %86, %88 : vector<128x32xf32>
    %90 = arith.truncf %89 : vector<128x32xf32> to vector<128x32xbf16>
    %c0_52 = arith.constant 0 : index
    %c96_53 = arith.constant 96 : index
    %91 = vector.load %arg11[%c0_52, %c96_53] : memref<128x128xbf16, #tpu.memory_space<vmem>>, vector<128x32xbf16>
    tpu.vector_store %arg11[%c0_52, %c96_53], %90 {strides = array<i32>} : memref<128x128xbf16, #tpu.memory_space<vmem>>, vector<128x32xbf16>,
    %c0_54 = arith.constant 0 : index
    %c0_55 = arith.constant 0 : index
    %92 = vector.load %arg11[%c0_54, %c0_55] : memref<128x128xbf16, #tpu.memory_space<vmem>>, vector<128x128xbf16>
    %c0_56 = arith.constant 0 : index
    %c0_57 = arith.constant 0 : index
    %93 = vector.load %arg6[%c0_56, %c0_57] : memref<128x128xbf16, #tpu.memory_space<vmem>>, vector<128x128xbf16>
    %cst_58 = arith.constant dense<0.000000e+00> : vector<128x128xf32>
    %94 = tpu.matmul %92, %93, %cst_58 {dimension_numbers = #tpu.dot_dimension_numbers<[1], [0], [0], [1], [0, 0, 1, 1], [], []>} : vector<128x128xbf16>, vector<128x128xbf16>, vector<128x128xf32> -> vector<128x128xf32>
    %c0_59 = arith.constant 0 : index
    %c0_60 = arith.constant 0 : index
    %95 = vector.load %arg7[%c0_59, %c0_60] : memref<1x128xf32, #tpu.memory_space<vmem>>, vector<1x128xf32>
    %96 = vector.broadcast %95 : vector<1x128xf32> to vector<128x128xf32>
    %97 = arith.addf %94, %96 : vector<128x128xf32>
    %c0_61 = arith.constant 0 : index
    %c0_62 = arith.constant 0 : index
    %c0_63 = arith.constant 0 : index
    %98 = vector.load %arg8[%c0_61, %c0_62, %c0_63] : memref<1x128x128xf32, #tpu.memory_space<vmem>>, vector<1x128x128xf32>
    %99 = vector.shape_cast %98 : vector<1x128x128xf32> to vector<128x128xf32>
    %100 = vector.shape_cast %97 : vector<128x128xf32> to vector<1x128x128xf32>
    tpu.vector_store %arg8[%c0_61, %c0_62, %c0_63], %100 {strides = array<i32>} : memref<1x128x128xf32, #tpu.memory_space<vmem>>, vector<1x128x128xf32>,
    return
  }
  func.func @transform_0(%arg0: i32) -> (i32, i32, i32) {
    %c0_i32 = arith.constant 0 : i32
    %c0_i32_0 = arith.constant 0 : i32
    %c0_i32_1 = arith.constant 0 : i32
    return %arg0, %c0_i32, %c0_i32_0 : i32, i32, i32
  }
  func.func @transform_1(%arg0: i32) -> (i32, i32) {
    %c0_i32 = arith.constant 0 : i32
    %c0_i32_0 = arith.constant 0 : i32
    %c0_i32_1 = arith.constant 0 : i32
    return %c0_i32, %c0_i32_0 : i32, i32
  }
  func.func @transform_2(%arg0: i32) -> (i32, i32) {
    %c0_i32 = arith.constant 0 : i32
    %c0_i32_0 = arith.constant 0 : i32
    %c0_i32_1 = arith.constant 0 : i32
    return %c0_i32, %c0_i32_0 : i32, i32
  }
  func.func @transform_3(%arg0: i32) -> (i32, i32) {
    %c0_i32 = arith.constant 0 : i32
    %c0_i32_0 = arith.constant 0 : i32
    %c0_i32_1 = arith.constant 0 : i32
    return %c0_i32, %c0_i32_0 : i32, i32
  }
  func.func @transform_4(%arg0: i32) -> (i32, i32) {
    %c0_i32 = arith.constant 0 : i32
    %c0_i32_0 = arith.constant 0 : i32
    %c0_i32_1 = arith.constant 0 : i32
    return %c0_i32, %c0_i32_0 : i32, i32
  }
  func.func @transform_5(%arg0: i32) -> (i32, i32) {
    %c0_i32 = arith.constant 0 : i32
    %c0_i32_0 = arith.constant 0 : i32
    %c0_i32_1 = arith.constant 0 : i32
    return %c0_i32, %c0_i32_0 : i32, i32
  }
  func.func @transform_6(%arg0: i32) -> (i32, i32) {
    %c0_i32 = arith.constant 0 : i32
    %c0_i32_0 = arith.constant 0 : i32
    %c0_i32_1 = arith.constant 0 : i32
    return %c0_i32, %c0_i32_0 : i32, i32
  }
  func.func @transform_7(%arg0: i32) -> (i32, i32, i32) {
    %c0_i32 = arith.constant 0 : i32
    %c0_i32_0 = arith.constant 0 : i32
    %c0_i32_1 = arith.constant 0 : i32
    return %arg0, %c0_i32, %c0_i32_0 : i32, i32, i32
  }
  func.func @transform_8(%arg0: i32) -> (i32, i32, i32) {
    %c0_i32 = arith.constant 0 : i32
    %c0_i32_0 = arith.constant 0 : i32
    %c0_i32_1 = arith.constant 0 : i32
    return %arg0, %c0_i32, %c0_i32_0 : i32, i32, i32
  }
}

</mosaic_0001>

<bundles_post_ra>
// kernel: tpu_custom_call.1
= control target key start
LH: loop header
LB: loop body
LE: loop exit
PB: predicated region body
PF: predicated region fallthrough
CT: control target
= control target key end

     0   :  { %s7124_s0 = inlined_call_operand.hbm [shape: f32[2,128,128], index: 0, kind: input, shape index: {}]   ;;  %s7125_s1 = inlined_call_operand.hbm [shape: bf16[128,512], index: 1, kind: input, shape index: {}]   ;;  %s7126_s2 = inlined_call_operand.hbm [shape: f32[1,512], index: 2, kind: input, shape index: {}]   ;;  %s7127_s3 = inlined_call_operand.hbm [shape: bf16[128,384], index: 3, kind: input, shape index: {}]   ;;  %s7128_s4 = inlined_call_operand.vmem [shape: f32[1,384], index: 4, kind: input, shape index: {}]   ;;  %s7129_s5 = inlined_call_operand.hbm [shape: bf16[128,128], index: 5, kind: input, shape index: {}]   ;;  %s7130_s6 = inlined_call_operand.vmem [shape: f32[1,128], index: 6, kind: input, shape index: {}]   ;;  %s7131_s7 = inlined_call_operand.hbm [shape: f32[2,128,128], index: 7, kind: output, shape index: {0}]   ;;  %s7132_s8 = inlined_call_operand.hbm [shape: bf16[2,128,384], index: 8, kind: output, shape index: {1}]  }
   0x1   :  { %7137 = sst [smem:[#allocation32_spill]] %s7124_s0 }
   0x2   :  { %7138 = sst [smem:[#allocation33_spill]] %s7125_s1 }
   0x3   :  { %7139 = sst [smem:[#allocation34_spill]] %s7126_s2 }
   0x4   :  { %7140 = sst [smem:[#allocation35_spill]] %s7127_s3 }
   0x5   :  { %14 = vsyncpa [#allocation5], 0 }
   0x6   :  { %16 = vsyncpa [#allocation5 + $0x1], 0 }
   0x7   :  { %17 = vsyncpa [#allocation8], 0 }
   0x8   :  { %18 = vsyncpa [#allocation11], 0 }
   0x9   :  { %19 = vsyncpa [#allocation6], 0 }
   0xa   :  { %21 = vsyncpa [#allocation6 + $0x1], 0 }
   0xb   :  { %22 = vsyncpa [#allocation15], 0 }
   0xc   :  { %24 = vsyncpa [#allocation15 + $0x1], 0  ;;  %s5699_s27 = smov 0   ;;  %s5701_s28 = smov 0  }
   0xd   :  { %s5703_s29 = smov 0   ;;  %s5705_s30 = smov 0  }
   0xe LB: > { %s5720_s9 = sadd.s32 4294967295, %s5633_s30   ;;  %s4074_s10 = sadd.s32 4294967294, %s5633_s30   ;;  %s5633_s30 = sphi %s5705_s30, %s7199_s30   ;;  %s5629_s29 = sphi %s5703_s29, %s7198_s29   ;;  %s5625_s28 = sphi %s5701_s28, %s7197_s28   ;;  %s5621_s27 = sphi %s5699_s27, %s7196_s27  }
   0xf   : > { %p50_p0 = scmp.ne.s32.totalorder %s5625_s28, %s5621_s27  ;;  %p51_p1 = scmp.eq.s32.totalorder %s5720_s9, 0 }
  0x10   : > { %p200_p2 = scmp.eq.s32.totalorder %s5720_s9, 1  ;;  %p206_p3 = scmp.eq.s32.totalorder %s4074_s10, 1 }
  0x11   : > { %p5729_p4 = por %p51_p1, %p50_p0  ;;  %p4075_p5 = scmp.ge.s32.totalorder %s5633_s30, 1 }
  0x12   : > { %p5734_p6 = por %p206_p3, %p50_p0  ;;  %p239_p7 = scmp.lt.s32.totalorder %s5633_s30, 3 }
  0x13   : > { %s7143_s1 = sld [smem:[#allocation33_spill]]  ;;  %s5635_s17 = smov [#allocation7]  }
  0x14   : > { %p5742_p8 = pnand %p4075_p5, %p239_p7  ;;  %s252_s18 = sshll.u32 %s5635_s17, 4  ;;  %s253_s18 = int_to_ptr.vmem [resolvable:$true] %s252_s18 }
  0x15   : > { %s7146_s3 = sld [smem:[#allocation35_spill]]  ;;  %s5636_s23 = smov 256  }
  0x16   : > { %p5035_p9 = pneg %p5742_p8  ;;  %s5637_s24 = smov 16  }
  0x17   : > { %s5638_s25 = smov [#allocation10]   ;;  %s5639_s10 = smov 192  }
  0x18   : > { %p5750_p10 = pnand %p5035_p9, %p51_p1  ;;  %s278_s26 = sshll.u32 %s5638_s25, 4  ;;  %s279_s26 = int_to_ptr.vmem [resolvable:$true] %s278_s26 }
  0x19   : > { %s250_s15 = sshll.u32 %s7143_s1, 4  ;;  %s5640_s13 = smov 12   ;;  %s251_s15 = int_to_ptr.hbm [resolvable:$true] %s250_s15 }
  0x1a   : > { %5038 = dma.hbm_to_vmem [thread:$0]  (!%p5750_p10), %s251_s15, 4096, %s253_s18, [#allocation8], %s5636_s23, %s5636_s23, %s5637_s24  }
  0x1b   : > { %s276_s22 = sshll.u32 %s7146_s3, 4  ;;  %s7147_s2 = sld [smem:[#allocation34_spill]]  ;;  %s277_s22 = int_to_ptr.hbm [resolvable:$true] %s276_s22 }
  0x1c   : > { %5044 = dma.hbm_to_vmem [thread:$0]  (!%p5750_p10), %s277_s22, 3072, %s279_s26, [#allocation11], %s5639_s10, %s5639_s10, %s5640_s13  }
  0x1d   : > { %s5641_s21 = smov [#allocation9]   ;;  %s293_s24 = sshll.u32 %s7129_s5, 4  ;;  %s294_s24 = int_to_ptr.hbm [resolvable:$true] %s293_s24 }
  0x1e   : > { %s267_s15 = sshll.u32 %s5641_s21, 4  ;;  %s5642_s22 = smov [#allocation12]   ;;  %s268_s15 = int_to_ptr.vmem [resolvable:$true] %s267_s15 }
  0x1f   : > { %s295_s25 = sshll.u32 %s5642_s22, 4  ;;  %s5643_s26 = smov 64   ;;  %s296_s25 = int_to_ptr.vmem [resolvable:$true] %s295_s25 }
  0x20   : > { %s5644_s10 = smov 4   ;;  %s5773_s13 = sadd.s32 1, %s5633_s30  }
  0x21   : > { %s265_s20 = sshll.u32 %s7147_s2, 4  ;;  %s34_s14 = ssub.s32 %s5633_s30, %s5773_s13  ;;  %s266_s20 = int_to_ptr.hbm [resolvable:$true] %s265_s20 }
  0x22   : > { %5041 = dma.hbm_to_vmem [thread:$0]  (!%p5750_p10), %s266_s20, 64, %s268_s15, [#allocation8]  }
  0x23   : > { %5047 = dma.hbm_to_vmem [thread:$0]  (!%p5750_p10), %s294_s24, 1024, %s296_s25, [#allocation11], %s5643_s26, %s5643_s26, %s5644_s10  }
  0x24   : > { %p35_p12 = scmp.eq.s32.totalorder %s34_s14, 0  ;;  %s37_s17 = sadd.s32 1, %s5629_s29 }
  0x25   : > { %p44_p13 = scmp.ne.s32.totalorder %s5629_s29, %s5625_s28  ;;  %p45_p0 = scmp.eq.s32.totalorder %s5633_s30, 0 }
  0x26   : > { %s5782_s20 = scalar_select %p35_p12, %s5629_s29, %s37_s17  }
  0x27   : > { %p46_p3 = por %p45_p0, %p44_p13  ;;  %p5786_p5 = por %p200_p2, %p44_p13 }
  0x28   : > { %p5063_p7 = scmp.lt.s32.totalorder %s5633_s30, 2  ;;  %s312_s15 = sand.u32 1, %s5629_s29  }
  0x29   : > { %s4081_s19 = sshll.u32 %s312_s15, 7  ;;  %s4833_s18 = sshll.u32 %s5633_s30, 7 }
  0x2a   : > { %s7149_s0 = sld [smem:[#allocation32_spill]]  ;;  %s316_s25 = scalar_lea.vmem [#allocation4], %s4081_s19 }
  0x2b   : > { %s324_s26 = sshll.u32 %s316_s25, 4  ;;  %p5796_p9 = pnand %p5063_p7, %p46_p3  ;;  %s325_s26 = int_to_ptr.vmem [resolvable:$true] %s324_s26 }
  0x2c   : > { %s313_s17 = scalar_lea.sflag [#allocation5], %s312_s15 }
  0x2d   : > { %p5501_p10 = pneg %p5796_p9 }
  0x30   : > { %s321_s22 = scalar_lea.hbm %s7149_s0, %s4833_s18  ;;  %s5504_s23 = scalar_lea.hbm %s7149_s0, 256 }
  0x31   : > { %s322_s10 = sshll.u32 %s321_s22, 4  ;;  %s323_s10 = int_to_ptr.hbm [resolvable:$true] %s322_s10 }
  0x32   : > { %s5497_s1 = sshra.s32 %s323_s10, 4  ;;  %s5498_s1 = int_to_ptr.hbm [resolvable:$true] %s5497_s1 }
  0x33   : > { %s5499_s2 = scalar_lea.hbm %s5498_s1, 128  ;;  %p5505_p0 = scmp.lt.s32.totalorder %s5498_s1, %s7149_s0 }
  0x34   : > { %p5500_p2 = scmp.ne.s32.totalorder %s5498_s1, %s5499_s2  ;;  %p5506_p3 = scmp.lt.s32.totalorder %s5504_s23, %s5499_s2 }
  0x36   : > { %p5502_p12 = pnand %p5501_p10, %p5500_p2  ;;  %p5507_p7 = por %p5506_p3, %p5505_p0 }
  0x38   : > { %p5503_p13 = pneg %p5502_p12 }
  0x3a   : > { %p5508_p11 = pnand %p5507_p7, %p5503_p13 }
  0x3c   : > { %5511 = shalt.err (!%p5508_p11)
}
  0x3d   : > { %s5645_s15 = smov 128   ;;  %s5646_s25 = smov 8  }
  0x3e   : > { %5051 = dma.hbm_to_vmem [thread:$0]  (!%p5796_p9), %s323_s10, 2048, %s325_s26, %s313_s17, %s5645_s15, %s5645_s15, %s5646_s25  }
  0x3f   : > { %336 = sbr.rel (%p5742_p8) target bundleno = 1812 (0x714), region = 48 }
  0x44   : > { %s5813_s18 = sand.u32 1, %s5625_s28  }
  0x45   : > { %s4085_s1 = sshll.u32 %s5813_s18, 7  ;;  %s339_s2 = scalar_lea.sflag [#allocation5], %s5813_s18 }
  0x46   : > { %s5819_s19 = scalar_lea.vmem [#allocation4], %s4085_s1 }
  0x47   : > { %5600 = dma.done.wait (%p5729_p4), %s339_s2, 2048  }
  0x48   : > { %5602 = vsyncadd (%p5729_p4), %s339_s2, 4294965248 }
  0x49   : > { %5604 = dma.done.wait (%p51_p1), [#allocation8], 4160  }
  0x4a   : > { %5606 = vsyncadd (%p51_p1), [#allocation8], 4294963136 }
  0x4b   : > { %5608 = dma.done.wait (%p51_p1), [#allocation11], 4096  }
  0x4c   : > { %5610 = vsyncadd (%p51_p1), [#allocation11], 4294963200  ;;  %v4205_v0 = vld [vmem:[#allocation7 + $0xe0] sm:$0xf]  ;;  %v4864_v1 = vld [vmem:[#allocation7 + $0xec] sm:$0xf0] }
  0x4d   : > { %v4862_v2 = vld [vmem:[#allocation7 + $0xe4] sm:$0xf]  ;;  %v4206_v3 = vor.u32 %v4864_v1, %v4205_v0  ;;  %v4207_v4 = vld [vmem:[#allocation7 + $0xf0] sm:$0xf0]  ;;  %v4213_v5 = vld [vmem:[#allocation7 + $0xe8] sm:$0xf] }
  0x4e   : > { %v4865_v6 = vld [vmem:[#allocation7 + $0xf4] sm:$0xf0]  ;;  %v4210_v7 = vor.u32 %v4862_v2, %v4207_v4  ;;  %v4863_v9 = vld [vmem:[#allocation7 + $0xec] sm:$0xf]  ;;  %v4215_v10 = vld [vmem:[#allocation7 + $0xf8] sm:$0xf0] }
  0x4f   : > { %v4214_v8 = vor.u32 %v4865_v6, %v4213_v5  ;;  %v4189_v11 = vld [vmem:[#allocation7 + $0xc0] sm:$0xf]  ;;  %627 = vmatpush.bf16.msra.mxu0 %v4206_v3  ;;  %v4218_v12 = vor.u32 %v4863_v9, %v4215_v10  ;;  %v4860_v13 = vld [vmem:[#allocation7 + $0xcc] sm:$0xf0]  ;;  %v4858_v14 = vld [vmem:[#allocation7 + $0xc4] sm:$0xf] }
  0x50   : > { %v4191_v15 = vld [vmem:[#allocation7 + $0xd0] sm:$0xf0]  ;;  %676 = vmatpush.bf16.msra.mxu1 %v4210_v7  ;;  %v4190_v16 = vor.u32 %v4860_v13, %v4189_v11  ;;  %v4197_v18 = vld [vmem:[#allocation7 + $0xc8] sm:$0xf]  ;;  %v4861_v19 = vld [vmem:[#allocation7 + $0xd4] sm:$0xf0] }
  0x51   : > { %725 = vmatpush.bf16.msra.mxu2 %v4214_v8  ;;  %v4194_v17 = vor.u32 %v4858_v14, %v4191_v15  ;;  %v4859_v20 = vld [vmem:[#allocation7 + $0xcc] sm:$0xf]  ;;  %774 = vmatpush.bf16.msra.mxu3 %v4218_v12  ;;  %v4198_v21 = vor.u32 %v4861_v19, %v4197_v18  ;;  %v4199_v22 = vld [vmem:[#allocation7 + $0xd8] sm:$0xf0]  ;;  %v4173_v23 = vld [vmem:[#allocation7 + $0xa0] sm:$0xf] }
  0x52   : > { %v4856_v24 = vld [vmem:[#allocation7 + $0xac] sm:$0xf0]  ;;  %v4202_v25 = vor.u32 %v4859_v20, %v4199_v22  ;;  %v4854_v26 = vld [vmem:[#allocation7 + $0xa4] sm:$0xf]  ;;  %v4175_v27 = vld [vmem:[#allocation7 + $0xb0] sm:$0xf0] }
  0x53   : > { %v4181_v28 = vld [vmem:[#allocation7 + $0xa8] sm:$0xf]  ;;  %628 = vmatpush.bf16.msra.mxu0 %v4190_v16  ;;  %v4174_v29 = vor.u32 %v4856_v24, %v4173_v23  ;;  %v4857_v30 = vld [vmem:[#allocation7 + $0xb4] sm:$0xf0]  ;;  %v4855_v31 = vld [vmem:[#allocation7 + $0xac] sm:$0xf]  ;;  %v4178_v33 = vor.u32 %v4854_v26, %v4175_v27 }
  0x54   : > { %v4183_v32 = vld [vmem:[#allocation7 + $0xb8] sm:$0xf0]  ;;  %677 = vmatpush.bf16.msra.mxu1 %v4194_v17  ;;  %v4182_v34 = vor.u32 %v4857_v30, %v4181_v28  ;;  %v4157_v35 = vld [vmem:[#allocation7 + $0x80] sm:$0xf]  ;;  %v4852_v36 = vld [vmem:[#allocation7 + $0x8c] sm:$0xf0] }
  0x55   : > { %726 = vmatpush.bf16.msra.mxu2 %v4198_v21  ;;  %v4850_v37 = vld [vmem:[#allocation7 + $0x84] sm:$0xf]  ;;  %775 = vmatpush.bf16.msra.mxu3 %v4202_v25  ;;  %v4186_v38 = vor.u32 %v4855_v31, %v4183_v32  ;;  %v4159_v39 = vld [vmem:[#allocation7 + $0x90] sm:$0xf0]  ;;  %v4165_v40 = vld [vmem:[#allocation7 + $0x88] sm:$0xf]  ;;  %v4158_v44 = vor.u32 %v4852_v36, %v4157_v35 }
  0x56   : > { %v4853_v41 = vld [vmem:[#allocation7 + $0x94] sm:$0xf0]  ;;  %v4851_v42 = vld [vmem:[#allocation7 + $0x8c] sm:$0xf]  ;;  %v4167_v43 = vld [vmem:[#allocation7 + $0x98] sm:$0xf0]  ;;  %v4162_v45 = vor.u32 %v4850_v37, %v4159_v39 }
  0x57   : > { %629 = vmatpush.bf16.msra.mxu0 %v4174_v29  ;;  %v4166_v46 = vor.u32 %v4853_v41, %v4165_v40  ;;  %v4141_v47 = vld [vmem:[#allocation7 + $0x60] sm:$0xf]  ;;  %v4848_v48 = vld [vmem:[#allocation7 + $0x6c] sm:$0xf0]  ;;  %v4846_v49 = vld [vmem:[#allocation7 + $0x64] sm:$0xf]  ;;  %v4170_v50 = vor.u32 %v4851_v42, %v4167_v43 }
  0x58   : > { %678 = vmatpush.bf16.msra.mxu1 %v4178_v33  ;;  %v4143_v51 = vld [vmem:[#allocation7 + $0x70] sm:$0xf0]  ;;  %v4149_v52 = vld [vmem:[#allocation7 + $0x68] sm:$0xf]  ;;  %v4849_v53 = vld [vmem:[#allocation7 + $0x74] sm:$0xf0]  ;;  %v4142_v56 = vor.u32 %v4848_v48, %v4141_v47 }
  0x59   : > { %727 = vmatpush.bf16.msra.mxu2 %v4182_v34  ;;  %776 = vmatpush.bf16.msra.mxu3 %v4186_v38  ;;  %v4847_v54 = vld [vmem:[#allocation7 + $0x6c] sm:$0xf]  ;;  %v4151_v55 = vld [vmem:[#allocation7 + $0x78] sm:$0xf0]  ;;  %v4146_v57 = vor.u32 %v4846_v49, %v4143_v51  ;;  %v4150_v58 = vor.u32 %v4849_v53, %v4149_v52  ;;  %v4125_v59 = vld [vmem:[#allocation7 + $0x40] sm:$0xf] }
  0x5a   : > { %v4844_v60 = vld [vmem:[#allocation7 + $0x4c] sm:$0xf0]  ;;  %v4842_v61 = vld [vmem:[#allocation7 + $0x44] sm:$0xf]  ;;  %v4154_v62 = vor.u32 %v4847_v54, %v4151_v55  ;;  %v4127_v63 = vld [vmem:[#allocation7 + $0x50] sm:$0xf0] }
  0x5b   : > { %630 = vmatpush.bf16.msra.mxu0 %v4158_v44  ;;  %v4133_v0 = vld [vmem:[#allocation7 + $0x48] sm:$0xf]  ;;  %v4845_v1 = vld [vmem:[#allocation7 + $0x54] sm:$0xf0]  ;;  %v4843_v2 = vld [vmem:[#allocation7 + $0x4c] sm:$0xf]  ;;  %v4126_v4 = vor.u32 %v4844_v60, %v4125_v59  ;;  %v4130_v5 = vor.u32 %v4842_v61, %v4127_v63 }
  0x5c   : > { %679 = vmatpush.bf16.msra.mxu1 %v4162_v45  ;;  %v4135_v3 = vld [vmem:[#allocation7 + $0x58] sm:$0xf0]  ;;  %v4134_v6 = vor.u32 %v4845_v1, %v4133_v0  ;;  %v4109_v7 = vld [vmem:[#allocation7 + $0x20] sm:$0xf]  ;;  %v4840_v8 = vld [vmem:[#allocation7 + $0x2c] sm:$0xf0] }
  0x5d   : > { %728 = vmatpush.bf16.msra.mxu2 %v4166_v46  ;;  %777 = vmatpush.bf16.msra.mxu3 %v4170_v50  ;;  %v4838_v9 = vld [vmem:[#allocation7 + $0x24] sm:$0xf]  ;;  %v4138_v10 = vor.u32 %v4843_v2, %v4135_v3  ;;  %v4111_v11 = vld [vmem:[#allocation7 + $0x30] sm:$0xf0]  ;;  %v4117_v12 = vld [vmem:[#allocation7 + $0x28] sm:$0xf]  ;;  %v4110_v16 = vor.u32 %v4840_v8, %v4109_v7 }
  0x5e   : > { %v4841_v13 = vld [vmem:[#allocation7 + $0x34] sm:$0xf0]  ;;  %v4839_v14 = vld [vmem:[#allocation7 + $0x2c] sm:$0xf]  ;;  %v4119_v15 = vld [vmem:[#allocation7 + $0x38] sm:$0xf0]  ;;  %v4114_v17 = vor.u32 %v4838_v9, %v4111_v11 }
  0x5f   : > { %631 = vmatpush.bf16.msra.mxu0 %v4142_v56  ;;  %v4118_v18 = vor.u32 %v4841_v13, %v4117_v12  ;;  %v4093_v19 = vld [vmem:[#allocation7] sm:$0xf]  ;;  %v4836_v20 = vld [vmem:[#allocation7 + $0xc] sm:$0xf0]  ;;  %v4834_v21 = vld [vmem:[#allocation7 + $0x4] sm:$0xf]  ;;  %v4122_v22 = vor.u32 %v4839_v14, %v4119_v15 }
  0x60   : > { %680 = vmatpush.bf16.msra.mxu1 %v4146_v57  ;;  %v4095_v23 = vld [vmem:[#allocation7 + $0x10] sm:$0xf0]  ;;  %v4101_v24 = vld [vmem:[#allocation7 + $0x8] sm:$0xf]  ;;  %v4837_v25 = vld [vmem:[#allocation7 + $0x14] sm:$0xf0]  ;;  %v4094_v28 = vor.u32 %v4836_v20, %v4093_v19 }
  0x61   : > { %729 = vmatpush.bf16.msra.mxu2 %v4150_v58  ;;  %778 = vmatpush.bf16.msra.mxu3 %v4154_v62  ;;  %v4835_v26 = vld [vmem:[#allocation7 + $0xc] sm:$0xf]  ;;  %v4103_v27 = vld [vmem:[#allocation7 + $0x18] sm:$0xf0]  ;;  %v401_v29 = vld [vmem:[%s5819_s19] sm:$0xff]  ;;  %v4098_v31 = vor.u32 %v4834_v21, %v4095_v23  ;;  %v4102_v32 = vor.u32 %v4837_v25, %v4101_v24  ;;  %s5647_s11 = smov 32  }
  0x62   : > { %v402_v30 = vld [vmem:[%s5819_s19 + $0x8] sm:$0xff]  ;;  %v4106_v33 = vor.u32 %v4835_v26, %v4103_v27  ;;  %v403_v35 = vld [vmem:[%s5819_s19 + $0x10] sm:$0xff]  ;;  %v404_v36 = vld [vmem:[%s5819_s19 + $0x18] sm:$0xff]  ;;  %s5648_s16 = smov 96   ;;  %s5649_s26 = smov 64   ;;  %vm1458_vm0 = vcmask 261120  }
  0x63   : > { %632 = vmatpush.bf16.msra.mxu0 %v4126_v4  ;;  %v417_v34 = vpack.c.bf16 %v402_v30, %v401_v29  ;;  %v418_v37 = vpack.c.bf16 %v404_v36, %v403_v35  ;;  %v405_v38 = vld [vmem:[%s5819_s19 + $0x20] sm:$0xff]  ;;  %v406_v39 = vld [vmem:[%s5819_s19 + $0x28] sm:$0xff]  ;;  %v407_v41 = vld [vmem:[%s5819_s19 + $0x30] sm:$0xff]  ;;  %s5011_s17 = smul.u32 192, %s5813_s18  ;;  %vm1821_vm1 = vcmask 257024   ;;  %vm2440_vm2 = vcmask 519424  }
  0x64   : > { %681 = vmatpush.bf16.msra.mxu1 %v4130_v5  ;;  %v419_v40 = vpack.c.bf16 %v406_v39, %v405_v38  ;;  %v408_v42 = vld [vmem:[%s5819_s19 + $0x38] sm:$0xff]  ;;  %v409_v44 = vld [vmem:[%s5819_s19 + $0x40] sm:$0xff]  ;;  %v410_v45 = vld [vmem:[%s5819_s19 + $0x48] sm:$0xff]  ;;  %vm3059_vm3 = vcmask 781824   ;;  %vm3678_vm4 = vcmask 1044224   ;;  %s7001_s15 = scalar_lea.vmem [#allocation13], %s4085_s1 }
  0x65   : > { %730 = vmatpush.bf16.msra.mxu2 %v4134_v6  ;;  %779 = vmatpush.bf16.msra.mxu3 %v4138_v10  ;;  %v420_v43 = vpack.c.bf16 %v408_v42, %v407_v41  ;;  %v421_v46 = vpack.c.bf16 %v410_v45, %v409_v44  ;;  %v411_v47 = vld [vmem:[%s5819_s19 + $0x50] sm:$0xff]  ;;  %v412_v48 = vld [vmem:[%s5819_s19 + $0x58] sm:$0xff]  ;;  %v4337_v50 = vld [vmem:[#allocation10 + $0xa8] sm:$0xf]  ;;  %s6014_s23 = scalar_lea.vmem [#allocation14], %s5011_s17  ;;  %s5012_s25 = smul.u32 192, %s5720_s9 }
  0x66   : > { %v422_v49 = vpack.c.bf16 %v412_v48, %v411_v47  ;;  %v4896_v51 = vld [vmem:[#allocation10 + $0xb0] sm:$0xf0]  ;;  %v4895_v52 = vld [vmem:[#allocation10 + $0xac] sm:$0xf]  ;;  %v4339_v54 = vld [vmem:[#allocation10 + $0xb4] sm:$0xf0] }
  0x67   : > { %633 = vmatpush.bf16.msra.mxu0 %v4110_v16  ;;  %v4338_v53 = vor.u32 %v4896_v51, %v4337_v50  ;;  %v4345_v55 = vld [vmem:[#allocation10 + $0xb0] sm:$0xf]  ;;  %v4897_v56 = vld [vmem:[#allocation10 + $0xb8] sm:$0xf0]  ;;  %v4342_v57 = vor.u32 %v4895_v52, %v4339_v54  ;;  %v414_v60 = vld [vmem:[%s5819_s19 + $0x68] sm:$0xff]  ;;  %s5547_s22 = scalar_lea.hbm %s7132_s8, 384 }
  0x68   : > { %682 = vmatpush.bf16.msra.mxu1 %v4114_v17  ;;  %v4346_v58 = vor.u32 %v4897_v56, %v4345_v55  ;;  %v413_v59 = vld [vmem:[%s5819_s19 + $0x60] sm:$0xff]  ;;  %v4325_v62 = vld [vmem:[#allocation10 + $0x90] sm:$0xf]  ;;  %v4892_v1 = vld [vmem:[#allocation10 + $0x94] sm:$0xf] }
  0x69   : > { %731 = vmatpush.bf16.msra.mxu2 %v4118_v18  ;;  %780 = vmatpush.bf16.msra.mxu3 %v4122_v22  ;;  %v423_v61 = vpack.c.bf16 %v414_v60, %v413_v59  ;;  %v4893_v63 = vld [vmem:[#allocation10 + $0x98] sm:$0xf0]  ;;  %v4327_v2 = vld [vmem:[#allocation10 + $0x9c] sm:$0xf0]  ;;  %v4333_v3 = vld [vmem:[#allocation10 + $0x98] sm:$0xf] }
  0x6a   : > { %v4326_v0 = vor.u32 %v4893_v63, %v4325_v62  ;;  %v4330_v4 = vor.u32 %v4892_v1, %v4327_v2  ;;  %v4894_v5 = vld [vmem:[#allocation10 + $0xa0] sm:$0xf0]  ;;  %v4313_v7 = vld [vmem:[#allocation10 + $0x78] sm:$0xf]  ;;  %v4889_v9 = vld [vmem:[#allocation10 + $0x7c] sm:$0xf] }
  0x6b   : > { %634 = vmatpush.bf16.msra.mxu0 %v4094_v28  ;;  %v4334_v6 = vor.u32 %v4894_v5, %v4333_v3  ;;  %v4890_v8 = vld [vmem:[#allocation10 + $0x80] sm:$0xf0]  ;;  %v4315_v11 = vld [vmem:[#allocation10 + $0x84] sm:$0xf0]  ;;  %v4321_v12 = vld [vmem:[#allocation10 + $0x80] sm:$0xf] }
  0x6c   : > { %683 = vmatpush.bf16.msra.mxu1 %v4098_v31  ;;  %v4314_v10 = vor.u32 %v4890_v8, %v4313_v7  ;;  %v4318_v13 = vor.u32 %v4889_v9, %v4315_v11  ;;  %v4891_v14 = vld [vmem:[#allocation10 + $0x88] sm:$0xf0]  ;;  %v4301_v16 = vld [vmem:[#allocation10 + $0x60] sm:$0xf]  ;;  %v4886_v18 = vld [vmem:[#allocation10 + $0x64] sm:$0xf] }
  0x6d   : > { %732 = vmatpush.bf16.msra.mxu2 %v4102_v32  ;;  %781 = vmatpush.bf16.msra.mxu3 %v4106_v33  ;;  %v4322_v15 = vor.u32 %v4891_v14, %v4321_v12  ;;  %v4887_v17 = vld [vmem:[#allocation10 + $0x68] sm:$0xf0]  ;;  %v4303_v20 = vld [vmem:[#allocation10 + $0x6c] sm:$0xf0]  ;;  %v4309_v21 = vld [vmem:[#allocation10 + $0x68] sm:$0xf] }
  0x6e   : > { %635 = vmatmul.bf16.vlgmr.msra.gmra.mxu0 %v417_v34  ;;  %v4302_v19 = vor.u32 %v4887_v17, %v4301_v16  ;;  %v4888_v22 = vld [vmem:[#allocation10 + $0x70] sm:$0xf0]  ;;  %v4306_v23 = vor.u32 %v4886_v18, %v4303_v20  ;;  %v415_v25 = vld [vmem:[%s5819_s19 + $0x70] sm:$0xff]  ;;  %v4289_v27 = vld [vmem:[#allocation10 + $0x48] sm:$0xf] }
  0x6f   : > { %684 = vmatmul.bf16.vlgmr.msra.gmra.mxu1 %v417_v34  ;;  %1119 = vmatpush.bf16.msrb.mxu0 %v4338_v53  ;;  %v4310_v24 = vor.u32 %v4888_v22, %v4309_v21  ;;  %v416_v26 = vld [vmem:[%s5819_s19 + $0x78] sm:$0xff]  ;;  %v4883_v29 = vld [vmem:[#allocation10 + $0x4c] sm:$0xf]  ;;  %v4297_v32 = vld [vmem:[#allocation10 + $0x50] sm:$0xf]  ;;  %s3926_s19 = scalar_lea.hbm %s7132_s8, %s5012_s25 }
  0x70   : > { %733 = vmatmul.bf16.vlgmr.msra.gmra.mxu2 %v417_v34  ;;  %782 = vmatmul.bf16.vlgmr.msra.gmra.mxu3 %v417_v34  ;;  %v4884_v28 = vld [vmem:[#allocation10 + $0x50] sm:$0xf0]  ;;  %v4291_v31 = vld [vmem:[#allocation10 + $0x54] sm:$0xf0]  ;;  %v4885_v33 = vld [vmem:[#allocation10 + $0x58] sm:$0xf0]  ;;  %v424_v34 = vpack.c.bf16 %v416_v26, %v415_v25 }
  0x71   : > { %1168 = vmatpush.bf16.msrb.mxu1 %v4342_v57  ;;  %1217 = vmatpush.bf16.msrb.mxu2 %v4346_v58  ;;  %v4290_v30 = vor.u32 %v4884_v28, %v4289_v27  ;;  %v4294_v35 = vor.u32 %v4883_v29, %v4291_v31  ;;  %v4298_v36 = vor.u32 %v4885_v33, %v4297_v32  ;;  %v4881_v38 = vld [vmem:[#allocation10 + $0x38] sm:$0xf0]  ;;  %v4880_v39 = vld [vmem:[#allocation10 + $0x34] sm:$0xf]  ;;  %v4279_v41 = vld [vmem:[#allocation10 + $0x3c] sm:$0xf0] }
  0x72   : > { %v4285_v42 = vld [vmem:[#allocation10 + $0x38] sm:$0xf]  ;;  %v4282_v44 = vor.u32 %v4880_v39, %v4279_v41  ;;  %v4878_v47 = vld [vmem:[#allocation10 + $0x20] sm:$0xf0]  ;;  %v4877_v48 = vld [vmem:[#allocation10 + $0x1c] sm:$0xf] }
  0x73   : > { %1120 = vmatpush.bf16.msrb.mxu0 %v4326_v0  ;;  %v4267_v50 = vld [vmem:[#allocation10 + $0x24] sm:$0xf0]  ;;  %v4273_v51 = vld [vmem:[#allocation10 + $0x20] sm:$0xf]  ;;  %v4879_v52 = vld [vmem:[#allocation10 + $0x28] sm:$0xf0] }
  0x74   : > { %v4270_v53 = vor.u32 %v4877_v48, %v4267_v50  ;;  %v4274_v54 = vor.u32 %v4879_v52, %v4273_v51  ;;  %v457_v55 = vld [vmem:[#allocation9] sm:$0xf]  ;;  %v4253_v56 = vld [vmem:[#allocation10] sm:$0xf]  ;;  %v4875_v57 = vld [vmem:[#allocation10 + $0x8] sm:$0xf0] }
  0x75   : > { %1169 = vmatpush.bf16.msrb.mxu1 %v4330_v4  ;;  %1218 = vmatpush.bf16.msrb.mxu2 %v4334_v6  ;;  %v4874_v58 = vld [vmem:[#allocation10 + $0x4] sm:$0xf]  ;;  %v4254_v59 = vor.u32 %v4875_v57, %v4253_v56  ;;  %v4255_v60 = vld [vmem:[#allocation10 + $0xc] sm:$0xf0]  ;;  %v4876_v62 = vld [vmem:[#allocation10 + $0x10] sm:$0xf0] }
  0x76   : > { %v4258_v63 = vor.u32 %v4874_v58, %v4255_v60  ;;  %v5849_v1 = vperm.slane %v457_v55, 0  ;;  %v5851_v2 = vperm.slane %v457_v55, 1  ;;  %v5855_v8 = vperm.slane %v457_v55, 2 }
  0x77   : > { %1121 = vmatpush.bf16.msrb.mxu0 %v4314_v10  ;;  %v5857_v9 = vperm.slane %v457_v55, 3 }
  0x79   : > { %1170 = vmatpush.bf16.msrb.mxu1 %v4318_v13  ;;  %1219 = vmatpush.bf16.msrb.mxu2 %v4322_v15 }
  0x7b   : > { %1122 = vmatpush.bf16.msrb.mxu0 %v4302_v19 }
  0x7d   : > { %1171 = vmatpush.bf16.msrb.mxu1 %v4306_v23  ;;  %1220 = vmatpush.bf16.msrb.mxu2 %v4310_v24 }
  0x7e   : > { %640 = vmatmul.bf16.gmra.mxu0 %v418_v37 }
  0x7f   : > { %689 = vmatmul.bf16.gmra.mxu1 %v418_v37  ;;  %1123 = vmatpush.bf16.msrb.mxu0 %v4290_v30 }
  0x80   : > { %738 = vmatmul.bf16.gmra.mxu2 %v418_v37  ;;  %787 = vmatmul.bf16.gmra.mxu3 %v418_v37  ;;  %v4277_v37 = vld [vmem:[#allocation10 + $0x30] sm:$0xf] }
  0x81   : > { %1172 = vmatpush.bf16.msrb.mxu1 %v4294_v35  ;;  %1221 = vmatpush.bf16.msrb.mxu2 %v4298_v36 }
  0x85   : > { %1173 = vmatpush.bf16.msrb.mxu1 %v4282_v44 }
  0x89   : > { %1174 = vmatpush.bf16.msrb.mxu1 %v4270_v53 }
  0x8d   : > { %1175 = vmatpush.bf16.msrb.mxu1 %v4258_v63 }
  0x8e   : > { %645 = vmatmul.bf16.gmra.mxu0 %v419_v40 }
  0x8f   : > { %694 = vmatmul.bf16.gmra.mxu1 %v419_v40 }
  0x90   : > { %743 = vmatmul.bf16.gmra.mxu2 %v419_v40  ;;  %792 = vmatmul.bf16.gmra.mxu3 %v419_v40  ;;  %v4278_v40 = vor.u32 %v4881_v38, %v4277_v37 }
  0x92   : > { %1124 = vmatpush.bf16.msrb.mxu0 %v4278_v40 }
  0x9e   : > { %650 = vmatmul.bf16.gmra.mxu0 %v420_v43 }
  0x9f   : > { %699 = vmatmul.bf16.gmra.mxu1 %v420_v43 }
  0xa0   : > { %748 = vmatmul.bf16.gmra.mxu2 %v420_v43  ;;  %797 = vmatmul.bf16.gmra.mxu3 %v420_v43  ;;  %v4882_v43 = vld [vmem:[#allocation10 + $0x40] sm:$0xf0] }
  0xa1   : > { %v4286_v45 = vor.u32 %v4882_v43, %v4285_v42 }
  0xa3   : > { %1222 = vmatpush.bf16.msrb.mxu2 %v4286_v45 }
  0xa7   : > { %1223 = vmatpush.bf16.msrb.mxu2 %v4274_v54 }
  0xae   : > { %655 = vmatmul.bf16.gmra.mxu0 %v421_v46 }
  0xaf   : > { %704 = vmatmul.bf16.gmra.mxu1 %v421_v46 }
  0xb0   : > { %753 = vmatmul.bf16.gmra.mxu2 %v421_v46  ;;  %802 = vmatmul.bf16.gmra.mxu3 %v421_v46  ;;  %v4265_v46 = vld [vmem:[#allocation10 + $0x18] sm:$0xf] }
  0xbe   : > { %660 = vmatmul.bf16.gmra.mxu0 %v422_v49 }
  0xbf   : > { %709 = vmatmul.bf16.gmra.mxu1 %v422_v49 }
  0xc0   : > { %758 = vmatmul.bf16.gmra.mxu2 %v422_v49  ;;  %807 = vmatmul.bf16.gmra.mxu3 %v422_v49  ;;  %v4266_v49 = vor.u32 %v4878_v47, %v4265_v46 }
  0xc2   : > { %1125 = vmatpush.bf16.msrb.mxu0 %v4266_v49 }
  0xc6   : > { %1126 = vmatpush.bf16.msrb.mxu0 %v4254_v59 }
  0xce   : > { %665 = vmatmul.bf16.gmra.mxu0 %v423_v61 }
  0xcf   : > { %714 = vmatmul.bf16.gmra.mxu1 %v423_v61 }
  0xd0   : > { %763 = vmatmul.bf16.gmra.mxu2 %v423_v61  ;;  %812 = vmatmul.bf16.gmra.mxu3 %v423_v61  ;;  %v4261_v61 = vld [vmem:[#allocation10 + $0x8] sm:$0xf] }
  0xd1   : > { %v4262_v0 = vor.u32 %v4876_v62, %v4261_v61 }
  0xd3   : > { %1224 = vmatpush.bf16.msrb.mxu2 %v4262_v0 }
  0xde   : > { %670 = vmatmul.bf16.gmra.mxu0 %v424_v34 }
  0xdf   : > { %719 = vmatmul.bf16.gmra.mxu1 %v424_v34 }
  0xe0   : > { %768 = vmatmul.bf16.gmra.mxu2 %v424_v34  ;;  %817 = vmatmul.bf16.gmra.mxu3 %v424_v34 }
  0xeb   : > { %v636_v3 = vpop.f32.mrf.mxu0 }
  0xec   : > { %v637_v4 = vadd.f32 %v636_v3, %v5849_v1  ;;  %v685_v5 = vpop.f32.mrf.mxu1 }
  0xed   : > { %v686_v6 = vadd.f32 %v685_v5, %v5851_v2 }
  0xef   : > { %v823_v7 = vpack.c.bf16 %v686_v6, %v637_v4 }
  0xf1   : > { %855 = vst [vmem:[#allocation2] sm:$0xff] %v823_v7 }
  0xf3   : > { %v734_v10 = vpop.f32.mrf.mxu2  ;;  %v783_v12 = vpop.f32.mrf.mxu3 }
  0xf4   : > { %v735_v11 = vadd.f32 %v734_v10, %v5855_v8  ;;  %v638_v13 = vpop.f32.mrf.mxu0  ;;  %v784_v14 = vadd.f32 %v783_v12, %v5857_v9  ;;  %v687_v16 = vpop.f32.mrf.mxu1 }
  0xf5   : > { %v639_v15 = vadd.f32 %v638_v13, %v5849_v1  ;;  %v688_v17 = vadd.f32 %v687_v16, %v5851_v2 }
  0xf6   : > { %v824_v18 = vpack.c.bf16 %v784_v14, %v735_v11 }
  0xf7   : > { %v825_v19 = vpack.c.bf16 %v688_v17, %v639_v15 }
  0xf8   : > { %856 = vst [vmem:[#allocation2 + $0x8] sm:$0xff] %v824_v18  ;;  %v4693_v30 = vld [vmem:[#allocation2 + $0x4] sm:$0xf]  ;;  %v4453_v36 = vld [vmem:[#allocation2] sm:$0xf] }
  0xf9   : > { %857 = vst [vmem:[#allocation2 + $0x10] sm:$0xff] %v825_v19  ;;  %v4485_v31 = vld [vmem:[#allocation2 + $0x4] sm:$0xf]  ;;  %v4557_v57 = vld [vmem:[#allocation2] sm:$0xf] }
  0xfa   : > { %v4589_v58 = vld [vmem:[#allocation2 + $0x4] sm:$0xf]  ;;  %v4661_v18 = vld [vmem:[#allocation2] sm:$0xf] }
  0xfb   : > { %v736_v20 = vpop.f32.mrf.mxu2  ;;  %v785_v22 = vpop.f32.mrf.mxu3 }
  0xfc   : > { %v737_v21 = vadd.f32 %v736_v20, %v5855_v8  ;;  %v641_v23 = vpop.f32.mrf.mxu0  ;;  %v786_v24 = vadd.f32 %v785_v22, %v5857_v9  ;;  %v690_v26 = vpop.f32.mrf.mxu1 }
  0xfd   : > { %v642_v25 = vadd.f32 %v641_v23, %v5849_v1  ;;  %v691_v27 = vadd.f32 %v690_v26, %v5851_v2 }
  0xfe   : > { %v826_v28 = vpack.c.bf16 %v786_v24, %v737_v21 }
  0xff   : > { %v827_v29 = vpack.c.bf16 %v691_v27, %v642_v25  ;;  %v4221_v48 = vld [vmem:[#allocation2 + $0xc] sm:$0xf]  ;;  %v4525_v55 = vld [vmem:[#allocation2 + $0x8] sm:$0xf] }
 0x100   : > { %858 = vst [vmem:[#allocation2 + $0x18] sm:$0xff] %v826_v28  ;;  %v4978_v32 = vld [vmem:[#allocation2 + $0x10] sm:$0xf0]  ;;  %v4922_v37 = vld [vmem:[#allocation2 + $0xc] sm:$0xf0] }
 0x101   : > { %v4930_v33 = vld [vmem:[#allocation2 + $0x10] sm:$0xf0]  ;;  %859 = vst [vmem:[#allocation2 + $0x20] sm:$0xff] %v827_v29  ;;  %v4694_v34 = vor.u32 %v4978_v32, %v4693_v30  ;;  %v4454_v39 = vor.u32 %v4922_v37, %v4453_v36  ;;  %v4946_v49 = vld [vmem:[#allocation2 + $0xc] sm:$0xf0] }
 0x102   : > { %v4486_v35 = vor.u32 %v4930_v33, %v4485_v31  ;;  %v4954_v53 = vld [vmem:[#allocation2 + $0x10] sm:$0xf0]  ;;  %v4558_v60 = vor.u32 %v4946_v49, %v4557_v57  ;;  %v4733_v12 = vld [vmem:[#allocation2 + $0x8] sm:$0xf]  ;;  %v4970_v13 = vld [vmem:[#allocation2 + $0xc] sm:$0xf0] }
 0x103   : > { %v739_v38 = vpop.f32.mrf.mxu2  ;;  %v788_v41 = vpop.f32.mrf.mxu3  ;;  %3220 = vrot.lane.b32.xlu0 %v4694_v34, %s5647_s11  ;;  %1926 = vrot.lane.b32.xlu2 %v4454_v39, %s5648_s16  ;;  %v4590_v61 = vor.u32 %v4954_v53, %v4589_v58  ;;  %v4662_v20 = vor.u32 %v4970_v13, %v4661_v18 }
 0x104   : > { %v740_v40 = vadd.f32 %v739_v38, %v5855_v8  ;;  %1982 = vrot.lane.b32.xlu1 %v4486_v35, %s5648_s16  ;;  %v643_v42 = vpop.f32.mrf.mxu0  ;;  %v789_v43 = vadd.f32 %v788_v41, %v5857_v9  ;;  %v692_v45 = vpop.f32.mrf.mxu1 }
 0x105   : > { %v644_v44 = vadd.f32 %v643_v42, %v5849_v1  ;;  %v693_v46 = vadd.f32 %v692_v45, %v5851_v2 }
 0x106   : > { %v828_v47 = vpack.c.bf16 %v789_v43, %v740_v40 }
 0x107   : > { %v829_v50 = vpack.c.bf16 %v693_v46, %v644_v44  ;;  %v4866_v51 = vld [vmem:[#allocation2 + $0x18] sm:$0xf0]  ;;  %v4938_v52 = vld [vmem:[#allocation2 + $0x14] sm:$0xf0] }
 0x108   : > { %860 = vst [vmem:[#allocation2 + $0x28] sm:$0xff] %v828_v47  ;;  %v4222_v54 = vor.u32 %v4866_v51, %v4221_v48  ;;  %v4526_v56 = vor.u32 %v4938_v52, %v4525_v55  ;;  %v4986_v10 = vld [vmem:[#allocation2 + $0x14] sm:$0xf0]  ;;  %v4593_v14 = vld [vmem:[#allocation2 + $0x24] sm:$0xf] }
 0x109   : > { %861 = vst [vmem:[#allocation2 + $0x30] sm:$0xff] %v829_v50  ;;  %v4734_v16 = vor.u32 %v4986_v10, %v4733_v12  ;;  %v4489_v37 = vld [vmem:[#allocation2 + $0x24] sm:$0xf] }
 0x10a   : > { %1127 = vmatmul.bf16.vlgmr.msrb.gmra.mxu0 %v4222_v54  ;;  %1176 = vmatmul.bf16.vlgmr.msrb.gmra.mxu1 %v4222_v54  ;;  %v4697_v40 = vld [vmem:[#allocation2 + $0x24] sm:$0xf] }
 0x10b   : > { %v741_v59 = vpop.f32.mrf.mxu2  ;;  %1225 = vmatmul.bf16.vlgmr.msrb.gmra.mxu2 %v4222_v54  ;;  %v790_v63 = vpop.f32.mrf.mxu3  ;;  %2255 = vrot.lane.b32.xlu0 %v4526_v56, %s5648_s16  ;;  %v4457_v56 = vld [vmem:[#allocation2 + $0x20] sm:$0xf] }
 0x10c   : > { %v742_v62 = vadd.f32 %v741_v59, %v5855_v8  ;;  %v646_v0 = vpop.f32.mrf.mxu0  ;;  %v791_v3 = vadd.f32 %v790_v63, %v5857_v9  ;;  %2545 = vrot.lane.b32.xlu1 %v4558_v60, %s5649_s26  ;;  %2601 = vrot.lane.b32.xlu2 %v4590_v61, %s5649_s26  ;;  %v695_v5 = vpop.f32.mrf.mxu1  ;;  %v4665_v59 = vld [vmem:[#allocation2 + $0x20] sm:$0xf] }
 0x10d   : > { %v647_v4 = vadd.f32 %v646_v0, %v5849_v1  ;;  %v696_v6 = vadd.f32 %v695_v5, %v5851_v2 }
 0x10e   : > { %v830_v7 = vpack.c.bf16 %v791_v3, %v742_v62 }
 0x10f   : > { %v831_v11 = vpack.c.bf16 %v696_v6, %v647_v4  ;;  %v4225_v28 = vld [vmem:[#allocation2 + $0x2c] sm:$0xf]  ;;  %v4529_v29 = vld [vmem:[#allocation2 + $0x28] sm:$0xf] }
 0x110   : > { %862 = vst [vmem:[#allocation2 + $0x38] sm:$0xff] %v830_v7  ;;  %v4955_v15 = vld [vmem:[#allocation2 + $0x30] sm:$0xf0]  ;;  %v4737_v50 = vld [vmem:[#allocation2 + $0x28] sm:$0xf] }
 0x111   : > { %863 = vst [vmem:[#allocation2 + $0x40] sm:$0xff] %v831_v11  ;;  %v4594_v17 = vor.u32 %v4955_v15, %v4593_v14  ;;  %v4931_v31 = vld [vmem:[#allocation2 + $0x30] sm:$0xf0]  ;;  %v4923_v53 = vld [vmem:[#allocation2 + $0x2c] sm:$0xf0] }
 0x112   : > { %v4979_v34 = vld [vmem:[#allocation2 + $0x30] sm:$0xf0]  ;;  %v4490_v39 = vor.u32 %v4931_v31, %v4489_v37  ;;  %v4971_v55 = vld [vmem:[#allocation2 + $0x2c] sm:$0xf0]  ;;  %v4458_v58 = vor.u32 %v4923_v53, %v4457_v56 }
 0x113   : > { %v744_v19 = vpop.f32.mrf.mxu2  ;;  %v793_v22 = vpop.f32.mrf.mxu3  ;;  %3493 = vrot.lane.b32.xlu0 %v4734_v16, %s5647_s11  ;;  %v4698_v42 = vor.u32 %v4979_v34, %v4697_v40  ;;  %v4666_v61 = vor.u32 %v4971_v55, %v4665_v59  ;;  %v4947_v11 = vld [vmem:[#allocation2 + $0x2c] sm:$0xf0] }
 0x114   : > { %v745_v21 = vadd.f32 %v744_v19, %v5855_v8  ;;  %v648_v23 = vpop.f32.mrf.mxu0  ;;  %v794_v24 = vadd.f32 %v793_v22, %v5857_v9  ;;  %2603 = vrot.lane.b32.xlu1 %v4594_v17, %s5649_s26  ;;  %3164 = vrot.lane.b32.xlu2 %v4662_v20, %s5647_s11  ;;  %v697_v26 = vpop.f32.mrf.mxu1  ;;  %v4561_v19 = vld [vmem:[#allocation2 + $0x20] sm:$0xf] }
 0x115   : > { %v649_v25 = vadd.f32 %v648_v23, %v5849_v1  ;;  %v698_v27 = vadd.f32 %v697_v26, %v5851_v2  ;;  %v4562_v20 = vor.u32 %v4947_v11, %v4561_v19 }
 0x116   : > { %v832_v30 = vpack.c.bf16 %v794_v24, %v745_v21 }
 0x117   : > { %v833_v32 = vpack.c.bf16 %v698_v27, %v649_v25  ;;  %v4867_v33 = vld [vmem:[#allocation2 + $0x38] sm:$0xf0]  ;;  %v4939_v35 = vld [vmem:[#allocation2 + $0x34] sm:$0xf0] }
 0x118   : > { %864 = vst [vmem:[#allocation2 + $0x48] sm:$0xff] %v832_v30  ;;  %v4226_v36 = vor.u32 %v4867_v33, %v4225_v28  ;;  %v4530_v38 = vor.u32 %v4939_v35, %v4529_v29  ;;  %v4987_v51 = vld [vmem:[#allocation2 + $0x34] sm:$0xf0]  ;;  %v4461_v12 = vld [vmem:[#allocation2 + $0x40] sm:$0xf] }
 0x119   : > { %865 = vst [vmem:[#allocation2 + $0x50] sm:$0xff] %v833_v32  ;;  %v4738_v57 = vor.u32 %v4987_v51, %v4737_v50  ;;  %v4493_v13 = vld [vmem:[#allocation2 + $0x44] sm:$0xf]  ;;  %v4565_v34 = vld [vmem:[#allocation2 + $0x40] sm:$0xf] }
 0x11a   : > { %1132 = vmatmul.bf16.gmra.mxu0 %v4226_v36  ;;  %1181 = vmatmul.bf16.gmra.mxu1 %v4226_v36  ;;  %v4701_v32 = vld [vmem:[#allocation2 + $0x44] sm:$0xf]  ;;  %v4669_v51 = vld [vmem:[#allocation2 + $0x40] sm:$0xf] }
 0x11b   : > { %v746_v41 = vpop.f32.mrf.mxu2  ;;  %v795_v44 = vpop.f32.mrf.mxu3  ;;  %1230 = vmatmul.bf16.gmra.mxu2 %v4226_v36  ;;  %1984 = vrot.lane.b32.xlu0 %v4490_v39, %s5648_s16  ;;  %v4597_v37 = vld [vmem:[#allocation2 + $0x44] sm:$0xf] }
 0x11c   : > { %v747_v43 = vadd.f32 %v746_v41, %v5855_v8  ;;  %v651_v45 = vpop.f32.mrf.mxu0  ;;  %v796_v46 = vadd.f32 %v795_v44, %v5857_v9  ;;  %3222 = vrot.lane.b32.xlu1 %v4698_v42, %s5647_s11  ;;  %2257 = vrot.lane.b32.xlu2 %v4530_v38, %s5648_s16  ;;  %v700_v48 = vpop.f32.mrf.mxu1 }
 0x11d   : > { %v652_v47 = vadd.f32 %v651_v45, %v5849_v1  ;;  %v701_v49 = vadd.f32 %v700_v48, %v5851_v2 }
 0x11e   : > { %v834_v52 = vpack.c.bf16 %v796_v46, %v747_v43 }
 0x11f   : > { %v835_v54 = vpack.c.bf16 %v701_v49, %v652_v47  ;;  %v4229_v7 = vld [vmem:[#allocation2 + $0x4c] sm:$0xf]  ;;  %v4741_v53 = vld [vmem:[#allocation2 + $0x48] sm:$0xf] }
 0x120   : > { %866 = vst [vmem:[#allocation2 + $0x58] sm:$0xff] %v834_v52  ;;  %v4924_v16 = vld [vmem:[#allocation2 + $0x4c] sm:$0xf0]  ;;  %v4932_v17 = vld [vmem:[#allocation2 + $0x50] sm:$0xf0] }
 0x121   : > { %867 = vst [vmem:[#allocation2 + $0x60] sm:$0xff] %v835_v54  ;;  %v4462_v22 = vor.u32 %v4924_v16, %v4461_v12  ;;  %v4494_v23 = vor.u32 %v4932_v17, %v4493_v13  ;;  %v4980_v33 = vld [vmem:[#allocation2 + $0x50] sm:$0xf0]  ;;  %v4948_v36 = vld [vmem:[#allocation2 + $0x4c] sm:$0xf0] }
 0x122   : > { %v4956_v38 = vld [vmem:[#allocation2 + $0x50] sm:$0xf0]  ;;  %v4702_v39 = vor.u32 %v4980_v33, %v4701_v32  ;;  %v4566_v41 = vor.u32 %v4948_v36, %v4565_v34  ;;  %v4533_v55 = vld [vmem:[#allocation2 + $0x48] sm:$0xf] }
 0x123   : > { %v749_v60 = vpop.f32.mrf.mxu2  ;;  %v798_v63 = vpop.f32.mrf.mxu3  ;;  %1928 = vrot.lane.b32.xlu0 %v4458_v58, %s5648_s16  ;;  %v4598_v42 = vor.u32 %v4956_v38, %v4597_v37  ;;  %v4972_v58 = vld [vmem:[#allocation2 + $0x4c] sm:$0xf0] }
 0x124   : > { %v750_v62 = vadd.f32 %v749_v60, %v5855_v8  ;;  %v653_v0 = vpop.f32.mrf.mxu0  ;;  %v799_v3 = vadd.f32 %v798_v63, %v5857_v9  ;;  %3166 = vrot.lane.b32.xlu1 %v4666_v61, %s5647_s11  ;;  %3495 = vrot.lane.b32.xlu2 %v4738_v57, %s5647_s11  ;;  %v702_v5 = vpop.f32.mrf.mxu1  ;;  %v4670_v63 = vor.u32 %v4972_v58, %v4669_v51 }
 0x125   : > { %v654_v4 = vadd.f32 %v653_v0, %v5849_v1  ;;  %v703_v6 = vadd.f32 %v702_v5, %v5851_v2 }
 0x126   : > { %v836_v10 = vpack.c.bf16 %v799_v3, %v750_v62 }
 0x127   : > { %v837_v14 = vpack.c.bf16 %v703_v6, %v654_v4  ;;  %v4868_v15 = vld [vmem:[#allocation2 + $0x58] sm:$0xf0]  ;;  %v4988_v54 = vld [vmem:[#allocation2 + $0x54] sm:$0xf0] }
 0x128   : > { %868 = vst [vmem:[#allocation2 + $0x68] sm:$0xff] %v836_v10  ;;  %v4230_v18 = vor.u32 %v4868_v15, %v4229_v7  ;;  %v4940_v59 = vld [vmem:[#allocation2 + $0x54] sm:$0xf0]  ;;  %v4742_v61 = vor.u32 %v4988_v54, %v4741_v53  ;;  %v4465_v13 = vld [vmem:[#allocation2 + $0x60] sm:$0xf] }
 0x129   : > { %869 = vst [vmem:[#allocation2 + $0x70] sm:$0xff] %v837_v14  ;;  %v4534_v0 = vor.u32 %v4940_v59, %v4533_v55  ;;  %v4637_v15 = vld [vmem:[#allocation2 + $0x48] sm:$0xf]  ;;  %v4601_v17 = vld [vmem:[#allocation2 + $0x64] sm:$0xf] }
 0x12a   : > { %1137 = vmatmul.bf16.gmra.mxu0 %v4230_v18  ;;  %1186 = vmatmul.bf16.gmra.mxu1 %v4230_v18  ;;  %v4964_v19 = vld [vmem:[#allocation2 + $0x54] sm:$0xf0]  ;;  %v4705_v32 = vld [vmem:[#allocation2 + $0x64] sm:$0xf]  ;;  %v4569_v59 = vld [vmem:[#allocation2 + $0x60] sm:$0xf] }
 0x12b   : > { %v751_v21 = vpop.f32.mrf.mxu2  ;;  %v800_v25 = vpop.f32.mrf.mxu3  ;;  %1235 = vmatmul.bf16.gmra.mxu2 %v4230_v18  ;;  %2547 = vrot.lane.b32.xlu0 %v4562_v20, %s5649_s26  ;;  %v4497_v36 = vld [vmem:[#allocation2 + $0x64] sm:$0xf] }
 0x12c   : > { %v752_v24 = vadd.f32 %v751_v21, %v5855_v8  ;;  %v656_v26 = vpop.f32.mrf.mxu0  ;;  %v801_v27 = vadd.f32 %v800_v25, %v5857_v9  ;;  %1930 = vrot.lane.b32.xlu1 %v4462_v22, %s5648_s16  ;;  %1986 = vrot.lane.b32.xlu2 %v4494_v23, %s5648_s16  ;;  %v705_v29 = vpop.f32.mrf.mxu1  ;;  %v4638_v23 = vor.u32 %v4964_v19, %v4637_v15 }
 0x12d   : > { %v657_v28 = vadd.f32 %v656_v26, %v5849_v1  ;;  %v706_v30 = vadd.f32 %v705_v29, %v5851_v2 }
 0x12e   : > { %v838_v31 = vpack.c.bf16 %v801_v27, %v752_v24 }
 0x12f   : > { %v839_v35 = vpack.c.bf16 %v706_v30, %v657_v28  ;;  %v4233_v50 = vld [vmem:[#allocation2 + $0x6c] sm:$0xf]  ;;  %v4537_v34 = vld [vmem:[#allocation2 + $0x68] sm:$0xf] }
 0x130   : > { %870 = vst [vmem:[#allocation2 + $0x78] sm:$0xff] %v838_v31  ;;  %v4925_v14 = vld [vmem:[#allocation2 + $0x6c] sm:$0xf0]  ;;  %v4957_v18 = vld [vmem:[#allocation2 + $0x70] sm:$0xf0] }
 0x131   : > { %871 = vst [vmem:[#allocation2 + $0x80] sm:$0xff] %v839_v35  ;;  %v4466_v20 = vor.u32 %v4925_v14, %v4465_v13  ;;  %v4602_v22 = vor.u32 %v4957_v18, %v4601_v17  ;;  %v4973_v58 = vld [vmem:[#allocation2 + $0x6c] sm:$0xf0]  ;;  %v4641_v13 = vld [vmem:[#allocation2 + $0x68] sm:$0xf] }
 0x132   : > { %v4745_v17 = vld [vmem:[#allocation2 + $0x68] sm:$0xf] }
 0x133   : > { %v754_v40 = vpop.f32.mrf.mxu2  ;;  %v803_v44 = vpop.f32.mrf.mxu3  ;;  %3224 = vrot.lane.b32.xlu0 %v4702_v39, %s5647_s11  ;;  %v4981_v39 = vld [vmem:[#allocation2 + $0x70] sm:$0xf0] }
 0x134   : > { %v755_v43 = vadd.f32 %v754_v40, %v5855_v8  ;;  %v658_v45 = vpop.f32.mrf.mxu0  ;;  %v804_v46 = vadd.f32 %v803_v44, %v5857_v9  ;;  %2549 = vrot.lane.b32.xlu1 %v4566_v41, %s5649_s26  ;;  %2605 = vrot.lane.b32.xlu2 %v4598_v42, %s5649_s26  ;;  %v707_v48 = vpop.f32.mrf.mxu1  ;;  %v4933_v40 = vld [vmem:[#allocation2 + $0x70] sm:$0xf0]  ;;  %v4706_v44 = vor.u32 %v4981_v39, %v4705_v32 }
 0x135   : > { %v659_v47 = vadd.f32 %v658_v45, %v5849_v1  ;;  %v708_v49 = vadd.f32 %v707_v48, %v5851_v2  ;;  %v4498_v45 = vor.u32 %v4933_v40, %v4497_v36 }
 0x136   : > { %v840_v52 = vpack.c.bf16 %v804_v46, %v755_v43 }
 0x137   : > { %v841_v56 = vpack.c.bf16 %v708_v49, %v659_v47  ;;  %v4869_v57 = vld [vmem:[#allocation2 + $0x78] sm:$0xf0]  ;;  %v4941_v35 = vld [vmem:[#allocation2 + $0x74] sm:$0xf0] }
 0x138   : > { %872 = vst [vmem:[#allocation2 + $0x88] sm:$0xff] %v840_v52  ;;  %v4234_v60 = vor.u32 %v4869_v57, %v4233_v50  ;;  %v4538_v42 = vor.u32 %v4941_v35, %v4537_v34  ;;  %v4469_v54 = vld [vmem:[#allocation2 + $0x80] sm:$0xf] }
 0x139   : > { %873 = vst [vmem:[#allocation2 + $0x90] sm:$0xff] %v841_v56  ;;  %v4673_v56 = vld [vmem:[#allocation2 + $0x60] sm:$0xf] }
 0x13a   : > { %1142 = vmatmul.bf16.gmra.mxu0 %v4234_v60  ;;  %1191 = vmatmul.bf16.gmra.mxu1 %v4234_v60  ;;  %v4573_v15 = vld [vmem:[#allocation2 + $0x80] sm:$0xf] }
 0x13b   : > { %v756_v62 = vpop.f32.mrf.mxu2  ;;  %v805_v4 = vpop.f32.mrf.mxu3  ;;  %1240 = vmatmul.bf16.gmra.mxu2 %v4234_v60  ;;  %3497 = vrot.lane.b32.xlu0 %v4742_v61, %s5647_s11  ;;  %v4949_v60 = vld [vmem:[#allocation2 + $0x6c] sm:$0xf0]  ;;  %v4677_v36 = vld [vmem:[#allocation2 + $0x80] sm:$0xf] }
 0x13c   : > { %v757_v3 = vadd.f32 %v756_v62, %v5855_v8  ;;  %v661_v5 = vpop.f32.mrf.mxu0  ;;  %v806_v6 = vadd.f32 %v805_v4, %v5857_v9  ;;  %3168 = vrot.lane.b32.xlu1 %v4670_v63, %s5647_s11  ;;  %2259 = vrot.lane.b32.xlu2 %v4534_v0, %s5648_s16  ;;  %v710_v10 = vpop.f32.mrf.mxu1  ;;  %v4674_v63 = vor.u32 %v4973_v58, %v4673_v56 }
 0x13d   : > { %v662_v7 = vadd.f32 %v661_v5, %v5849_v1  ;;  %v711_v11 = vadd.f32 %v710_v10, %v5851_v2  ;;  %v4570_v0 = vor.u32 %v4949_v60, %v4569_v59 }
 0x13e   : > { %v842_v12 = vpack.c.bf16 %v806_v6, %v757_v3 }
 0x13f   : > { %v843_v16 = vpack.c.bf16 %v711_v11, %v662_v7  ;;  %v4237_v31 = vld [vmem:[#allocation2 + $0x8c] sm:$0xf] }
 0x140   : > { %874 = vst [vmem:[#allocation2 + $0x98] sm:$0xff] %v842_v12  ;;  %v4926_v55 = vld [vmem:[#allocation2 + $0x8c] sm:$0xf0]  ;;  %v4934_v40 = vld [vmem:[#allocation2 + $0x90] sm:$0xf0] }
 0x141   : > { %875 = vst [vmem:[#allocation2 + $0xa0] sm:$0xff] %v843_v16  ;;  %v4470_v61 = vor.u32 %v4926_v55, %v4469_v54  ;;  %v4950_v16 = vld [vmem:[#allocation2 + $0x8c] sm:$0xf0]  ;;  %v4605_v54 = vld [vmem:[#allocation2 + $0x84] sm:$0xf] }
 0x142   : > { %v4958_v60 = vld [vmem:[#allocation2 + $0x90] sm:$0xf0] }
 0x143   : > { %v759_v21 = vpop.f32.mrf.mxu2  ;;  %v808_v25 = vpop.f32.mrf.mxu3  ;;  %1932 = vrot.lane.b32.xlu0 %v4466_v20, %s5648_s16  ;;  %v4965_v20 = vld [vmem:[#allocation2 + $0x74] sm:$0xf0] }
 0x144   : > { %v760_v24 = vadd.f32 %v759_v21, %v5855_v8  ;;  %v663_v26 = vpop.f32.mrf.mxu0  ;;  %v809_v27 = vadd.f32 %v808_v25, %v5857_v9  ;;  %2607 = vrot.lane.b32.xlu1 %v4602_v22, %s5649_s26  ;;  %2878 = vrot.lane.b32.xlu2 %v4638_v23, %s5649_s26  ;;  %v712_v29 = vpop.f32.mrf.mxu1  ;;  %v4989_v21 = vld [vmem:[#allocation2 + $0x74] sm:$0xf0]  ;;  %v4574_v23 = vor.u32 %v4950_v16, %v4573_v15 }
 0x145   : > { %v664_v28 = vadd.f32 %v663_v26, %v5849_v1  ;;  %v713_v30 = vadd.f32 %v712_v29, %v5851_v2  ;;  %v4642_v25 = vor.u32 %v4965_v20, %v4641_v13  ;;  %v4746_v26 = vor.u32 %v4989_v21, %v4745_v17  ;;  %v4982_v17 = vld [vmem:[#allocation2 + $0x90] sm:$0xf0] }
 0x146   : > { %v844_v33 = vpack.c.bf16 %v809_v27, %v760_v24 }
 0x147   : > { %v845_v37 = vpack.c.bf16 %v713_v30, %v664_v28  ;;  %v4870_v38 = vld [vmem:[#allocation2 + $0x98] sm:$0xf0] }
 0x148   : > { %876 = vst [vmem:[#allocation2 + $0xa8] sm:$0xff] %v844_v33  ;;  %v4238_v41 = vor.u32 %v4870_v38, %v4237_v31  ;;  %v4501_v38 = vld [vmem:[#allocation2 + $0x84] sm:$0xf] }
 0x149   : > { %877 = vst [vmem:[#allocation2 + $0xb0] sm:$0xff] %v845_v37  ;;  %v4974_v37 = vld [vmem:[#allocation2 + $0x8c] sm:$0xf0] }
 0x14a   : > { %1147 = vmatmul.bf16.gmra.mxu0 %v4238_v41  ;;  %1196 = vmatmul.bf16.gmra.mxu1 %v4238_v41 }
 0x14b   : > { %v761_v43 = vpop.f32.mrf.mxu2  ;;  %v810_v47 = vpop.f32.mrf.mxu3  ;;  %1245 = vmatmul.bf16.gmra.mxu2 %v4238_v41  ;;  %2261 = vrot.lane.b32.xlu0 %v4538_v42, %s5648_s16  ;;  %v4749_v41 = vld [vmem:[#allocation2 + $0x88] sm:$0xf]  ;;  %v4990_v42 = vld [vmem:[#allocation2 + $0x94] sm:$0xf0] }
 0x14c   : > { %v762_v46 = vadd.f32 %v761_v43, %v5855_v8  ;;  %v666_v48 = vpop.f32.mrf.mxu0  ;;  %v811_v49 = vadd.f32 %v810_v47, %v5857_v9  ;;  %3226 = vrot.lane.b32.xlu1 %v4706_v44, %s5647_s11  ;;  %1988 = vrot.lane.b32.xlu2 %v4498_v45, %s5648_s16  ;;  %v715_v51 = vpop.f32.mrf.mxu1  ;;  %v4678_v43 = vor.u32 %v4974_v37, %v4677_v36 }
 0x14d   : > { %v667_v50 = vadd.f32 %v666_v48, %v5849_v1  ;;  %v716_v52 = vadd.f32 %v715_v51, %v5851_v2  ;;  %v4502_v45 = vor.u32 %v4934_v40, %v4501_v38 }
 0x14e   : > { %v846_v53 = vpack.c.bf16 %v811_v49, %v762_v46  ;;  %v4750_v46 = vor.u32 %v4990_v42, %v4749_v41 }
 0x14f   : > { %v847_v57 = vpack.c.bf16 %v716_v52, %v667_v50  ;;  %v4241_v12 = vld [vmem:[#allocation2 + $0xac] sm:$0xf]  ;;  %v4545_v58 = vld [vmem:[#allocation2 + $0xa8] sm:$0xf] }
 0x150   : > { %878 = vst [vmem:[#allocation2 + $0xb8] sm:$0xff] %v846_v53 }
 0x151   : > { %879 = vst [vmem:[#allocation2 + $0xc0] sm:$0xff] %v847_v57 }
 0x153   : > { %v764_v62 = vpop.f32.mrf.mxu2  ;;  %v813_v4 = vpop.f32.mrf.mxu3  ;;  %1934 = vrot.lane.b32.xlu0 %v4470_v61, %s5648_s16 }
 0x154   : > { %v765_v3 = vadd.f32 %v764_v62, %v5855_v8  ;;  %v668_v5 = vpop.f32.mrf.mxu0  ;;  %v814_v6 = vadd.f32 %v813_v4, %v5857_v9  ;;  %3170 = vrot.lane.b32.xlu1 %v4674_v63, %s5647_s11  ;;  %2551 = vrot.lane.b32.xlu2 %v4570_v0, %s5649_s26  ;;  %v717_v10 = vpop.f32.mrf.mxu1  ;;  %v4713_v62 = vld [vmem:[#allocation2 + $0xa4] sm:$0xf]  ;;  %v4983_v63 = vld [vmem:[#allocation2 + $0xb0] sm:$0xf0] }
 0x155   : > { %v669_v7 = vadd.f32 %v668_v5, %v5849_v1  ;;  %v718_v11 = vadd.f32 %v717_v10, %v5851_v2  ;;  %v4606_v5 = vor.u32 %v4958_v60, %v4605_v54 }
 0x156   : > { %v848_v14 = vpack.c.bf16 %v814_v6, %v765_v3  ;;  %v4714_v6 = vor.u32 %v4983_v63, %v4713_v62 }
 0x157   : > { %v849_v18 = vpack.c.bf16 %v718_v11, %v669_v7  ;;  %v4871_v19 = vld [vmem:[#allocation2 + $0xb8] sm:$0xf0]  ;;  %v4943_v59 = vld [vmem:[#allocation2 + $0xb4] sm:$0xf0]  ;;  %v4709_v11 = vld [vmem:[#allocation2 + $0x84] sm:$0xf] }
 0x158   : > { %880 = vst [vmem:[#allocation2 + $0xc8] sm:$0xff] %v848_v14  ;;  %v4242_v22 = vor.u32 %v4871_v19, %v4241_v12  ;;  %v4546_v4 = vor.u32 %v4943_v59, %v4545_v58  ;;  %v4509_v14 = vld [vmem:[#allocation2 + $0xc4] sm:$0xf]  ;;  %v4991_v36 = vld [vmem:[#allocation2 + $0xb4] sm:$0xf0] }
 0x159   : > { %881 = vst [vmem:[#allocation2 + $0xd0] sm:$0xff] %v849_v18  ;;  %v4577_v18 = vld [vmem:[#allocation2 + $0xa0] sm:$0xf]  ;;  %v4966_v58 = vld [vmem:[#allocation2 + $0x94] sm:$0xf0] }
 0x15a   : > { %1152 = vmatmul.bf16.gmra.mxu0 %v4242_v22  ;;  %1201 = vmatmul.bf16.gmra.mxu1 %v4242_v22  ;;  %v4581_v54 = vld [vmem:[#allocation2 + $0xc0] sm:$0xf]  ;;  %v4649_v59 = vld [vmem:[#allocation2 + $0xa8] sm:$0xf]  ;;  %v4967_v60 = vld [vmem:[#allocation2 + $0xb4] sm:$0xf0] }
 0x15b   : > { %v766_v24 = vpop.f32.mrf.mxu2  ;;  %v815_v28 = vpop.f32.mrf.mxu3  ;;  %1250 = vmatmul.bf16.gmra.mxu2 %v4242_v22  ;;  %2553 = vrot.lane.b32.xlu0 %v4574_v23, %s5649_s26  ;;  %v4710_v22 = vor.u32 %v4982_v17, %v4709_v11  ;;  %v4433_v11 = vld [vmem:[#allocation2 + $0x68] sm:$0xf] }
 0x15c   : > { %v767_v27 = vadd.f32 %v766_v24, %v5855_v8  ;;  %v671_v29 = vpop.f32.mrf.mxu0  ;;  %v816_v30 = vadd.f32 %v815_v28, %v5857_v9  ;;  %2880 = vrot.lane.b32.xlu1 %v4642_v25, %s5649_s26  ;;  %3499 = vrot.lane.b32.xlu2 %v4746_v26, %s5647_s11  ;;  %v720_v32 = vpop.f32.mrf.mxu1  ;;  %v4942_v28 = vld [vmem:[#allocation2 + $0x94] sm:$0xf0] }
 0x15d   : > { %v672_v31 = vadd.f32 %v671_v29, %v5849_v1  ;;  %v721_v33 = vadd.f32 %v720_v32, %v5851_v2  ;;  %v5951_v35 = vpop.permute.xlu2 %1926  ;;  %v4753_v29 = vld [vmem:[#allocation2 + $0xa8] sm:$0xf] }
 0x15e   : > { %v850_v34 = vpack.c.bf16 %v816_v30, %v767_v27  ;;  %v4541_v27 = vld [vmem:[#allocation2 + $0x88] sm:$0xf]  ;;  %v4405_v30 = vld [vmem:[#allocation2 + $0xc4] sm:$0xf] }
 0x15f   : > { %v851_v39 = vpack.c.bf16 %v721_v33, %v672_v31  ;;  %v4245_v55 = vld [vmem:[#allocation2 + $0xcc] sm:$0xf]  ;;  %v4613_v33 = vld [vmem:[#allocation2 + $0xc4] sm:$0xf]  ;;  %v4445_v38 = vld [vmem:[#allocation2 + $0xc8] sm:$0xf] }
 0x160   : > { %882 = vst [vmem:[#allocation2 + $0xd8] sm:$0xff] %v850_v34  ;;  %v4936_v15 = vld [vmem:[#allocation2 + $0xd0] sm:$0xf0] }
 0x161   : > { %883 = vst [vmem:[#allocation2 + $0xe0] sm:$0xff] %v851_v39  ;;  %v4510_v20 = vor.u32 %v4936_v15, %v4509_v14  ;;  %v4912_v31 = vld [vmem:[#allocation2 + $0xd0] sm:$0xf0]  ;;  %v4917_v14 = vld [vmem:[#allocation2 + $0x74] sm:$0xf0] }
 0x162   : > { %v4960_v34 = vld [vmem:[#allocation2 + $0xd0] sm:$0xf0]  ;;  %v4406_v41 = vor.u32 %v4912_v31, %v4405_v30  ;;  %v4397_v15 = vld [vmem:[#allocation2 + $0x84] sm:$0xf] }
 0x163   : > { %v769_v44 = vpop.f32.mrf.mxu2  ;;  %v818_v48 = vpop.f32.mrf.mxu3  ;;  %3172 = vrot.lane.b32.xlu0 %v4678_v43, %s5647_s11  ;;  %v4614_v42 = vor.u32 %v4960_v34, %v4613_v33  ;;  %v4542_v43 = vor.u32 %v4942_v28, %v4541_v27  ;;  %v4429_v33 = vld [vmem:[#allocation2 + $0x48] sm:$0xf]  ;;  %v4916_v34 = vld [vmem:[#allocation2 + $0x54] sm:$0xf0] }
 0x164   : > { %v770_v47 = vadd.f32 %v769_v44, %v5855_v8  ;;  %v673_v49 = vpop.f32.mrf.mxu0  ;;  %v819_v50 = vadd.f32 %v818_v48, %v5857_v9  ;;  %1990 = vrot.lane.b32.xlu1 %v4502_v45, %s5648_s16  ;;  %3501 = vrot.lane.b32.xlu2 %v4750_v46, %s5647_s11  ;;  %v722_v52 = vpop.f32.mrf.mxu1  ;;  %v4754_v44 = vor.u32 %v4991_v36, %v4753_v29  ;;  %v1502_v46 = vsel %vm1458_vm0, %v4406_v41, 0 }
 0x165   : > { %v674_v51 = vadd.f32 %v673_v49, %v5849_v1  ;;  %v723_v53 = vadd.f32 %v722_v52, %v5851_v2  ;;  %v4441_v49 = vld [vmem:[#allocation2 + $0xa8] sm:$0xf]  ;;  %v4434_v29 = vor.u32 %v4917_v14, %v4433_v11  ;;  %v4430_v41 = vor.u32 %v4916_v34, %v4429_v33  ;;  %v4473_v33 = vld [vmem:[#allocation2 + $0xa0] sm:$0xf]  ;;  %v4927_v34 = vld [vmem:[#allocation2 + $0xac] sm:$0xf0] }
 0x166   : > { %v852_v56 = vpack.c.bf16 %v819_v50, %v770_v47  ;;  %v5960_v57 = vpop.permute.xlu2 %2601  ;;  %v4401_v47 = vld [vmem:[#allocation2 + $0xa4] sm:$0xf]  ;;  %v4919_v50 = vld [vmem:[#allocation2 + $0xb4] sm:$0xf0] }
 0x167   : > { %v853_v61 = vpack.c.bf16 %v723_v53, %v674_v51  ;;  %v4872_v0 = vld [vmem:[#allocation2 + $0xd8] sm:$0xf0]  ;;  %v4920_v39 = vld [vmem:[#allocation2 + $0xd4] sm:$0xf0]  ;;  %v4911_v51 = vld [vmem:[#allocation2 + $0xb0] sm:$0xf0] }
 0x168   : > { %884 = vst [vmem:[#allocation2 + $0xe8] sm:$0xff] %v852_v56  ;;  %v4246_v3 = vor.u32 %v4872_v0, %v4245_v55  ;;  %v4409_v16 = vld [vmem:[#allocation2 + $0xe4] sm:$0xf]  ;;  %v4446_v45 = vor.u32 %v4920_v39, %v4445_v38  ;;  %v4952_v55 = vld [vmem:[#allocation2 + $0xcc] sm:$0xf0]  ;;  %v4402_v62 = vor.u32 %v4911_v51, %v4401_v47 }
 0x169   : > { %885 = vst [vmem:[#allocation2 + $0xf0] sm:$0xff] %v853_v61  ;;  %v4645_v56 = vld [vmem:[#allocation2 + $0x88] sm:$0xf]  ;;  %v4442_v61 = vor.u32 %v4919_v50, %v4441_v49  ;;  %v4582_v63 = vor.u32 %v4952_v55, %v4581_v54  ;;  %v4944_v51 = vld [vmem:[#allocation2 + $0xd4] sm:$0xf0] }
 0x16a   : > { %1157 = vmatmul.bf16.gmra.mxu0 %v4246_v3  ;;  %1206 = vmatmul.bf16.gmra.mxu1 %v4246_v3  ;;  %v4437_v0 = vld [vmem:[#allocation2 + $0x88] sm:$0xf]  ;;  %v4609_v54 = vld [vmem:[#allocation2 + $0xa4] sm:$0xf] }
 0x16b   : > { %v771_v1 = vpop.f32.mrf.mxu2  ;;  %v820_v7 = vpop.f32.mrf.mxu3  ;;  %2265 = vrot.lane.b32.xlu0 %v4546_v4, %s5648_s16  ;;  %1255 = vmatmul.bf16.gmra.mxu2 %v4246_v3  ;;  %v4918_v3 = vld [vmem:[#allocation2 + $0x94] sm:$0xf0]  ;;  %v935_v4 = vld [vmem:[%s7128_s4] sm:$0x7]  ;;  %v4549_v50 = vld [vmem:[#allocation2 + $0xc8] sm:$0xf] }
 0x16c   : > { %v772_v2 = vadd.f32 %v771_v1, %v5855_v8  ;;  %v821_v10 = vadd.f32 %v820_v7, %v5857_v9  ;;  %2609 = vrot.lane.b32.xlu1 %v4606_v5, %s5649_s26  ;;  %3230 = vrot.lane.b32.xlu2 %v4714_v6, %s5647_s11  ;;  %v4951_v8 = vld [vmem:[#allocation2 + $0xac] sm:$0xf0]  ;;  %v4646_v1 = vor.u32 %v4966_v58, %v4645_v56  ;;  %v1499_v6 = vsel %vm1458_vm0, %v4402_v62, 0 }
 0x16d   : > { %v4578_v9 = vor.u32 %v4951_v8, %v4577_v18  ;;  %v4650_v5 = vor.u32 %v4967_v60, %v4649_v59  ;;  %v5996_v7 = vperm.slane %v935_v4, 0  ;;  %v4685_v8 = vld [vmem:[#allocation2 + $0xc0] sm:$0xf]  ;;  %v6010_v39 = vperm.slane %v935_v4, 2  ;;  %v4959_v59 = vld [vmem:[#allocation2 + $0xb0] sm:$0xf0] }
 0x16e   : > { %v854_v12 = vpack.c.bf16 %v821_v10, %v772_v2  ;;  %v5967_v13 = vpop.permute.xlu2 %3164  ;;  %v4438_v2 = vor.u32 %v4918_v3, %v4437_v0  ;;  %v5999_v10 = vperm.slane %v935_v4, 1  ;;  %v4653_v60 = vld [vmem:[#allocation2 + $0xc8] sm:$0xf] }
 0x16f   : > { %7151 = vst [vmem:[#allocation21_spill] sm:$0xff] %v5967_v13  ;;  %v4449_v26 = vld [vmem:[#allocation2 + $0xe8] sm:$0xf] }
 0x170   : > { %886 = vst [vmem:[#allocation2 + $0xf8] sm:$0xff] %v854_v12  ;;  %v4913_v19 = vld [vmem:[#allocation2 + $0xf0] sm:$0xf0] }
 0x171   : > { %v4410_v21 = vor.u32 %v4913_v19, %v4409_v16  ;;  %v4910_v16 = vld [vmem:[#allocation2 + $0x90] sm:$0xf0]  ;;  %v4976_v19 = vld [vmem:[#allocation2 + $0xcc] sm:$0xf0] }
 0x172   : > { %v4398_v30 = vor.u32 %v4910_v16, %v4397_v15  ;;  %v4686_v31 = vor.u32 %v4976_v19, %v4685_v8  ;;  %v4421_v15 = vld [vmem:[#allocation2 + $0x8] sm:$0xf]  ;;  %v4389_v19 = vld [vmem:[#allocation2 + $0x44] sm:$0xf] }
 0x173   : > { %1994 = vrot.lane.b32.xlu0 %v4510_v20, %s5648_s16  ;;  %v1505_v23 = vsel %vm1458_vm0, %v4410_v21, 0  ;;  %v4505_v20 = vld [vmem:[#allocation2 + $0xa4] sm:$0xf] }
 0x174   : > { %3228 = vrot.lane.b32.xlu1 %v4710_v22, %s5647_s11  ;;  %2555 = vrot.lane.b32.xlu2 %v4578_v9, %s5649_s26  ;;  %v4935_v9 = vld [vmem:[#allocation2 + $0xb0] sm:$0xf0] }
 0x175   : > { %1507 = vmatpush.bf16.xpose.msrb.mxu3 %v1505_v23  ;;  %v5973_v24 = vpop.permute.xlu0 %3220  ;;  %v4477_v23 = vld [vmem:[#allocation2 + $0xc0] sm:$0xf] }
 0x176   : > { %v5975_v25 = vpop.permute.xlu1 %1982  ;;  %v5977_v32 = vpop.permute.xlu2 %2257 }
 0x177   : > { %v4921_v37 = vld [vmem:[#allocation2 + $0xf4] sm:$0xf0] }
 0x178   : > { %v4450_v40 = vor.u32 %v4921_v37, %v4449_v26  ;;  %v4928_v26 = vld [vmem:[#allocation2 + $0xcc] sm:$0xf0]  ;;  %v4506_v37 = vor.u32 %v4935_v9, %v4505_v20  ;;  %v4908_v20 = vld [vmem:[#allocation2 + $0x50] sm:$0xf0] }
 0x179   : > { %v4478_v38 = vor.u32 %v4928_v26, %v4477_v23  ;;  %v4929_v9 = vld [vmem:[#allocation2 + $0xec] sm:$0xf0] }
 0x17a   : > { %1724 = vmatpush.bf16.msra.mxu0 %v4450_v40  ;;  %v1496_v40 = vsel %vm1458_vm0, %v4398_v30, 0 }
 0x17b   : > { %2613 = vrot.lane.b32.xlu0 %v4614_v42, %s5649_s26  ;;  %v4425_v42 = vld [vmem:[#allocation2 + $0x28] sm:$0xf] }
 0x17c   : > { %2263 = vrot.lane.b32.xlu1 %v4542_v43, %s5648_s16  ;;  %3503 = vrot.lane.b32.xlu2 %v4754_v44, %s5647_s11  ;;  %v4915_v44 = vld [vmem:[#allocation2 + $0x34] sm:$0xf0] }
 0x17d   : > { %1508 = vmatpush.bf16.xpose.msrb.mxu3 %v1502_v46  ;;  %v5983_v48 = vpop.permute.xlu0 %2255  ;;  %v4909_v46 = vld [vmem:[#allocation2 + $0x70] sm:$0xf0]  ;;  %v4426_v0 = vor.u32 %v4915_v44, %v4425_v42 }
 0x17e   : > { %1725 = vmatpush.bf16.msra.mxu0 %v4446_v45  ;;  %v5985_v52 = vpop.permute.xlu1 %2545  ;;  %v5987_v53 = vpop.permute.xlu2 %3495  ;;  %v4393_v45 = vld [vmem:[#allocation2 + $0x64] sm:$0xf] }
 0x17f   : > { %v4394_v3 = vor.u32 %v4909_v46, %v4393_v45  ;;  %v4474_v45 = vor.u32 %v4927_v34, %v4473_v33 }
 0x181   : > { %v1493_v16 = vsel %vm1458_vm0, %v4394_v3, 0  ;;  %v4975_v3 = vld [vmem:[#allocation2 + $0xac] sm:$0xf0] }
 0x182   : > { %1726 = vmatpush.bf16.msra.mxu0 %v4442_v61  ;;  %v4968_v61 = vld [vmem:[#allocation2 + $0xd4] sm:$0xf0] }
 0x183   : > { %2557 = vrot.lane.b32.xlu0 %v4582_v63, %s5649_s26  ;;  %v4654_v11 = vor.u32 %v4968_v61, %v4653_v60  ;;  %v4937_v60 = vld [vmem:[#allocation2 + $0xf0] sm:$0xf0]  ;;  %v4681_v61 = vld [vmem:[#allocation2 + $0xa0] sm:$0xf] }
 0x184   : > { %2882 = vrot.lane.b32.xlu1 %v4646_v1, %s5649_s26  ;;  %2884 = vrot.lane.b32.xlu2 %v4650_v5, %s5649_s26  ;;  %v4550_v5 = vor.u32 %v4944_v51, %v4549_v50  ;;  %v4385_v51 = vld [vmem:[#allocation2 + $0x24] sm:$0xf] }
 0x185   : > { %1509 = vmatpush.bf16.xpose.msrb.mxu3 %v1499_v6  ;;  %v6001_v12 = vpop.permute.xlu0 %3493  ;;  %v4914_v6 = vld [vmem:[#allocation2 + $0x14] sm:$0xf0] }
 0x186   : > { %1727 = vmatpush.bf16.msra.mxu0 %v4438_v2  ;;  %v6003_v17 = vpop.permute.xlu1 %2603  ;;  %v6005_v18 = vpop.permute.xlu2 %1986  ;;  %v4610_v2 = vor.u32 %v4959_v59, %v4609_v54  ;;  %v4422_v8 = vor.u32 %v4914_v6, %v4421_v15  ;;  %v4907_v54 = vld [vmem:[#allocation2 + $0x30] sm:$0xf0]  ;;  %v4513_v59 = vld [vmem:[#allocation2 + $0xe4] sm:$0xf] }
 0x187   : > { %v1128_v21 = vpop.f32.mrf.mxu0  ;;  %v1177_v22 = vpop.f32.mrf.mxu1  ;;  %v4514_v15 = vor.u32 %v4937_v60, %v4513_v59 }
 0x188   : > { %v1129_v27 = vadd.f32 %v1128_v21, %v5996_v7  ;;  %v1178_v28 = vadd.f32 %v1177_v22, %v5999_v10  ;;  %v4481_v22 = vld [vmem:[#allocation2 + $0xe0] sm:$0xf] }
 0x18a   : > { %v1266_v36 = vpack.c.bf16 %v1178_v28, %v1129_v27  ;;  %1728 = vmatpush.bf16.msra.mxu0 %v4434_v29  ;;  %v4757_v27 = vld [vmem:[#allocation2 + $0xc8] sm:$0xf]  ;;  %v4992_v28 = vld [vmem:[#allocation2 + $0xd4] sm:$0xf0] }
 0x18b   : > { %3176 = vrot.lane.b32.xlu0 %v4686_v31, %s5647_s11  ;;  %v4758_v44 = vor.u32 %v4992_v28, %v4757_v27  ;;  %v4906_v27 = vld [vmem:[#allocation2 + $0x10] sm:$0xf0] }
 0x18c   : > { %1298 = vst [vmem:[%s6014_s23] sm:$0xff] %v1266_v36  ;;  %1992 = vrot.lane.b32.xlu1 %v4506_v37, %s5648_s16  ;;  %1938 = vrot.lane.b32.xlu2 %v4478_v38, %s5648_s16  ;;  %v4482_v38 = vor.u32 %v4929_v9, %v4481_v22  ;;  %v4553_v22 = vld [vmem:[#allocation2 + $0xe8] sm:$0xf]  ;;  %v4945_v9 = vld [vmem:[#allocation2 + $0xf4] sm:$0xf0] }
 0x18d   : > { %1510 = vmatpush.bf16.xpose.msrb.mxu3 %v1496_v40  ;;  %v6020_v43 = vpop.permute.xlu0 %1984  ;;  %v4390_v40 = vor.u32 %v4908_v20, %v4389_v19 }
 0x18e   : > { %v1226_v47 = vpop.f32.mrf.mxu2  ;;  %1729 = vmatpush.bf16.msra.mxu0 %v4430_v41  ;;  %v6022_v49 = vpop.permute.xlu1 %3222 }
 0x18f   : > { %v1227_v55 = vadd.f32 %v1226_v47, %v6010_v39  ;;  %v6025_v56 = vpop.permute.xlu2 %2605  ;;  %v1130_v58 = vpop.f32.mrf.mxu0  ;;  %v1490_v47 = vsel %vm1458_vm0, %v4390_v40, 0  ;;  %v4984_v40 = vld [vmem:[#allocation2 + $0xd0] sm:$0xf0] }
 0x190   : > { %v1131_v62 = vadd.f32 %v1130_v58, %v5996_v7  ;;  %v1179_v63 = vpop.f32.mrf.mxu1 }
 0x191   : > { %v1267_v4 = vpack.c.bf16 %v1227_v55, %v1227_v55  ;;  %v1180_v1 = vadd.f32 %v1179_v63, %v5999_v10 }
 0x192   : > { %1730 = vmatpush.bf16.msra.mxu0 %v4426_v0 }
 0x193   : > { %1299 = vst [vmem:[%s6014_s23 + $0x8] sm:$0xf] %v1267_v4  ;;  %v1268_v14 = vpack.c.bf16 %v1180_v1, %v1131_v62  ;;  %2267 = vrot.lane.b32.xlu0 %v4550_v5, %s5648_s16  ;;  %v4689_v4 = vld [vmem:[#allocation2 + $0xe0] sm:$0xf]  ;;  %v4977_v1 = vld [vmem:[#allocation2 + $0xec] sm:$0xf0] }
 0x194   : > { %2611 = vrot.lane.b32.xlu1 %v4610_v2, %s5649_s26  ;;  %2886 = vrot.lane.b32.xlu2 %v4654_v11, %s5649_s26  ;;  %v4386_v2 = vor.u32 %v4907_v54, %v4385_v51  ;;  %v4629_v51 = vld [vmem:[#allocation2 + $0x8] sm:$0xf] }
 0x195   : > { %1300 = vst [vmem:[%s6014_s23 + $0xc] sm:$0xff] %v1268_v14  ;;  %1511 = vmatpush.bf16.xpose.msrb.mxu3 %v1493_v16  ;;  %v6035_v21 = vpop.permute.xlu0 %1928  ;;  %v4682_v16 = vor.u32 %v4975_v3, %v4681_v61 }
 0x196   : > { %v1228_v23 = vpop.f32.mrf.mxu2  ;;  %1731 = vmatpush.bf16.msra.mxu0 %v4422_v8  ;;  %v6037_v26 = vpop.permute.xlu1 %3166  ;;  %v4690_v8 = vor.u32 %v4977_v1, %v4689_v4  ;;  %v1487_v20 = vsel %vm1458_vm0, %v4386_v2, 0  ;;  %v4617_v2 = vld [vmem:[#allocation2 + $0xe4] sm:$0xf] }
 0x197   : > { %7152 = vst [vmem:[#allocation22_spill] sm:$0xff] %v6037_v26  ;;  %v1229_v29 = vadd.f32 %v1228_v23, %v6010_v39  ;;  %v6040_v30 = vpop.permute.xlu2 %2259  ;;  %v1133_v31 = vpop.f32.mrf.mxu0 }
 0x198   : > { %v1134_v36 = vadd.f32 %v1133_v31, %v5996_v7  ;;  %v1182_v37 = vpop.f32.mrf.mxu1  ;;  %v4381_v31 = vld [vmem:[#allocation2 + $0x4] sm:$0xf] }
 0x199   : > { %v1269_v41 = vpack.c.bf16 %v1229_v29, %v1229_v29  ;;  %v1183_v42 = vadd.f32 %v1182_v37, %v5999_v10  ;;  %v4554_v37 = vor.u32 %v4945_v9, %v4553_v22  ;;  %v4349_v9 = vld [vmem:[#allocation2] sm:$0xf] }
 0x19b   : > { %1301 = vst [vmem:[%s6014_s23 + $0x14] sm:$0xf] %v1269_v41  ;;  %v1270_v46 = vpack.c.bf16 %v1183_v42, %v1134_v36  ;;  %3505 = vrot.lane.b32.xlu0 %v4758_v44, %s5647_s11  ;;  %v4962_v41 = vld [vmem:[#allocation2 + $0x14] sm:$0xf0] }
 0x19c   : > { %1936 = vrot.lane.b32.xlu1 %v4474_v45, %s5648_s16  ;;  %1940 = vrot.lane.b32.xlu2 %v4482_v38, %s5648_s16  ;;  %v4717_v38 = vld [vmem:[#allocation2 + $0xc4] sm:$0xf]  ;;  %v4382_v45 = vor.u32 %v4906_v27, %v4381_v31 }
 0x19d   : > { %1302 = vst [vmem:[%s6014_s23 + $0x18] sm:$0xff] %v1270_v46  ;;  %1512 = vmatpush.bf16.xpose.msrb.mxu3 %v1490_v47  ;;  %v6050_v50 = vpop.permute.xlu0 %2547  ;;  %v4718_v54 = vor.u32 %v4984_v40, %v4717_v38 }
 0x19e   : > { %v6052_v55 = vpop.permute.xlu1 %1930  ;;  %v1231_v58 = vpop.f32.mrf.mxu2  ;;  %v1484_v60 = vsel %vm1458_vm0, %v4382_v45, 0 }
 0x19f   : > { %v6054_v62 = vpop.permute.xlu2 %2878  ;;  %v1232_v63 = vadd.f32 %v1231_v58, %v6010_v39  ;;  %v1135_v0 = vpop.f32.mrf.mxu0  ;;  %v4630_v58 = vor.u32 %v4962_v41, %v4629_v51  ;;  %v4721_v41 = vld [vmem:[#allocation2 + $0xe4] sm:$0xf] }
 0x1a0   : > { %v1136_v5 = vadd.f32 %v1135_v0, %v5996_v7  ;;  %v1184_v6 = vpop.f32.mrf.mxu1  ;;  %v4969_v0 = vld [vmem:[#allocation2 + $0xf4] sm:$0xf0] }
 0x1a1   : > { %v1271_v11 = vpack.c.bf16 %v1232_v63, %v1232_v63  ;;  %v1185_v14 = vadd.f32 %v1184_v6, %v5999_v10  ;;  %v4657_v63 = vld [vmem:[#allocation2 + $0xe8] sm:$0xf] }
 0x1a3   : > { %1303 = vst [vmem:[%s6014_s23 + $0x20] sm:$0xf] %v1271_v11  ;;  %v1272_v19 = vpack.c.bf16 %v1185_v14, %v1136_v5  ;;  %1996 = vrot.lane.b32.xlu0 %v4514_v15, %s5648_s16  ;;  %v4961_v11 = vld [vmem:[#allocation2 + $0xf0] sm:$0xf0] }
 0x1a4   : > { %3174 = vrot.lane.b32.xlu1 %v4682_v16, %s5647_s11  ;;  %3178 = vrot.lane.b32.xlu2 %v4690_v8, %s5647_s11  ;;  %v4658_v16 = vor.u32 %v4969_v0, %v4657_v63  ;;  %v4898_v8 = vld [vmem:[#allocation2 + $0xc] sm:$0xf0]  ;;  %v4618_v22 = vor.u32 %v4961_v11, %v4617_v2 }
 0x1a5   : > { %1304 = vst [vmem:[%s6014_s23 + $0x24] sm:$0xff] %v1272_v19  ;;  %1513 = vmatpush.bf16.xpose.msrb.mxu3 %v1487_v20  ;;  %v6065_v23 = vpop.permute.xlu0 %3224 }
 0x1a6   : > { %v6067_v28 = vpop.permute.xlu1 %2549  ;;  %v1233_v29 = vpop.f32.mrf.mxu2 }
 0x1a7   : > { %v6069_v33 = vpop.permute.xlu2 %1988  ;;  %v1234_v34 = vadd.f32 %v1233_v29, %v6010_v39  ;;  %v1138_v36 = vpop.f32.mrf.mxu0  ;;  %v4350_v29 = vor.u32 %v4898_v8, %v4349_v9 }
 0x1a8   : > { %v1139_v42 = vadd.f32 %v1138_v36, %v5996_v7  ;;  %v1187_v44 = vpop.f32.mrf.mxu1 }
 0x1a9   : > { %v1273_v46 = vpack.c.bf16 %v1234_v34, %v1234_v34  ;;  %v1188_v47 = vadd.f32 %v1187_v44, %v5999_v10 }
 0x1ab   : > { %1305 = vst [vmem:[%s6014_s23 + $0x2c] sm:$0xf] %v1273_v46  ;;  %v1274_v59 = vpack.c.bf16 %v1188_v47, %v1139_v42  ;;  %2269 = vrot.lane.b32.xlu0 %v4554_v37, %s5648_s16  ;;  %v4985_v42 = vld [vmem:[#allocation2 + $0xf0] sm:$0xf0] }
 0x1ac   : > { %3232 = vrot.lane.b32.xlu1 %v4718_v54, %s5647_s11  ;;  %2874 = vrot.lane.b32.xlu2 %v4630_v58, %s5649_s26  ;;  %v4722_v51 = vor.u32 %v4985_v42, %v4721_v41 }
 0x1ad   : > { %1306 = vst [vmem:[%s6014_s23 + $0x30] sm:$0xff] %v1274_v59  ;;  %1514 = vmatpush.bf16.xpose.msrb.mxu3 %v1484_v60  ;;  %v6080_v61 = vpop.permute.xlu0 %3497 }
 0x1ae   : > { %v6082_v3 = vpop.permute.xlu1 %3168  ;;  %v1236_v4 = vpop.f32.mrf.mxu2 }
 0x1af   : > { %7153 = vst [vmem:[#allocation23_spill] sm:$0xff] %v6082_v3  ;;  %v6084_v1 = vpop.permute.xlu2 %2551  ;;  %v1237_v5 = vadd.f32 %v1236_v4, %v6010_v39  ;;  %v1140_v6 = vpop.f32.mrf.mxu0 }
 0x1b0   : > { %v1141_v14 = vadd.f32 %v1140_v6, %v5996_v7  ;;  %v1189_v15 = vpop.f32.mrf.mxu1  ;;  %v4953_v6 = vld [vmem:[#allocation2 + $0xec] sm:$0xf0] }
 0x1b1   : > { %v1275_v19 = vpack.c.bf16 %v1237_v5, %v1237_v5  ;;  %v1190_v20 = vadd.f32 %v1189_v15, %v5999_v10  ;;  %v4585_v5 = vld [vmem:[#allocation2 + $0xe0] sm:$0xf] }
 0x1b2   : > { %v4586_v8 = vor.u32 %v4953_v6, %v4585_v5 }
 0x1b3   : > { %1307 = vst [vmem:[%s6014_s23 + $0x38] sm:$0xf] %v1275_v19  ;;  %v1276_v27 = vpack.c.bf16 %v1190_v20, %v1141_v14  ;;  %v4899_v14 = vld [vmem:[#allocation2 + $0x2c] sm:$0xf0]  ;;  %v4353_v19 = vld [vmem:[#allocation2 + $0x20] sm:$0xf] }
 0x1b4   : > { %2615 = vrot.lane.b32.xlu1 %v4618_v22, %s5649_s26  ;;  %2888 = vrot.lane.b32.xlu2 %v4658_v16, %s5649_s26  ;;  %v4354_v22 = vor.u32 %v4899_v14, %v4353_v19  ;;  %v4963_v14 = vld [vmem:[#allocation2 + $0x34] sm:$0xf0]  ;;  %v4900_v19 = vld [vmem:[#allocation2 + $0x4c] sm:$0xf0] }
 0x1b5   : > { %1308 = vst [vmem:[%s6014_s23 + $0x3c] sm:$0xff] %v1276_v27  ;;  %4411 = vmatmul.msk.bf16.vlgmr.msrb.gmra.mxu3 %vm1458_vm0, %v4350_v29  ;;  %v6094_v31 = vpop.permute.xlu0 %1932  ;;  %v4761_v27 = vld [vmem:[#allocation2 + $0xe8] sm:$0xf]  ;;  %v4993_v29 = vld [vmem:[#allocation2 + $0xf4] sm:$0xf0] }
 0x1b6   : > { %v6096_v34 = vpop.permute.xlu1 %2607  ;;  %v1238_v36 = vpop.f32.mrf.mxu2 }
 0x1b7   : > { %v6098_v37 = vpop.permute.xlu2 %3499  ;;  %v1239_v38 = vadd.f32 %v1238_v36, %v6010_v39  ;;  %v1143_v40 = vpop.f32.mrf.mxu0 }
 0x1b8   : > { %v1144_v44 = vadd.f32 %v1143_v40, %v5996_v7  ;;  %v1192_v45 = vpop.f32.mrf.mxu1 }
 0x1b9   : > { %v1277_v46 = vpack.c.bf16 %v1239_v38, %v1239_v38  ;;  %v1193_v47 = vadd.f32 %v1192_v45, %v5999_v10 }
 0x1bb   : > { %1309 = vst [vmem:[%s6014_s23 + $0x44] sm:$0xf] %v1277_v46  ;;  %v1278_v54 = vpack.c.bf16 %v1193_v47, %v1144_v44  ;;  %v4762_v46 = vor.u32 %v4993_v29, %v4761_v27 }
 0x1bc   : > { %3234 = vrot.lane.b32.xlu1 %v4722_v51, %s5647_s11 }
 0x1bd   : > { %1310 = vst [vmem:[%s6014_s23 + $0x48] sm:$0xff] %v1278_v54  ;;  %v6106_v58 = vpop.permute.xlu0 %2261 }
 0x1be   : > { %v6108_v59 = vpop.permute.xlu1 %3226  ;;  %v1241_v60 = vpop.f32.mrf.mxu2 }
 0x1bf   : > { %v6110_v63 = vpop.permute.xlu2 %3501  ;;  %v1242_v0 = vadd.f32 %v1241_v60, %v6010_v39  ;;  %v1145_v4 = vpop.f32.mrf.mxu0 }
 0x1c0   : > { %v1146_v2 = vadd.f32 %v1145_v4, %v5996_v7  ;;  %v1194_v11 = vpop.f32.mrf.mxu1 }
 0x1c1   : > { %v1279_v15 = vpack.c.bf16 %v1242_v0, %v1242_v0  ;;  %v1195_v16 = vadd.f32 %v1194_v11, %v5999_v10  ;;  %v4633_v11 = vld [vmem:[#allocation2 + $0x28] sm:$0xf] }
 0x1c2   : > { %v4634_v27 = vor.u32 %v4963_v14, %v4633_v11 }
 0x1c3   : > { %1311 = vst [vmem:[%s6014_s23 + $0x50] sm:$0xf] %v1279_v15  ;;  %v1280_v20 = vpack.c.bf16 %v1195_v16, %v1146_v2 }
 0x1c4   : > { %2559 = vrot.lane.b32.xlu1 %v4586_v8, %s5649_s26  ;;  %v4357_v8 = vld [vmem:[#allocation2 + $0x40] sm:$0xf] }
 0x1c5   : > { %1312 = vst [vmem:[%s6014_s23 + $0x54] sm:$0xff] %v1280_v20  ;;  %4412 = vmatmul.msk.bf16.gmra.mxu3 %vm1458_vm0, %v4354_v22  ;;  %v6119_v9 = vpop.permute.xlu0 %1934 }
 0x1c6   : > { %v6121_v36 = vpop.permute.xlu1 %3170  ;;  %v1243_v38 = vpop.f32.mrf.mxu2 }
 0x1c7   : > { %7154 = vst [vmem:[#allocation24_spill] sm:$0xff] %v6121_v36  ;;  %v6123_v40 = vpop.permute.xlu2 %3230  ;;  %v1244_v41 = vadd.f32 %v1243_v38, %v6010_v39  ;;  %v1148_v42 = vpop.f32.mrf.mxu0  ;;  %v4358_v38 = vor.u32 %v4900_v19, %v4357_v8 }
 0x1c8   : > { %v1149_v44 = vadd.f32 %v1148_v42, %v5996_v7  ;;  %v1197_v45 = vpop.f32.mrf.mxu1 }
 0x1c9   : > { %v1281_v47 = vpack.c.bf16 %v1244_v41, %v1244_v41  ;;  %v1198_v51 = vadd.f32 %v1197_v45, %v5999_v10 }
 0x1cb   : > { %1313 = vst [vmem:[%s6014_s23 + $0x5c] sm:$0xf] %v1281_v47  ;;  %v1282_v54 = vpack.c.bf16 %v1198_v51, %v1149_v44 }
 0x1cc   : > { %3507 = vrot.lane.b32.xlu1 %v4762_v46, %s5647_s11 }
 0x1cd   : > { %1314 = vst [vmem:[%s6014_s23 + $0x60] sm:$0xff] %v1282_v54  ;;  %v6131_v60 = vpop.permute.xlu0 %2553 }
 0x1ce   : > { %v6133_v0 = vpop.permute.xlu1 %2880  ;;  %v1246_v4 = vpop.f32.mrf.mxu2 }
 0x1cf   : > { %v6135_v5 = vpop.permute.xlu2 %2555  ;;  %v1247_v6 = vadd.f32 %v1246_v4, %v6010_v39  ;;  %v1150_v2 = vpop.f32.mrf.mxu0 }
 0x1d0   : > { %7155 = vst [vmem:[#allocation25_spill] sm:$0xff] %v6135_v5  ;;  %v1151_v15 = vadd.f32 %v1150_v2, %v5996_v7  ;;  %v1199_v16 = vpop.f32.mrf.mxu1 }
 0x1d1   : > { %v1283_v20 = vpack.c.bf16 %v1247_v6, %v1247_v6  ;;  %v1200_v22 = vadd.f32 %v1199_v16, %v5999_v10 }
 0x1d3   : > { %1315 = vst [vmem:[%s6014_s23 + $0x68] sm:$0xf] %v1283_v20  ;;  %v1284_v29 = vpack.c.bf16 %v1200_v22, %v1151_v15 }
 0x1d4   : > { %2876 = vrot.lane.b32.xlu1 %v4634_v27, %s5649_s26  ;;  %v4361_v27 = vld [vmem:[#allocation2 + $0x60] sm:$0xf] }
 0x1d5   : > { %1316 = vst [vmem:[%s6014_s23 + $0x6c] sm:$0xff] %v1284_v29  ;;  %4413 = vmatmul.msk.bf16.gmra.mxu3 %vm1458_vm0, %v4358_v38  ;;  %v6144_v41 = vpop.permute.xlu0 %3172  ;;  %v4901_v29 = vld [vmem:[#allocation2 + $0x6c] sm:$0xf0] }
 0x1d6   : > { %7156 = vst [vmem:[#allocation26_spill] sm:$0xff] %v6144_v41  ;;  %v6146_v42 = vpop.permute.xlu1 %1990  ;;  %v1248_v44 = vpop.f32.mrf.mxu2  ;;  %v4365_v41 = vld [vmem:[#allocation2 + $0x80] sm:$0xf] }
 0x1d7   : > { %v6148_v45 = vpop.permute.xlu2 %3503  ;;  %v1249_v46 = vadd.f32 %v1248_v44, %v6010_v39  ;;  %v1153_v47 = vpop.f32.mrf.mxu0 }
 0x1d8   : > { %v1154_v51 = vadd.f32 %v1153_v47, %v5996_v7  ;;  %v1202_v54 = vpop.f32.mrf.mxu1  ;;  %v4362_v47 = vor.u32 %v4901_v29, %v4361_v27 }
 0x1d9   : > { %v1285_v4 = vpack.c.bf16 %v1249_v46, %v1249_v46  ;;  %v1203_v6 = vadd.f32 %v1202_v54, %v5999_v10 }
 0x1db   : > { %1317 = vst [vmem:[%s6014_s23 + $0x74] sm:$0xf] %v1285_v4  ;;  %v1286_v2 = vpack.c.bf16 %v1203_v6, %v1154_v51 }
 0x1dd   : > { %1318 = vst [vmem:[%s6014_s23 + $0x78] sm:$0xff] %v1286_v2  ;;  %v6155_v11 = vpop.permute.xlu0 %2265 }
 0x1de   : > { %v6157_v14 = vpop.permute.xlu1 %2609  ;;  %v1251_v15 = vpop.f32.mrf.mxu2 }
 0x1df   : > { %v6159_v16 = vpop.permute.xlu2 %2884  ;;  %v1252_v8 = vadd.f32 %v1251_v15, %v6010_v39  ;;  %v1155_v19 = vpop.f32.mrf.mxu0 }
 0x1e0   : > { %v1156_v20 = vadd.f32 %v1155_v19, %v5996_v7  ;;  %v1204_v22 = vpop.f32.mrf.mxu1 }
 0x1e1   : > { %v1287_v38 = vpack.c.bf16 %v1252_v8, %v1252_v8  ;;  %v1205_v44 = vadd.f32 %v1204_v22, %v5999_v10 }
 0x1e3   : > { %1319 = vst [vmem:[%s6014_s23 + $0x80] sm:$0xf] %v1287_v38  ;;  %v1288_v46 = vpack.c.bf16 %v1205_v44, %v1156_v20 }
 0x1e5   : > { %1320 = vst [vmem:[%s6014_s23 + $0x84] sm:$0xff] %v1288_v46  ;;  %4414 = vmatmul.msk.bf16.gmra.mxu3 %vm1458_vm0, %v4362_v47  ;;  %v6167_v51 = vpop.permute.xlu0 %1994 }
 0x1e6   : > { %v6169_v54 = vpop.permute.xlu1 %3228  ;;  %v1253_v4 = vpop.f32.mrf.mxu2 }
 0x1e7   : > { %v6171_v6 = vpop.permute.xlu2 %1938  ;;  %v1254_v2 = vadd.f32 %v1253_v4, %v6010_v39  ;;  %v1158_v15 = vpop.f32.mrf.mxu0 }
 0x1e8   : > { %7157 = vst [vmem:[#allocation27_spill] sm:$0xff] %v6171_v6  ;;  %v1159_v8 = vadd.f32 %v1158_v15, %v5996_v7  ;;  %v1207_v19 = vpop.f32.mrf.mxu1  ;;  %v4902_v15 = vld [vmem:[#allocation2 + $0x8c] sm:$0xf0] }
 0x1e9   : > { %v1289_v22 = vpack.c.bf16 %v1254_v2, %v1254_v2  ;;  %v1208_v20 = vadd.f32 %v1207_v19, %v5999_v10 }
 0x1eb   : > { %1321 = vst [vmem:[%s6014_s23 + $0x8c] sm:$0xf] %v1289_v22  ;;  %v1290_v27 = vpack.c.bf16 %v1208_v20, %v1159_v8  ;;  %v4366_v20 = vor.u32 %v4902_v15, %v4365_v41  ;;  %v4369_v41 = vld [vmem:[#allocation2 + $0xa0] sm:$0xf]  ;;  %v4903_v15 = vld [vmem:[#allocation2 + $0xac] sm:$0xf0] }
 0x1ed   : > { %v6177_v29 = vpop.permute.xlu0 %2613  ;;  %1322 = vst [vmem:[%s6014_s23 + $0x90] sm:$0xff] %v1290_v27 }
 0x1ee   : > { %v6180_v38 = vpop.permute.xlu1 %2263  ;;  %v1256_v44 = vpop.f32.mrf.mxu2 }
 0x1ef   : > { %v2887_v46 = vpop.permute.xlu2 %2886  ;;  %v1257_v47 = vadd.f32 %v1256_v44, %v6010_v39  ;;  %v1160_v4 = vpop.f32.mrf.mxu0 }
 0x1f0   : > { %v1161_v2 = vadd.f32 %v1160_v4, %v5996_v7  ;;  %v1209_v19 = vpop.f32.mrf.mxu1 }
 0x1f1   : > { %v1291_v22 = vpack.c.bf16 %v1257_v47, %v1257_v47  ;;  %v1210_v8 = vadd.f32 %v1209_v19, %v5999_v10 }
 0x1f3   : > { %1323 = vst [vmem:[%s6014_s23 + $0x98] sm:$0xf] %v1291_v22  ;;  %v1292_v27 = vpack.c.bf16 %v1210_v8, %v1161_v2  ;;  %v4370_v2 = vor.u32 %v4903_v15, %v4369_v41 }
 0x1f5   : > { %4415 = vmatmul.msk.bf16.gmra.mxu3 %vm1458_vm0, %v4366_v20  ;;  %v6187_v36 = vpop.permute.xlu0 %2557  ;;  %1324 = vst [vmem:[%s6014_s23 + $0x9c] sm:$0xff] %v1292_v27 }
 0x1f6   : > { %7158 = vst [vmem:[#allocation28_spill] sm:$0xff] %v6187_v36  ;;  %v2883_v3 = vpop.permute.xlu1 %2882  ;;  %v1258_v44 = vpop.f32.mrf.mxu2 }
 0x1f7   : > { %v6190_v26 = vpop.permute.xlu2 %1940  ;;  %v1259_v13 = vadd.f32 %v1258_v44, %v6010_v39  ;;  %v4904_v44 = vld [vmem:[#allocation2 + $0xcc] sm:$0xf0] }
 0x1f8   : > { %7159 = vst [vmem:[#allocation29_spill] sm:$0xff] %v6190_v26  ;;  %v4873_v26 = vld [vmem:[#allocation2 + $0xf8] sm:$0xf0] }
 0x1f9   : > { %v1293_v5 = vpack.c.bf16 %v1259_v13, %v1259_v13 }
 0x1fb   : > { %1325 = vst [vmem:[%s6014_s23 + $0xa4] sm:$0xf] %v1293_v5  ;;  %v4373_v5 = vld [vmem:[#allocation2 + $0xc0] sm:$0xf] }
 0x1fd   : > { %v6194_v4 = vpop.permute.xlu0 %3176 }
 0x1fe   : > { %7160 = vst [vmem:[#allocation30_spill] sm:$0xff] %v6194_v4  ;;  %v1993_v47 = vpop.permute.xlu1 %1992  ;;  %v4374_v4 = vor.u32 %v4904_v44, %v4373_v5 }
 0x1ff   : > { %v6196_v19 = vpop.permute.xlu2 %3178 }
 0x200   : > { %7161 = vst [vmem:[#allocation31_spill] sm:$0xff] %v6196_v19 }
 0x205   : > { %4416 = vmatmul.msk.bf16.gmra.mxu3 %vm1458_vm0, %v4370_v2  ;;  %v2268_v22 = vpop.permute.xlu0 %2267  ;;  %v4249_v2 = vld [vmem:[#allocation2 + $0xec] sm:$0xf] }
 0x206   : > { %v2612_v8 = vpop.permute.xlu1 %2611  ;;  %v4250_v6 = vor.u32 %v4873_v26, %v4249_v2 }
 0x207   : > { %v6199_v20 = vpop.permute.xlu2 %2874 }
 0x208   : > { %1211 = vmatmul.bf16.gmra.mxu1 %v4250_v6  ;;  %1162 = vmatmul.bf16.gmra.mxu0 %v4250_v6 }
 0x209   : > { %1260 = vmatmul.bf16.gmra.mxu2 %v4250_v6  ;;  %v2032_v6 = vsel %vm1458_vm0, %v6069_v33, 0 }
 0x20d   : > { %v6201_v27 = vpop.permute.xlu0 %3505 }
 0x20e   : > { %v6203_v36 = vpop.permute.xlu1 %1936 }
 0x20f   : > { %v2889_v13 = vpop.permute.xlu2 %2888 }
 0x210   : > { %2898 = vmatpush.bf16.msrb.mxu0 %v2889_v13 }
 0x214   : > { %2899 = vmatpush.bf16.msrb.mxu0 %v2887_v46  ;;  %v2041_v46 = vsel %vm1458_vm0, %v6167_v51, 0  ;;  %v2035_v51 = vsel %vm1458_vm0, %v6146_v42, 0 }
 0x215   : > { %4417 = vmatmul.msk.bf16.gmra.mxu3 %vm1458_vm0, %v4374_v4  ;;  %v1997_v19 = vpop.permute.xlu0 %1996  ;;  %v4377_v4 = vld [vmem:[#allocation2 + $0xe0] sm:$0xf] }
 0x216   : > { %v2044_v41 = vsel %vm1458_vm0, %v1997_v19, 0  ;;  %v6207_v15 = vpop.permute.xlu1 %3174  ;;  %v4905_v19 = vld [vmem:[#allocation2 + $0xec] sm:$0xf0] }
 0x217   : > { %2046 = vmatpush.bf16.xpose.msra.mxu1 %v2044_v41  ;;  %v4378_v44 = vor.u32 %v4905_v19, %v4377_v4 }
 0x218   : > { %2900 = vmatpush.bf16.msrb.mxu0 %v6159_v16 }
 0x21c   : > { %2901 = vmatpush.bf16.msrb.mxu0 %v2883_v3  ;;  %v2038_v3 = vsel %vm1458_vm0, %v1993_v47, 0 }
 0x21d   : > { %v2270_v13 = vpop.permute.xlu0 %2269 }
 0x21e   : > { %v6210_v5 = vpop.permute.xlu1 %3232  ;;  %2279 = vmatpush.bf16.msra.mxu2 %v2270_v13 }
 0x21f   : > { %2047 = vmatpush.bf16.xpose.msra.mxu1 %v2041_v46 }
 0x220   : > { %2902 = vmatpush.bf16.msrb.mxu0 %v6133_v0 }
 0x222   : > { %2280 = vmatpush.bf16.msra.mxu2 %v2268_v22 }
 0x224   : > { %2903 = vmatpush.bf16.msrb.mxu0 %v6054_v62  ;;  %v2660_v62 = vsel %vm1458_vm0, %v6177_v29, 0 }
 0x225   : > { %4418 = vmatmul.msk.bf16.gmra.mxu3 %vm1458_vm0, %v4378_v44 }
 0x226   : > { %v2616_v26 = vpop.permute.xlu1 %2615  ;;  %2281 = vmatpush.bf16.msra.mxu2 %v6155_v11 }
 0x227   : > { %v2663_v16 = vsel %vm1458_vm0, %v2616_v26, 0  ;;  %2048 = vmatpush.bf16.xpose.msra.mxu1 %v2038_v3 }
 0x228   : > { %2665 = vmatpush.bf16.xpose.msra.mxu3 %v2663_v16 }
 0x22a   : > { %2282 = vmatpush.bf16.msra.mxu2 %v6180_v38 }
 0x22e   : > { %v3235_v0 = vpop.permute.xlu1 %3234  ;;  %2283 = vmatpush.bf16.msra.mxu2 %v6106_v58  ;;  %v2657_v58 = vsel %vm1458_vm0, %v2612_v8, 0 }
 0x22f   : > { %2049 = vmatpush.bf16.xpose.msra.mxu1 %v2035_v51 }
 0x230   : > { %2666 = vmatpush.bf16.xpose.msra.mxu3 %v2660_v62 }
 0x232   : > { %2284 = vmatpush.bf16.msra.mxu2 %v6040_v30  ;;  %v2029_v30 = vsel %vm1458_vm0, %v6005_v18, 0  ;;  %v2651_v18 = vsel %vm1458_vm0, %v6096_v34, 0  ;;  %v3282_v34 = vsel %vm1458_vm0, %v3235_v0, 0  ;;  %v7162_v0 = vld [vmem:[#allocation27_spill] sm:$0xff] }
 0x236   : > { %v6227_v11 = vpop.permute.xlu1 %2559  ;;  %2285 = vmatpush.bf16.msra.mxu2 %v5977_v32  ;;  %v2654_v32 = vsel %vm1458_vm0, %v6157_v14, 0 }
 0x237   : > { %2050 = vmatpush.bf16.xpose.msra.mxu1 %v2032_v6 }
 0x238   : > { %v6233_v38 = vpop.f32.mrf.mxu3  ;;  %2667 = vmatpush.bf16.xpose.msra.mxu3 %v2657_v58 }
 0x239   : > { %1556 = vmax.xlane.f32.xlu2 %v6233_v38 }
 0x23a   : > { %2286 = vmatpush.bf16.msra.mxu2 %v5983_v48  ;;  %v2026_v48 = vsel %vm1458_vm0, %v6020_v43, 0  ;;  %v2648_v43 = vsel %vm1458_vm0, %v6025_v56, 0 }
 0x23e   : > { %v3508_v42 = vpop.permute.xlu1 %3507 }
 0x23f   : > { %3517 = vmatpush.bf16.msrb.mxu2 %v3508_v42  ;;  %2051 = vmatpush.bf16.xpose.msra.mxu1 %v2029_v30 }
 0x240   : > { %v6241_v33 = vpop.f32.mrf.mxu3  ;;  %2668 = vmatpush.bf16.xpose.msra.mxu3 %v2654_v32  ;;  %v7164_v32 = vld [vmem:[#allocation29_spill] sm:$0xff] }
 0x241   : > { %1558 = vmax.xlane.f32.xlu0 %v6241_v33 }
 0x243   : > { %3518 = vmatpush.bf16.msrb.mxu2 %v6201_v27 }
 0x246   : > { %v2877_v29 = vpop.permute.xlu1 %2876 }
 0x247   : > { %2904 = vmatpush.bf16.msrb.mxu0 %v2877_v29  ;;  %3519 = vmatpush.bf16.msrb.mxu2 %v6148_v45  ;;  %v2023_v45 = vsel %vm1458_vm0, %v5975_v25, 0  ;;  %v2645_v25 = vsel %vm1458_vm0, %v6003_v17, 0 }
 0x248   : > { %v6250_v47 = vpop.f32.mrf.mxu3  ;;  %2052 = vmatpush.bf16.xpose.msra.mxu1 %v2026_v48  ;;  %2669 = vmatpush.bf16.xpose.msra.mxu3 %v2651_v18 }
 0x249   : > { %1560 = vmax.xlane.f32.xlu2 %v6250_v47 }
 0x24b   : > { %2905 = vmatpush.bf16.msrb.mxu0 %v6199_v20  ;;  %3520 = vmatpush.bf16.msrb.mxu2 %v6110_v63  ;;  %v3270_v63 = vsel %vm1458_vm0, %v6108_v59, 0  ;;  %v3264_v59 = vsel %vm1458_vm0, %v6022_v49, 0 }
 0x24f   : > { %3521 = vmatpush.bf16.msrb.mxu2 %v6098_v37  ;;  %v3279_v37 = vsel %vm1458_vm0, %v6210_v5, 0 }
 0x250   : > { %v6261_v14 = vpop.f32.mrf.mxu3  ;;  %2053 = vmatpush.bf16.xpose.msra.mxu1 %v2023_v45  ;;  %2670 = vmatpush.bf16.xpose.msra.mxu3 %v2648_v43 }
 0x251   : > { %1562 = vmax.xlane.f32.xlu0 %v6261_v14 }
 0x253   : > { %3522 = vmatpush.bf16.msrb.mxu2 %v6080_v61  ;;  %v2642_v61 = vsel %vm1458_vm0, %v5960_v57, 0  ;;  %v3273_v57 = vsel %vm1458_vm0, %v6169_v54, 0 }
 0x257   : > { %4515 = vmatmul.msk.bf16.vlgmr.msra.gmra.mxu1 %vm1458_vm0, %v5951_v35  ;;  %3523 = vmatpush.bf16.msrb.mxu2 %v5987_v53  ;;  %v3276_v53 = vsel %vm1458_vm0, %v6123_v40, 0 }
 0x258   : > { %3284 = vmatpush.bf16.xpose.msrb.mxu1 %v3282_v34  ;;  %v6270_v56 = vpop.f32.mrf.mxu3  ;;  %2671 = vmatpush.bf16.xpose.msra.mxu3 %v2645_v25 }
 0x259   : > { %1564 = vmax.xlane.f32.xlu0 %v6270_v56 }
 0x25b   : > { %3524 = vmatpush.bf16.msrb.mxu2 %v6001_v12 }
 0x260   : > { %3285 = vmatpush.bf16.xpose.msrb.mxu1 %v3279_v37  ;;  %v6278_v35 = vpop.f32.mrf.mxu3  ;;  %2672 = vmatpush.bf16.xpose.msra.mxu3 %v2642_v61  ;;  %v7166_v61 = vld [vmem:[#allocation21_spill] sm:$0xff] }
 0x261   : > { %1566 = vmax.xlane.f32.xlu2 %v6278_v35 }
 0x267   : > { %4516 = vmatmul.msk.bf16.gmra.mxu1 %vm1458_vm0, %v6035_v21  ;;  %4619 = vmatmul.msk.bf16.vlgmr.msra.gmra.mxu3 %vm1458_vm0, %v5985_v52  ;;  %v3267_v21 = vsel %vm1458_vm0, %v6065_v23, 0 }
 0x268   : > { %3286 = vmatpush.bf16.xpose.msrb.mxu1 %v3276_v53  ;;  %v6287_v17 = vpop.f32.mrf.mxu3 }
 0x269   : > { %1568 = vmax.xlane.f32.xlu0 %v6287_v17 }
 0x270   : > { %3287 = vmatpush.bf16.xpose.msrb.mxu1 %v3273_v57  ;;  %v6292_v12 = vpop.f32.mrf.mxu3 }
 0x271   : > { %1570 = vmax.xlane.f32.xlu2 %v6292_v12 }
 0x277   : > { %4517 = vmatmul.msk.bf16.gmra.mxu1 %vm1458_vm0, %v6052_v55  ;;  %4620 = vmatmul.msk.bf16.gmra.mxu3 %vm1458_vm0, %v6050_v50  ;;  %v3261_v55 = vsel %vm1458_vm0, %v5973_v24, 0 }
 0x278   : > { %3288 = vmatpush.bf16.xpose.msrb.mxu1 %v3270_v63  ;;  %v6301_v52 = vpop.f32.mrf.mxu3 }
 0x279   : > { %1572 = vmax.xlane.f32.xlu1 %v6301_v52 }
 0x280   : > { %3289 = vmatpush.bf16.xpose.msrb.mxu1 %v3267_v21  ;;  %v6306_v40 = vpop.f32.mrf.mxu3 }
 0x281   : > { %1574 = vmax.xlane.f32.xlu0 %v6306_v40 }
 0x285   : > { %v1212_v49 = vpop.f32.mrf.mxu1 }
 0x286   : > { %v1213_v20 = vadd.f32 %v1212_v49, %v5999_v10 }
 0x287   : > { %4518 = vmatmul.msk.bf16.gmra.mxu1 %vm1458_vm0, %v6094_v31  ;;  %4621 = vmatmul.msk.bf16.gmra.mxu3 %vm1458_vm0, %v6067_v28  ;;  %v1163_v28 = vpop.f32.mrf.mxu0 }
 0x288   : > { %3290 = vmatpush.bf16.xpose.msrb.mxu1 %v3264_v59  ;;  %v6315_v50 = vpop.f32.mrf.mxu3 }
 0x289   : > { %1576 = vmax.xlane.f32.xlu0 %v6315_v50 }
 0x28c   : > { %v1261_v24 = vpop.f32.mrf.mxu2 }
 0x28d   : > { %v1214_v54 = vpop.f32.mrf.mxu1  ;;  %v1262_v13 = vadd.f32 %v1261_v24, %v6010_v39 }
 0x28f   : > { %v1165_v22 = vpop.f32.mrf.mxu0  ;;  %v1295_v46 = vpack.c.bf16 %v1262_v13, %v1262_v13 }
 0x290   : > { %3291 = vmatpush.bf16.xpose.msrb.mxu1 %v3261_v55  ;;  %v6320_v23 = vpop.f32.mrf.mxu3  ;;  %v1166_v27 = vadd.f32 %v1165_v22, %v5996_v7  ;;  %v7167_v22 = vld [vmem:[#allocation22_spill] sm:$0xff] }
 0x291   : > { %1578 = vmax.xlane.f32.xlu0 %v6320_v23  ;;  %1327 = vst [vmem:[%s6014_s23 + $0xb0] sm:$0xf] %v1295_v46 }
 0x294   : > { %v1263_v5 = vpop.f32.mrf.mxu2 }
 0x297   : > { %4519 = vmatmul.msk.bf16.gmra.mxu1 %vm1458_vm0, %v6119_v9  ;;  %4622 = vmatmul.msk.bf16.gmra.mxu3 %vm1458_vm0, %v6084_v1  ;;  %v1215_v9 = vadd.f32 %v1214_v54, %v5999_v10  ;;  %v1164_v1 = vadd.f32 %v1163_v28, %v5996_v7  ;;  %v1264_v10 = vadd.f32 %v1263_v5, %v6010_v39 }
 0x298   : > { %v6327_v31 = vpop.f32.mrf.mxu3 }
 0x299   : > { %1580 = vmax.xlane.f32.xlu0 %v6327_v31  ;;  %v1294_v41 = vpack.c.bf16 %v1213_v20, %v1164_v1  ;;  %v1296_v2 = vpack.c.bf16 %v1215_v9, %v1166_v27  ;;  %v1297_v4 = vpack.c.bf16 %v1264_v10, %v1264_v10 }
 0x29b   : > { %1326 = vst [vmem:[%s6014_s23 + $0xa8] sm:$0xff] %v1294_v41 }
 0x29c   : > { %1328 = vst [vmem:[%s6014_s23 + $0xb4] sm:$0xff] %v1296_v2 }
 0x29d   : > { %1329 = vst [vmem:[%s6014_s23 + $0xbc] sm:$0xf] %v1297_v4 }
 0x2a0   : > { %v6330_v8 = vpop.f32.mrf.mxu3 }
 0x2a1   : > { %1582 = vmax.xlane.f32.xlu2 %v6330_v8 }
 0x2a7   : > { %4520 = vmatmul.msk.bf16.gmra.mxu1 %vm1458_vm0, %v6203_v36  ;;  %4623 = vmatmul.msk.bf16.gmra.mxu3 %vm1458_vm0, %v6131_v60  ;;  %v7163_v36 = vld [vmem:[#allocation25_spill] sm:$0xff] }
 0x2ac   : > { %v1557_v7 = vpop.xlane.xlu2 %1556 }
 0x2ad   : > { %v1588_v19 = vsub.f32 %v6233_v38, %v1557_v7 }
 0x2af   : > { %v1604_v44 = vmul.f32 1.442695, %v1588_v19 }
 0x2b1   : > { %5121 = vpow2.f32 %v1604_v44 }
 0x2b4   : > { %v1559_v26 = vpop.xlane.xlu0 %1558 }
 0x2b5   : > { %v1589_v3 = vsub.f32 %v6241_v33, %v1559_v26  ;;  %v7165_v33 = vld [vmem:[#allocation28_spill] sm:$0xff] }
 0x2b7   : > { %v1606_v16 = vmul.f32 1.442695, %v1589_v3  ;;  %4521 = vmatmul.msk.bf16.gmra.mxu1 %vm1458_vm0, %v7162_v0  ;;  %4624 = vmatmul.msk.bf16.gmra.mxu3 %vm1458_vm0, %v7163_v36  ;;  %v5122_v60 = vpop.eup %5121 }
 0x2b9   : > { %5123 = vpow2.f32 %v1606_v16 }
 0x2bc   : > { %v1561_v39 = vpop.xlane.xlu2 %1560 }
 0x2bd   : > { %v1590_v6 = vsub.f32 %v6250_v47, %v1561_v39 }
 0x2bf   : > { %v5124_v51 = vpop.eup %5123  ;;  %v1608_v58 = vmul.f32 1.442695, %v1590_v6 }
 0x2c0   : > { %v1668_v62 = vpack.c.bf16 %v5124_v51, %v5122_v60 }
 0x2c1   : > { %5125 = vpow2.f32 %v1608_v58 }
 0x2c2   : > { %1732 = vmatmul.bf16.vlgmr.msra.gmra.mxu0 %v1668_v62 }
 0x2c4   : > { %v1563_v38 = vpop.xlane.xlu0 %1562 }
 0x2c5   : > { %v1591_v42 = vsub.f32 %v6261_v14, %v1563_v38 }
 0x2c7   : > { %v1610_v30 = vmul.f32 1.442695, %v1591_v42  ;;  %4522 = vmatmul.msk.bf16.gmra.mxu1 %vm1458_vm0, %v7164_v32  ;;  %4625 = vmatmul.msk.bf16.gmra.mxu3 %vm1458_vm0, %v7165_v33  ;;  %v6359_v48 = vpop.eup %5125 }
 0x2c9   : > { %5127 = vpow2.f32 %v1610_v30 }
 0x2cc   : > { %v1565_v29 = vpop.xlane.xlu0 %1564 }
 0x2cd   : > { %v1592_v47 = vsub.f32 %v6270_v56, %v1565_v29  ;;  %v6374_v56 = vpop.f32.mrf.mxu3 }
 0x2cf   : > { %v6361_v18 = vpop.eup %5127  ;;  %v1612_v43 = vmul.f32 1.442695, %v1592_v47 }
 0x2d0   : > { %v1669_v45 = vpack.c.bf16 %v6361_v18, %v6359_v48 }
 0x2d1   : > { %5129 = vpow2.f32 %v1612_v43  ;;  %v7172_v43 = vld [vmem:[#allocation26_spill] sm:$0xff] }
 0x2d2   : > { %1737 = vmatmul.bf16.gmra.mxu0 %v1669_v45 }
 0x2d4   : > { %v1567_v34 = vpop.xlane.xlu2 %1566  ;;  %v6366_v14 = vpop.f32.mrf.mxu1 }
 0x2d5   : > { %v1593_v25 = vsub.f32 %v6278_v35, %v1567_v34  ;;  %2095 = vmax.xlane.f32.xlu1 %v6366_v14  ;;  %v6387_v59 = vpop.f32.mrf.mxu3 }
 0x2d7   : > { %v1614_v37 = vmul.f32 1.442695, %v1593_v25  ;;  %4626 = vmatmul.msk.bf16.gmra.mxu3 %vm1458_vm0, %v6227_v11  ;;  %4723 = vmatmul.msk.bf16.vlgmr.msrb.gmra.mxu1 %vm1458_vm0, %v7166_v61  ;;  %v6380_v35 = vpop.eup %5129 }
 0x2d9   : > { %5131 = vpow2.f32 %v1614_v37 }
 0x2dc   : > { %v6376_v53 = vpop.f32.mrf.mxu1  ;;  %v1569_v57 = vpop.xlane.xlu0 %1568 }
 0x2dd   : > { %2097 = vmax.xlane.f32.xlu0 %v6376_v53  ;;  %1584 = vmax.xlane.f32.xlu1 %v6374_v56  ;;  %v1594_v11 = vsub.f32 %v6287_v17, %v1569_v57 }
 0x2df   : > { %v6382_v63 = vpop.eup %5131  ;;  %v1616_v55 = vmul.f32 1.442695, %v1594_v11 }
 0x2e0   : > { %v1670_v21 = vpack.c.bf16 %v6382_v63, %v6380_v35 }
 0x2e1   : > { %5133 = vpow2.f32 %v1616_v55 }
 0x2e2   : > { %1742 = vmatmul.bf16.gmra.mxu0 %v1670_v21 }
 0x2e4   : > { %v1571_v49 = vpop.xlane.xlu2 %1570  ;;  %v6389_v28 = vpop.f32.mrf.mxu1 }
 0x2e5   : > { %v1595_v24 = vsub.f32 %v6292_v12, %v1571_v49  ;;  %2099 = vmax.xlane.f32.xlu2 %v6389_v28  ;;  %1586 = vmax.xlane.f32.xlu0 %v6387_v59 }
 0x2e7   : > { %v1618_v54 = vmul.f32 1.442695, %v1595_v24  ;;  %4724 = vmatmul.msk.bf16.gmra.mxu1 %vm1458_vm0, %v7167_v22  ;;  %v6401_v1 = vpop.eup %5133  ;;  %v7174_v24 = vld [vmem:[#allocation30_spill] sm:$0xff] }
 0x2e9   : > { %5135 = vpow2.f32 %v1618_v54 }
 0x2ea   : > { %v6396_v17 = vpop.f32.mrf.mxu3 }
 0x2ec   : > { %v6398_v20 = vpop.f32.mrf.mxu1  ;;  %v1573_v9 = vpop.xlane.xlu1 %1572 }
 0x2ed   : > { %1638 = vadd.xlane.f32.xlu2 %v5124_v51  ;;  %2101 = vmax.xlane.f32.xlu1 %v6398_v20  ;;  %v1596_v27 = vsub.f32 %v6301_v52, %v1573_v9  ;;  %v7168_v52 = vld [vmem:[#allocation23_spill] sm:$0xff] }
 0x2ee   : > { %1636 = vadd.xlane.f32.xlu0 %v5122_v60 }
 0x2ef   : > { %v6403_v12 = vpop.eup %5135  ;;  %v1620_v13 = vmul.f32 1.442695, %v1596_v27  ;;  %v7175_v27 = vld [vmem:[#allocation31_spill] sm:$0xff] }
 0x2f0   : > { %v1671_v41 = vpack.c.bf16 %v6403_v12, %v6401_v1 }
 0x2f1   : > { %5137 = vpow2.f32 %v1620_v13 }
 0x2f2   : > { %1747 = vmatmul.bf16.gmra.mxu0 %v1671_v41  ;;  %v6408_v2 = vpop.f32.mrf.mxu3 }
 0x2f4   : > { %v1575_v5 = vpop.xlane.xlu0 %1574  ;;  %v6410_v10 = vpop.f32.mrf.mxu1 }
 0x2f5   : > { %v1597_v46 = vsub.f32 %v6306_v40, %v1575_v5  ;;  %2103 = vmax.xlane.f32.xlu2 %v6410_v10  ;;  %2716 = vmax.xlane.f32.xlu1 %v6408_v2 }
 0x2f6   : > { %2714 = vmax.xlane.f32.xlu0 %v6396_v17 }
 0x2f7   : > { %v1622_v4 = vmul.f32 1.442695, %v1597_v46  ;;  %4725 = vmatmul.msk.bf16.gmra.mxu1 %vm1458_vm0, %v7168_v52  ;;  %v6424_v40 = vpop.eup %5137 }
 0x2f9   : > { %5139 = vpow2.f32 %v1622_v4 }
 0x2fa   : > { %v6418_v7 = vpop.f32.mrf.mxu3 }
 0x2fc   : > { %v1577_v19 = vpop.xlane.xlu0 %1576  ;;  %v6420_v44 = vpop.f32.mrf.mxu1 }
 0x2fd   : > { %2105 = vmax.xlane.f32.xlu2 %v6420_v44  ;;  %2718 = vmax.xlane.f32.xlu1 %v6418_v7  ;;  %v1598_v3 = vsub.f32 %v6315_v50, %v1577_v19  ;;  %v7169_v50 = vld [vmem:[#allocation24_spill] sm:$0xff] }
 0x2fe   : > { %1640 = vadd.xlane.f32.xlu0 %v6359_v48 }
 0x2ff   : > { %v6427_v26 = vpop.eup %5139  ;;  %v1624_v36 = vmul.f32 1.442695, %v1598_v3 }
 0x300   : > { %v1672_v16 = vpack.c.bf16 %v6427_v26, %v6424_v40 }
 0x301   : > { %5141 = vpow2.f32 %v1624_v36 }
 0x302   : > { %1752 = vmatmul.bf16.gmra.mxu0 %v1672_v16  ;;  %v6432_v0 = vpop.f32.mrf.mxu3 }
 0x304   : > { %v1579_v39 = vpop.xlane.xlu0 %1578  ;;  %v6434_v60 = vpop.f32.mrf.mxu1 }
 0x305   : > { %v1599_v51 = vsub.f32 %v6320_v23, %v1579_v39  ;;  %1642 = vadd.xlane.f32.xlu1 %v6361_v18  ;;  %2720 = vmax.xlane.f32.xlu2 %v6432_v0 }
 0x306   : > { %2107 = vmax.xlane.f32.xlu0 %v6434_v60 }
 0x307   : > { %v1626_v62 = vmul.f32 1.442695, %v1599_v51  ;;  %4726 = vmatmul.msk.bf16.gmra.mxu1 %vm1458_vm0, %v7169_v50  ;;  %v6447_v23 = vpop.eup %5141 }
 0x308   : > { %7170 = vst [vmem:[#allocation27_spill] sm:$0xff] %v6447_v23 }
 0x309   : > { %5143 = vpow2.f32 %v1626_v62 }
 0x30a   : > { %v6442_v6 = vpop.f32.mrf.mxu3 }
 0x30c   : > { %v6444_v58 = vpop.f32.mrf.mxu1  ;;  %v1581_v38 = vpop.xlane.xlu0 %1580 }
 0x30d   : > { %2722 = vmax.xlane.f32.xlu1 %v6442_v6  ;;  %v1600_v30 = vsub.f32 %v6327_v31, %v1581_v38 }
 0x30f   : > { %v6449_v42 = vpop.eup %5143  ;;  %v1628_v29 = vmul.f32 1.442695, %v1600_v30 }
 0x310   : > { %7171 = vst [vmem:[#allocation25_spill] sm:$0xff] %v6449_v42  ;;  %v1673_v32 = vpack.c.bf16 %v6449_v42, %v6447_v23 }
 0x311   : > { %5145 = vpow2.f32 %v1628_v29 }
 0x312   : > { %1757 = vmatmul.bf16.gmra.mxu0 %v1673_v32  ;;  %v6454_v33 = vpop.f32.mrf.mxu3 }
 0x313   : > { %2724 = vmax.xlane.f32.xlu0 %v6454_v33 }
 0x314   : > { %v1583_v48 = vpop.xlane.xlu2 %1582  ;;  %v6457_v18 = vpop.f32.mrf.mxu1 }
 0x315   : > { %v1601_v47 = vsub.f32 %v6330_v8, %v1583_v48  ;;  %2109 = vmax.xlane.f32.xlu1 %v6444_v58 }
 0x317   : > { %v1630_v45 = vmul.f32 1.442695, %v1601_v47  ;;  %4727 = vmatmul.msk.bf16.gmra.mxu1 %vm1458_vm0, %v7172_v43  ;;  %v6470_v25 = vpop.eup %5145 }
 0x318   : > { %7173 = vst [vmem:[#allocation29_spill] sm:$0xff] %v6470_v25 }
 0x319   : > { %5147 = vpow2.f32 %v1630_v45 }
 0x31a   : > { %v6463_v31 = vpop.f32.mrf.mxu3 }
 0x31b   : > { %2726 = vmax.xlane.f32.xlu0 %v6463_v31 }
 0x31c   : > { %v6466_v34 = vpop.f32.mrf.mxu1 }
 0x31d   : > { %2113 = vmax.xlane.f32.xlu2 %v6466_v34  ;;  %2111 = vmax.xlane.f32.xlu1 %v6457_v18 }
 0x31f   : > { %v6472_v8 = vpop.eup %5147 }
 0x320   : > { %v1674_v37 = vpack.c.bf16 %v6472_v8, %v6470_v25 }
 0x322   : > { %1762 = vmatmul.bf16.gmra.mxu0 %v1674_v37  ;;  %v6476_v61 = vpop.f32.mrf.mxu3 }
 0x324   : > { %v6478_v57 = vpop.f32.mrf.mxu1 }
 0x325   : > { %2728 = vmax.xlane.f32.xlu2 %v6476_v61 }
 0x327   : > { %4728 = vmatmul.msk.bf16.gmra.mxu1 %vm1458_vm0, %v6207_v15 }
 0x32a   : > { %v6483_v11 = vpop.f32.mrf.mxu3 }
 0x32c   : > { %v6485_v21 = vpop.f32.mrf.mxu1 }
 0x32d   : > { %2117 = vmax.xlane.f32.xlu0 %v6485_v21  ;;  %2115 = vmax.xlane.f32.xlu2 %v6478_v57 }
 0x332   : > { %v6489_v55 = vpop.f32.mrf.mxu3 }
 0x333   : > { %2732 = vmax.xlane.f32.xlu1 %v6489_v55 }
 0x334   : > { %v6492_v49 = vpop.f32.mrf.mxu1 }
 0x335   : > { %2119 = vmax.xlane.f32.xlu0 %v6492_v49  ;;  %2730 = vmax.xlane.f32.xlu2 %v6483_v11 }
 0x337   : > { %4729 = vmatmul.msk.bf16.gmra.mxu1 %vm1458_vm0, %v7174_v24 }
 0x33a   : > { %v6498_v15 = vpop.f32.mrf.mxu3 }
 0x33b   : > { %2734 = vmax.xlane.f32.xlu1 %v6498_v15 }
 0x33c   : > { %v6501_v54 = vpop.f32.mrf.mxu1 }
 0x33d   : > { %1646 = vadd.xlane.f32.xlu2 %v6382_v63 }
 0x33f   : > { %v1733_v51 = vpop.f32.mrf.mxu0 }
 0x342   : > { %v6504_v22 = vpop.f32.mrf.mxu3 }
 0x343   : > { %2121 = vmax.xlane.f32.xlu1 %v6501_v54  ;;  %2736 = vmax.xlane.f32.xlu0 %v6504_v22 }
 0x344   : > { %v6508_v9 = vpop.f32.mrf.mxu1 }
 0x347   : > { %4730 = vmatmul.msk.bf16.gmra.mxu1 %vm1458_vm0, %v7175_v27 }
 0x348   : > { %v2096_v41 = vpop.xlane.xlu1 %2095 }
 0x349   : > { %v2127_v63 = vsub.f32 %v6366_v14, %v2096_v41 }
 0x34a   : > { %v6512_v13 = vpop.f32.mrf.mxu3 }
 0x34b   : > { %1644 = vadd.xlane.f32.xlu1 %v6380_v35  ;;  %2123 = vmax.xlane.f32.xlu0 %v6508_v9  ;;  %v2143_v46 = vmul.f32 1.442695, %v2127_v63 }
 0x34c   : > { %v6517_v5 = vpop.f32.mrf.mxu1 }
 0x34d   : > { %2125 = vmax.xlane.f32.xlu2 %v6517_v5  ;;  %5149 = vpow2.f32 %v2143_v46 }
 0x350   : > { %v2098_v4 = vpop.xlane.xlu0 %2097  ;;  %v1585_v19 = vpop.xlane.xlu1 %1584 }
 0x351   : > { %v2128_v52 = vsub.f32 %v6376_v53, %v2098_v4  ;;  %v1602_v14 = vsub.f32 %v6374_v56, %v1585_v19 }
 0x352   : > { %v6521_v3 = vpop.f32.mrf.mxu3 }
 0x353   : > { %v2145_v16 = vmul.f32 1.442695, %v2128_v52  ;;  %2738 = vmax.xlane.f32.xlu0 %v6512_v13  ;;  %v1632_v62 = vmul.f32 1.442695, %v1602_v14  ;;  %v5150_v50 = vpop.eup %5149 }
 0x354   : > { %v6524_v35 = vpop.f32.mrf.mxu1 }
 0x355   : > { %5151 = vpow2.f32 %v2145_v16  ;;  %2740 = vmax.xlane.f32.xlu2 %v6521_v3 }
 0x356   : > { %5153 = vpow2.f32 %v1632_v62 }
 0x358   : > { %v2100_v36 = vpop.xlane.xlu2 %2099  ;;  %v1587_v39 = vpop.xlane.xlu0 %1586 }
 0x359   : > { %v1603_v53 = vsub.f32 %v6387_v59, %v1587_v39  ;;  %v2129_v48 = vsub.f32 %v6389_v28, %v2100_v36  ;;  %v1735_v28 = vpop.f32.mrf.mxu0 }
 0x35a   : > { %v6529_v38 = vpop.f32.mrf.mxu3 }
 0x35b   : > { %v5152_v30 = vpop.eup %5151  ;;  %v1634_v32 = vmul.f32 1.442695, %v1603_v53  ;;  %2175 = vadd.xlane.f32.xlu0 %v5150_v50  ;;  %v2147_v56 = vmul.f32 1.442695, %v2129_v48 }
 0x35c   : > { %v2207_v29 = vpack.c.bf16 %v5152_v30, %v5150_v50  ;;  %v6532_v47 = vpop.f32.mrf.mxu1  ;;  %v6538_v27 = vpop.eup %5153 }
 0x35d   : > { %2742 = vmax.xlane.f32.xlu2 %v6529_v38  ;;  %5155 = vpow2.f32 %v1634_v32  ;;  %7176 = vst [vmem:[#allocation28_spill] sm:$0xff] %v6538_v27 }
 0x35e   : > { %2287 = vmatmul.bf16.vlgmr.msra.gmra.mxu2 %v2207_v29 }
 0x360   : > { %v1639_v45 = vpop.xlane.xlu2 %1638  ;;  %v2102_v43 = vpop.xlane.xlu1 %2101 }
 0x361   : > { %5157 = vrcp.f32 %v1639_v45  ;;  %v2130_v59 = vsub.f32 %v6398_v20, %v2102_v43  ;;  %v1637_v37 = vpop.xlane.xlu0 %1636 }
 0x362   : > { %5159 = vrcp.f32 %v1637_v37  ;;  %v6536_v24 = vpop.f32.mrf.mxu3 }
 0x363   : > { %v2149_v41 = vmul.f32 1.442695, %v2130_v59  ;;  %3333 = vmax.xlane.f32.xlu0 %v6524_v35  ;;  %2744 = vmax.xlane.f32.xlu1 %v6536_v24  ;;  %v6542_v63 = vpop.eup %5155  ;;  %5161 = vpow2.f32 %v2147_v56 }
 0x364   : > { %v6544_v46 = vpop.f32.mrf.mxu1  ;;  %v1675_v20 = vpack.c.bf16 %v6542_v63, %v6538_v27 }
 0x365   : > { %5163 = vpow2.f32 %v2149_v41  ;;  %2177 = vadd.xlane.f32.xlu2 %v5152_v30 }
 0x366   : > { %1767 = vmatmul.bf16.gmra.mxu0 %v1675_v20 }
 0x367   : > { %v5158_v4 = vpop.eup %5157 }
 0x368   : > { %v5160_v52 = vpop.eup %5159  ;;  %v1790_v19 = vmul.f32 %v5158_v4, %v1735_v28  ;;  %v2104_v16 = vpop.xlane.xlu2 %2103 }
 0x369   : > { %v2717_v14 = vpop.xlane.xlu1 %2716  ;;  %v1789_v36 = vmul.f32 %v5160_v52, %v1733_v51  ;;  %v2715_v39 = vpop.xlane.xlu0 %2714  ;;  %v2131_v56 = vsub.f32 %v6410_v10, %v2104_v16 }
 0x36a   : > { %v2747_v62 = vsub.f32 %v6408_v2, %v2717_v14  ;;  %v5162_v53 = vpop.eup %5161  ;;  %v1806_v50 = vpack.c.bf16 %v1790_v19, %v1790_v19  ;;  %v2746_v32 = vsub.f32 %v6396_v17, %v2715_v39  ;;  %v1738_v51 = vpop.f32.mrf.mxu0 }
 0x36b   : > { %v5164_v29 = vpop.eup %5163  ;;  %v1805_v30 = vpack.c.bf16 %v1789_v36, %v1789_v36  ;;  %2179 = vadd.xlane.f32.xlu0 %v5162_v53  ;;  %v2151_v17 = vmul.f32 1.442695, %v2131_v56 }
 0x36c   : > { %v2764_v48 = vmul.f32 1.442695, %v2747_v62  ;;  %v2762_v45 = vmul.f32 1.442695, %v2746_v32  ;;  %v6551_v43 = vpop.f32.mrf.mxu1  ;;  %v2208_v59 = vpack.c.bf16 %v5164_v29, %v5162_v53  ;;  %1823 = vst.msk [vmem:[#allocation3 + $0x4] sm:$0xf] %vm1821_vm1, %v1806_v50 }
 0x36d   : > { %3335 = vmax.xlane.f32.xlu2 %v6532_v47  ;;  %1822 = vst.msk [vmem:[#allocation3] sm:$0xf] %vm1821_vm1, %v1805_v30 }
 0x36e   : > { %5165 = vpow2.f32 %v2762_v45  ;;  %2292 = vmatmul.bf16.gmra.mxu2 %v2208_v59 }
 0x36f   : > { %5167 = vpow2.f32 %v2764_v48 }
 0x370   : > { %v2106_v2 = vpop.xlane.xlu2 %2105 }
 0x371   : > { %v2719_v37 = vpop.xlane.xlu1 %2718  ;;  %v2132_v28 = vsub.f32 %v6420_v44, %v2106_v2  ;;  %v1641_v10 = vpop.xlane.xlu0 %1640 }
 0x372   : > { %v2748_v41 = vsub.f32 %v6418_v7, %v2719_v37  ;;  %5169 = vrcp.f32 %v1641_v10  ;;  %v1740_v44 = vpop.f32.mrf.mxu0 }
 0x373   : > { %v2153_v20 = vmul.f32 1.442695, %v2132_v28  ;;  %3339 = vmax.xlane.f32.xlu0 %v6551_v43  ;;  %5171 = vpow2.f32 %v2151_v17 }
 0x374   : > { %v2766_v4 = vmul.f32 1.442695, %v2748_v41  ;;  %v5166_v52 = vpop.eup %5165  ;;  %v6559_v19 = vpop.f32.mrf.mxu1 }
 0x375   : > { %v5168_v16 = vpop.eup %5167  ;;  %5173 = vpow2.f32 %v2153_v20  ;;  %2794 = vadd.xlane.f32.xlu1 %v5166_v52  ;;  %3337 = vmax.xlane.f32.xlu2 %v6544_v46 }
 0x376   : > { %v2826_v14 = vpack.c.bf16 %v5168_v16, %v5166_v52  ;;  %5175 = vpow2.f32 %v2766_v4 }
 0x378   : > { %v5170_v36 = vpop.eup %5169  ;;  %2906 = vmatmul.bf16.vlgmr.msrb.gmra.mxu0 %v2826_v14  ;;  %v2721_v39 = vpop.xlane.xlu2 %2720 }
 0x379   : > { %v1643_v7 = vpop.xlane.xlu1 %1642  ;;  %v1791_v62 = vmul.f32 %v5170_v36, %v1738_v51  ;;  %v2108_v53 = vpop.xlane.xlu0 %2107  ;;  %v2749_v50 = vsub.f32 %v6432_v0, %v2721_v39 }
 0x37a   : > { %5177 = vrcp.f32 %v1643_v7  ;;  %v5172_v32 = vpop.eup %5171  ;;  %v2133_v30 = vsub.f32 %v6434_v60, %v2108_v53  ;;  %v6567_v60 = vpop.f32.mrf.mxu0 }
 0x37b   : > { %v5174_v48 = vpop.eup %5173  ;;  %v1807_v56 = vpack.c.bf16 %v1791_v62, %v1791_v62  ;;  %v2768_v45 = vmul.f32 1.442695, %v2749_v50  ;;  %2796 = vadd.xlane.f32.xlu0 %v5168_v16 }
 0x37c   : > { %v5176_v59 = vpop.eup %5175  ;;  %v2155_v17 = vmul.f32 1.442695, %v2133_v30  ;;  %v6564_v2 = vpop.f32.mrf.mxu1  ;;  %v2209_v37 = vpack.c.bf16 %v5174_v48, %v5172_v32 }
 0x37d   : > { %5179 = vpow2.f32 %v2768_v45  ;;  %2798 = vadd.xlane.f32.xlu1 %v5176_v59  ;;  %2181 = vadd.xlane.f32.xlu2 %v5164_v29  ;;  %1824 = vst.msk [vmem:[#allocation3 + $0x8] sm:$0xf] %vm1821_vm1, %v1807_v56 }
 0x37e   : > { %5181 = vpow2.f32 %v2155_v17  ;;  %2297 = vmatmul.bf16.gmra.mxu2 %v2209_v37 }
 0x380   : > { %v5178_v0 = vpop.eup %5177 }
 0x381   : > { %v1792_v51 = vmul.f32 %v5178_v0, %v1740_v44  ;;  %v2723_v28 = vpop.xlane.xlu1 %2722 }
 0x382   : > { %v2750_v10 = vsub.f32 %v6442_v6, %v2723_v28  ;;  %v6575_v62 = vpop.f32.mrf.mxu0 }
 0x383   : > { %v1808_v41 = vpack.c.bf16 %v1792_v51, %v1792_v51  ;;  %v5180_v20 = vpop.eup %5179  ;;  %2183 = vadd.xlane.f32.xlu0 %v5172_v32 }
 0x384   : > { %v2770_v4 = vmul.f32 1.442695, %v2750_v10  ;;  %v5182_v52 = vpop.eup %5181  ;;  %v6570_v16 = vpop.f32.mrf.mxu1  ;;  %v2827_v14 = vpack.c.bf16 %v5180_v20, %v5176_v59 }
 0x385   : > { %1825 = vst.msk [vmem:[#allocation3 + $0xc] sm:$0xf] %vm1821_vm1, %v1808_v41  ;;  %2187 = vadd.xlane.f32.xlu1 %v5182_v52  ;;  %2185 = vadd.xlane.f32.xlu2 %v5174_v48 }
 0x386   : > { %5183 = vpow2.f32 %v2770_v4  ;;  %v2725_v29 = vpop.xlane.xlu0 %2724 }
 0x387   : > { %v2751_v44 = vsub.f32 %v6454_v33, %v2725_v29 }
 0x388   : > { %2911 = vmatmul.bf16.gmra.mxu0 %v2827_v14 }
 0x389   : > { %v2110_v36 = vpop.xlane.xlu1 %2109  ;;  %v2772_v7 = vmul.f32 1.442695, %v2751_v44 }
 0x38a   : > { %v2134_v6 = vsub.f32 %v6444_v58, %v2110_v36  ;;  %v6586_v51 = vpop.f32.mrf.mxu0 }
 0x38b   : > { %3341 = vmax.xlane.f32.xlu0 %v6559_v19  ;;  %5185 = vpow2.f32 %v2772_v7 }
 0x38c   : > { %v5184_v39 = vpop.eup %5183  ;;  %v2157_v53 = vmul.f32 1.442695, %v2134_v6  ;;  %v6578_v50 = vpop.f32.mrf.mxu1 }
 0x38d   : > { %2802 = vadd.xlane.f32.xlu1 %v5184_v39  ;;  %3343 = vmax.xlane.f32.xlu2 %v6564_v2 }
 0x38e   : > { %5187 = vpow2.f32 %v2157_v53  ;;  %v2727_v30 = vpop.xlane.xlu0 %2726 }
 0x38f   : > { %v2752_v17 = vsub.f32 %v6463_v31, %v2727_v30 }
 0x390   : > { %v2114_v32 = vpop.xlane.xlu2 %2113 }
 0x391   : > { %v2112_v33 = vpop.xlane.xlu1 %2111  ;;  %v5186_v56 = vpop.eup %5185  ;;  %v2136_v45 = vsub.f32 %v6466_v34, %v2114_v32  ;;  %v2774_v10 = vmul.f32 1.442695, %v2752_v17 }
 0x392   : > { %v2135_v48 = vsub.f32 %v6457_v18, %v2112_v33  ;;  %v2828_v18 = vpack.c.bf16 %v5186_v56, %v5184_v39 }
 0x393   : > { %2800 = vadd.xlane.f32.xlu0 %v5180_v20  ;;  %v2161_v28 = vmul.f32 1.442695, %v2136_v45 }
 0x394   : > { %v5188_v58 = vpop.eup %5187  ;;  %v2159_v59 = vmul.f32 1.442695, %v2135_v48  ;;  %v6584_v37 = vpop.f32.mrf.mxu1 }
 0x395   : > { %v2210_v0 = vpack.c.bf16 %v5188_v58, %v5182_v52  ;;  %3347 = vmax.xlane.f32.xlu1 %v6578_v50  ;;  %3345 = vmax.xlane.f32.xlu2 %v6570_v16  ;;  %v6594_v52 = vpop.f32.mrf.mxu0 }
 0x396   : > { %5189 = vpow2.f32 %v2159_v59 }
 0x397   : > { %2302 = vmatmul.bf16.gmra.mxu2 %v2210_v0  ;;  %5191 = vpow2.f32 %v2161_v28 }
 0x398   : > { %2916 = vmatmul.bf16.gmra.mxu0 %v2828_v18  ;;  %v2729_v34 = vpop.xlane.xlu2 %2728  ;;  %5193 = vpow2.f32 %v2774_v10 }
 0x399   : > { %v2753_v41 = vsub.f32 %v6476_v61, %v2729_v34 }
 0x39b   : > { %v2776_v31 = vmul.f32 1.442695, %v2753_v41  ;;  %2189 = vadd.xlane.f32.xlu0 %v5188_v58 }
 0x39c   : > { %v5190_v20 = vpop.eup %5189  ;;  %v6591_v4 = vpop.f32.mrf.mxu1 }
 0x39d   : > { %5195 = vpow2.f32 %v2776_v31  ;;  %3349 = vmax.xlane.f32.xlu1 %v6584_v37  ;;  %2191 = vadd.xlane.f32.xlu2 %v5190_v20  ;;  %v5192_v44 = vpop.eup %5191  ;;  %v6601_v45 = vpop.f32.mrf.mxu0 }
 0x39e   : > { %v5194_v7 = vpop.eup %5193  ;;  %v2211_v32 = vpack.c.bf16 %v5192_v44, %v5190_v20  ;;  %7177 = vst [vmem:[#allocation21_spill] sm:$0xff] %v6601_v45 }
 0x3a0   : > { %v2118_v14 = vpop.xlane.xlu0 %2117  ;;  %v2116_v29 = vpop.xlane.xlu2 %2115 }
 0x3a1   : > { %v2138_v36 = vsub.f32 %v6485_v21, %v2118_v14  ;;  %v2137_v39 = vsub.f32 %v6478_v57, %v2116_v29 }
 0x3a3   : > { %v5196_v61 = vpop.eup %5195  ;;  %v2165_v6 = vmul.f32 1.442695, %v2138_v36  ;;  %2804 = vadd.xlane.f32.xlu0 %v5186_v56  ;;  %v2163_v48 = vmul.f32 1.442695, %v2137_v39 }
 0x3a4   : > { %v6598_v53 = vpop.f32.mrf.mxu1  ;;  %v2829_v33 = vpack.c.bf16 %v5196_v61, %v5194_v7 }
 0x3a5   : > { %5197 = vpow2.f32 %v2165_v6  ;;  %2808 = vadd.xlane.f32.xlu1 %v5196_v61  ;;  %2806 = vadd.xlane.f32.xlu2 %v5194_v7  ;;  %v6607_v20 = vpop.f32.mrf.mxu0 }
 0x3a6   : > { %v2733_v30 = vpop.xlane.xlu1 %2732  ;;  %5199 = vpow2.f32 %v2163_v48 }
 0x3a7   : > { %2307 = vmatmul.bf16.gmra.mxu2 %v2211_v32  ;;  %v2755_v58 = vsub.f32 %v6489_v55, %v2733_v30 }
 0x3a8   : > { %2921 = vmatmul.bf16.gmra.mxu0 %v2829_v33  ;;  %v2731_v21 = vpop.xlane.xlu2 %2730  ;;  %v2120_v18 = vpop.xlane.xlu0 %2119 }
 0x3a9   : > { %v2780_v59 = vmul.f32 1.442695, %v2755_v58  ;;  %v2754_v57 = vsub.f32 %v6483_v11, %v2731_v21  ;;  %v2139_v14 = vsub.f32 %v6492_v49, %v2120_v18 }
 0x3ab   : > { %v5198_v56 = vpop.eup %5197  ;;  %v2778_v17 = vmul.f32 1.442695, %v2754_v57  ;;  %2193 = vadd.xlane.f32.xlu0 %v5192_v44  ;;  %5201 = vpow2.f32 %v2780_v59  ;;  %v2167_v32 = vmul.f32 1.442695, %v2139_v14 }
 0x3ac   : > { %v6604_v0 = vpop.f32.mrf.mxu1  ;;  %v5200_v34 = vpop.eup %5199 }
 0x3ad   : > { %2197 = vadd.xlane.f32.xlu2 %v5198_v56  ;;  %5203 = vpow2.f32 %v2778_v17  ;;  %v2212_v44 = vpack.c.bf16 %v5198_v56, %v5200_v34  ;;  %v6621_v59 = vpop.f32.mrf.mxu0 }
 0x3ae   : > { %v2735_v28 = vpop.xlane.xlu1 %2734  ;;  %7178 = vst [vmem:[#allocation22_spill] sm:$0xff] %v6621_v59 }
 0x3af   : > { %v2756_v55 = vsub.f32 %v6498_v15, %v2735_v28 }
 0x3b0   : > { %v1647_v10 = vpop.xlane.xlu2 %1646 }
 0x3b1   : > { %5205 = vrcp.f32 %v1647_v10  ;;  %v2782_v41 = vmul.f32 1.442695, %v2756_v55  ;;  %v5202_v31 = vpop.eup %5201 }
 0x3b3   : > { %3351 = vmax.xlane.f32.xlu0 %v6591_v4  ;;  %v5204_v11 = vpop.eup %5203  ;;  %5207 = vpow2.f32 %v2782_v41 }
 0x3b4   : > { %v6611_v29 = vpop.f32.mrf.mxu1  ;;  %2810 = vadd.xlane.f32.xlu1 %v5204_v11  ;;  %v2830_v36 = vpack.c.bf16 %v5202_v31, %v5204_v11 }
 0x3b5   : > { %3355 = vmax.xlane.f32.xlu2 %v6604_v0 }
 0x3b6   : > { %v2122_v15 = vpop.xlane.xlu1 %2121  ;;  %v2737_v7 = vpop.xlane.xlu0 %2736 }
 0x3b7   : > { %2312 = vmatmul.bf16.gmra.mxu2 %v2212_v44  ;;  %v5206_v61 = vpop.eup %5205  ;;  %v2140_v6 = vsub.f32 %v6501_v54, %v2122_v15  ;;  %v2757_v39 = vsub.f32 %v6504_v22, %v2737_v7 }
 0x3b8   : > { %v1794_v33 = vmul.f32 %v5206_v61, %v6575_v62  ;;  %2926 = vmatmul.bf16.gmra.mxu0 %v2830_v36 }
 0x3b9   : > { %v2169_v49 = vmul.f32 1.442695, %v2140_v6  ;;  %v2784_v30 = vmul.f32 1.442695, %v2757_v39  ;;  %v5208_v58 = vpop.eup %5207 }
 0x3ba   : > { %v1810_v48 = vpack.c.bf16 %v1794_v33, %v1794_v33 }
 0x3bb   : > { %5209 = vpow2.f32 %v2169_v49  ;;  %3353 = vmax.xlane.f32.xlu0 %v6598_v53 }
 0x3bc   : > { %5211 = vpow2.f32 %v2167_v32  ;;  %v6618_v21 = vpop.f32.mrf.mxu1  ;;  %1827 = vst.msk [vmem:[#allocation3 + $0x14] sm:$0xf] %vm1821_vm1, %v1810_v48  ;;  %2814 = vadd.xlane.f32.xlu1 %v5208_v58 }
 0x3bd   : > { %5213 = vpow2.f32 %v2784_v30  ;;  %2812 = vadd.xlane.f32.xlu2 %v5202_v31 }
 0x3be   : > { %v1645_v54 = vpop.xlane.xlu1 %1644  ;;  %v2124_v22 = vpop.xlane.xlu0 %2123 }
 0x3bf   : > { %5215 = vrcp.f32 %v1645_v54  ;;  %v2141_v17 = vsub.f32 %v6508_v9, %v2124_v22 }
 0x3c0   : > { %v2126_v62 = vpop.xlane.xlu2 %2125 }
 0x3c1   : > { %v6623_v57 = vpop.eup %5209  ;;  %v2142_v28 = vsub.f32 %v6517_v5, %v2126_v62  ;;  %v2171_v11 = vmul.f32 1.442695, %v2141_v17 }
 0x3c2   : > { %v6625_v56 = vpop.eup %5211 }
 0x3c3   : > { %v6628_v18 = vpop.eup %5213  ;;  %2195 = vadd.xlane.f32.xlu0 %v5200_v34  ;;  %v2213_v10 = vpack.c.bf16 %v6623_v57, %v6625_v56  ;;  %v2173_v44 = vmul.f32 1.442695, %v2142_v28  ;;  %v6640_v34 = vpop.f32.mrf.mxu0  ;;  %5217 = vpow2.f32 %v2171_v11 }
 0x3c4   : > { %v6631_v55 = vpop.f32.mrf.mxu1  ;;  %3359 = vmax.xlane.f32.xlu1 %v6618_v21  ;;  %v2831_v9 = vpack.c.bf16 %v6628_v18, %v5208_v58  ;;  %7179 = vst [vmem:[#allocation23_spill] sm:$0xff] %v6640_v34 }
 0x3c5   : > { %v5216_v41 = vpop.eup %5215  ;;  %3357 = vmax.xlane.f32.xlu2 %v6611_v29  ;;  %5219 = vpow2.f32 %v2173_v44 }
 0x3c6   : > { %v1793_v31 = vmul.f32 %v5216_v41, %v6567_v60  ;;  %v2739_v14 = vpop.xlane.xlu0 %2738 }
 0x3c7   : > { %2317 = vmatmul.bf16.gmra.mxu2 %v2213_v10  ;;  %v2758_v5 = vsub.f32 %v6512_v13, %v2739_v14 }
 0x3c8   : > { %v1809_v36 = vpack.c.bf16 %v1793_v31, %v1793_v31  ;;  %2931 = vmatmul.bf16.gmra.mxu0 %v2831_v9  ;;  %v2741_v15 = vpop.xlane.xlu2 %2740 }
 0x3c9   : > { %v2786_v7 = vmul.f32 1.442695, %v2758_v5  ;;  %v2759_v61 = vsub.f32 %v6521_v3, %v2741_v15  ;;  %v6650_v39 = vpop.eup %5217 }
 0x3ca   : > { %1826 = vst.msk [vmem:[#allocation3 + $0x10] sm:$0xf] %vm1821_vm1, %v1809_v36 }
 0x3cb   : > { %v2788_v60 = vmul.f32 1.442695, %v2759_v61  ;;  %5221 = vpow2.f32 %v2786_v7  ;;  %v6652_v33 = vpop.eup %5219  ;;  %v6656_v49 = vpop.f32.mrf.mxu0 }
 0x3cc   : > { %v6644_v6 = vpop.f32.mrf.mxu1  ;;  %3361 = vmax.xlane.f32.xlu1 %v6631_v55  ;;  %7180 = vst [vmem:[#allocation24_spill] sm:$0xff] %v6656_v49  ;;  %v2214_v48 = vpack.c.bf16 %v6652_v33, %v6650_v39 }
 0x3cd   : > { %5223 = vpow2.f32 %v2788_v60  ;;  %3363 = vmax.xlane.f32.xlu0 %v6644_v6 }
 0x3ce   : > { %v6648_v13 = vpop.xlane.xlu0 %2175 }
 0x3d0   : > { %v2743_v32 = vpop.xlane.xlu2 %2742 }
 0x3d1   : > { %v6654_v3 = vpop.eup %5221  ;;  %v2760_v62 = vsub.f32 %v6529_v38, %v2743_v32 }
 0x3d3   : > { %v6658_v30 = vpop.eup %5223  ;;  %v2790_v11 = vmul.f32 1.442695, %v2760_v62  ;;  %v6667_v9 = vpop.f32.mrf.mxu0 }
 0x3d4   : > { %v2832_v58 = vpack.c.bf16 %v6658_v30, %v6654_v3  ;;  %7181 = vst [vmem:[#allocation26_spill] sm:$0xff] %v6667_v9 }
 0x3d6   : > { %v3334_v54 = vpop.xlane.xlu0 %3333  ;;  %v2745_v22 = vpop.xlane.xlu1 %2744 }
 0x3d7   : > { %2322 = vmatmul.bf16.gmra.mxu2 %v2214_v48  ;;  %v3365_v17 = vsub.f32 %v6524_v35, %v3334_v54  ;;  %v2761_v28 = vsub.f32 %v6536_v24, %v2745_v22 }
 0x3d8   : > { %2936 = vmatmul.bf16.gmra.mxu0 %v2832_v58  ;;  %v2178_v10 = vpop.xlane.xlu2 %2177 }
 0x3d9   : > { %v3381_v41 = vmul.f32 1.442695, %v3365_v17  ;;  %v2792_v31 = vmul.f32 1.442695, %v2761_v28 }
 0x3db   : > { %5225 = vpow2.f32 %v3381_v41 }
 0x3dc   : > { %5227 = vpow2.f32 %v2792_v31 }
 0x3dd   : > { %5229 = vpow2.f32 %v2790_v11 }
 0x3de   : > { %v2180_v14 = vpop.xlane.xlu0 %2179  ;;  %5231 = vrcp.f32 %v2178_v10 }
 0x3e0   : > { %v3336_v44 = vpop.xlane.xlu2 %3335 }
 0x3e1   : > { %v5226_v5 = vpop.eup %5225  ;;  %v3366_v36 = vsub.f32 %v6532_v47, %v3336_v44  ;;  %v2288_v38 = vpop.f32.mrf.mxu2 }
 0x3e2   : > { %3413 = vadd.xlane.f32.xlu2 %v5226_v5  ;;  %v6670_v35 = vpop.eup %5227 }
 0x3e3   : > { %v3383_v24 = vmul.f32 1.442695, %v3366_v36  ;;  %v6672_v15 = vpop.f32.mrf.mxu0  ;;  %v6674_v7 = vpop.eup %5229 }
 0x3e4   : > { %7182 = vst [vmem:[#allocation30_spill] sm:$0xff] %v6672_v15  ;;  %v2833_v60 = vpack.c.bf16 %v6670_v35, %v6674_v7  ;;  %v5232_v58 = vpop.eup %5231 }
 0x3e5   : > { %5233 = vpow2.f32 %v3383_v24 }
 0x3e6   : > { %v3340_v61 = vpop.xlane.xlu0 %3339  ;;  %5235 = vrcp.f32 %v2180_v14 }
 0x3e7   : > { %v3368_v31 = vsub.f32 %v6551_v43, %v3340_v61 }
 0x3e8   : > { %2941 = vmatmul.bf16.gmra.mxu0 %v2833_v60  ;;  %v2795_v32 = vpop.xlane.xlu1 %2794  ;;  %v3338_v48 = vpop.xlane.xlu2 %3337 }
 0x3e9   : > { %v3367_v47 = vsub.f32 %v6544_v46, %v3338_v48  ;;  %v2290_v54 = vpop.f32.mrf.mxu2  ;;  %v3387_v24 = vmul.f32 1.442695, %v3368_v31 }
 0x3ea   : > { %v2345_v22 = vmul.f32 %v5232_v58, %v2290_v54 }
 0x3eb   : > { %v5234_v62 = vpop.eup %5233  ;;  %v3385_v17 = vmul.f32 1.442695, %v3367_v47  ;;  %v6679_v41 = vpop.f32.mrf.mxu0 }
 0x3ec   : > { %v3445_v28 = vpack.c.bf16 %v5234_v62, %v5226_v5  ;;  %v2361_v10 = vpack.c.bf16 %v2345_v22, %v2345_v22  ;;  %7183 = vst [vmem:[#allocation31_spill] sm:$0xff] %v6679_v41  ;;  %3415 = vadd.xlane.f32.xlu1 %v5234_v62  ;;  %v5236_v36 = vpop.eup %5235 }
 0x3ed   : > { %5237 = vpow2.f32 %v3385_v17 }
 0x3ee   : > { %v2797_v11 = vpop.xlane.xlu0 %2796  ;;  %2394 = vrot.lane.b32.xlu0 %v2361_v10, %s5647_s11  ;;  %3525 = vmatmul.bf16.vlgmr.msrb.gmra.mxu2 %v3445_v28  ;;  %5239 = vpow2.f32 %v3387_v24 }
 0x3ef   : > { %5241 = vrcp.f32 %v2797_v11 }
 0x3f0   : > { %v6683_v44 = vpop.xlane.xlu1 %2798  ;;  %v2182_v46 = vpop.xlane.xlu2 %2181  ;;  %5243 = vrcp.f32 %v6648_v13 }
 0x3f1   : > { %v2293_v60 = vpop.f32.mrf.mxu2 }
 0x3f2   : > { %v6685_v14 = vmul.f32 %v5236_v36, %v2293_v60 }
 0x3f3   : > { %v5238_v5 = vpop.eup %5237 }
 0x3f4   : > { %3417 = vadd.xlane.f32.xlu2 %v5238_v5  ;;  %v6688_v54 = vpop.eup %5239 }
 0x3f5   : > { %v2907_v48 = vpop.f32.mrf.mxu0  ;;  %v3446_v22 = vpack.c.bf16 %v6688_v54, %v5238_v5  ;;  %v5242_v62 = vpop.eup %5241 }
 0x3f6   : > { %v2184_v58 = vpop.xlane.xlu0 %2183  ;;  %v5244_v28 = vpop.eup %5243 }
 0x3f7   : > { %5245 = vrcp.f32 %v2184_v58  ;;  %v2344_v36 = vmul.f32 %v5244_v28, %v2288_v38 }
 0x3f8   : > { %v2188_v43 = vpop.xlane.xlu1 %2187  ;;  %v2186_v61 = vpop.xlane.xlu2 %2185  ;;  %5247 = vrcp.f32 %v2182_v46 }
 0x3f9   : > { %v2295_v47 = vpop.f32.mrf.mxu2  ;;  %5249 = vrcp.f32 %v2795_v32 }
 0x3fa   : > { %5251 = vrcp.f32 %v2186_v61 }
 0x3fd   : > { %v2909_v17 = vpop.f32.mrf.mxu0  ;;  %v5246_v15 = vpop.eup %5245 }
 0x3fe   : > { %v2964_v10 = vmul.f32 %v5242_v62, %v2909_v17  ;;  %v3342_v31 = vpop.xlane.xlu0 %3341  ;;  %3530 = vmatmul.bf16.gmra.mxu2 %v3446_v22  ;;  %v5248_v62 = vpop.eup %5247  ;;  %v2360_v17 = vpack.c.bf16 %v2344_v36, %v2344_v36 }
 0x3ff   : > { %v3369_v11 = vsub.f32 %v6559_v19, %v3342_v31  ;;  %v2347_v32 = vmul.f32 %v5248_v62, %v2295_v47  ;;  %v5250_v19 = vpop.eup %5249 }
 0x400   : > { %v2980_v13 = vpack.c.bf16 %v2964_v10, %v2964_v10  ;;  %v6692_v24 = vpop.xlane.xlu1 %2802  ;;  %v3344_v60 = vpop.xlane.xlu2 %3343  ;;  %v2963_v28 = vmul.f32 %v5250_v19, %v2907_v48 }
 0x401   : > { %v3389_v59 = vmul.f32 1.442695, %v3369_v11  ;;  %v3370_v58 = vsub.f32 %v6564_v2, %v3344_v60  ;;  %v2298_v5 = vpop.f32.mrf.mxu2  ;;  %v2363_v2 = vpack.c.bf16 %v2347_v32, %v2347_v32 }
 0x402   : > { %3013 = vrot.lane.b32.xlu0 %v2980_v13, %s5649_s26  ;;  %v6696_v46 = vmul.f32 %v5246_v15, %v2298_v5  ;;  %v5252_v15 = vpop.eup %5251  ;;  %v2979_v61 = vpack.c.bf16 %v2963_v28, %v2963_v28 }
 0x403   : > { %v3391_v38 = vmul.f32 1.442695, %v3370_v58  ;;  %5253 = vpow2.f32 %v3389_v59 }
 0x405   : > { %5255 = vpow2.f32 %v3391_v38  ;;  %v6698_v22 = vpop.f32.mrf.mxu0  ;;  %2392 = vrot.lane.b32.xlu1 %v2360_v17, %s5647_s11 }
 0x406   : > { %v6701_v10 = vpop.xlane.xlu0 %2800  ;;  %5257 = vrcp.f32 %v2188_v43 }
 0x408   : > { %v3348_v31 = vpop.xlane.xlu1 %3347  ;;  %v3346_v11 = vpop.xlane.xlu2 %3345 }
 0x409   : > { %v2300_v13 = vpop.f32.mrf.mxu2  ;;  %v6703_v60 = vpop.eup %5253  ;;  %v3372_v47 = vsub.f32 %v6578_v50, %v3348_v31  ;;  %v3371_v48 = vsub.f32 %v6570_v16, %v3346_v11 }
 0x40a   : > { %2398 = vrot.lane.b32.xlu0 %v2363_v2, %s5647_s11  ;;  %v6707_v59 = vmul.f32 %v5252_v15, %v2300_v13 }
 0x40b   : > { %v6709_v36 = vpop.eup %5255  ;;  %v3395_v62 = vmul.f32 1.442695, %v3372_v47  ;;  %v3393_v50 = vmul.f32 1.442695, %v3371_v48 }
 0x40c   : > { %3011 = vrot.lane.b32.xlu2 %v2979_v61, %s5649_s26  ;;  %v3447_v58 = vpack.c.bf16 %v6709_v36, %v6703_v60  ;;  %v5258_v28 = vpop.eup %5257 }
 0x40d   : > { %v6715_v5 = vpop.f32.mrf.mxu0  ;;  %5259 = vpow2.f32 %v3395_v62 }
 0x40e   : > { %v6717_v17 = vpop.xlane.xlu0 %2189  ;;  %3535 = vmatmul.bf16.gmra.mxu2 %v3447_v58  ;;  %5261 = vpow2.f32 %v3393_v50 }
 0x410   : > { %v2192_v38 = vpop.xlane.xlu2 %2191  ;;  %v3350_v19 = vpop.xlane.xlu1 %3349 }
 0x411   : > { %v3373_v62 = vsub.f32 %v6584_v37, %v3350_v19  ;;  %5263 = vrcp.f32 %v2192_v38 }
 0x413   : > { %v6723_v2 = vpop.eup %5259  ;;  %v3397_v49 = vmul.f32 1.442695, %v3373_v62 }
 0x414   : > { %v5262_v11 = vpop.eup %5261 }
 0x415   : > { %v6719_v32 = vpop.f32.mrf.mxu0  ;;  %v3448_v61 = vpack.c.bf16 %v6723_v2, %v5262_v11  ;;  %5265 = vpow2.f32 %v3397_v49 }
 0x416   : > { %v6721_v16 = vpop.xlane.xlu0 %2804 }
 0x417   : > { %v5264_v27 = vpop.eup %5263 }
 0x418   : > { %v6725_v31 = vpop.xlane.xlu2 %2806  ;;  %v6732_v48 = vpop.xlane.xlu1 %2808 }
 0x41a   : > { %v2303_v15 = vpop.f32.mrf.mxu2 }
 0x41b   : > { %v6727_v13 = vmul.f32 %v5258_v28, %v2303_v15  ;;  %v6746_v19 = vpop.eup %5265 }
 0x41d   : > { %v6730_v47 = vpop.f32.mrf.mxu0 }
 0x41e   : > { %v2194_v43 = vpop.xlane.xlu0 %2193  ;;  %3540 = vmatmul.bf16.gmra.mxu2 %v3448_v61 }
 0x41f   : > { %5267 = vrcp.f32 %v2194_v43 }
 0x420   : > { %v2198_v58 = vpop.xlane.xlu2 %2197 }
 0x422   : > { %v6735_v50 = vpop.f32.mrf.mxu2 }
 0x425   : > { %v6737_v34 = vpop.f32.mrf.mxu0  ;;  %v5268_v62 = vpop.eup %5267 }
 0x426   : > { %v3352_v41 = vpop.xlane.xlu0 %3351 }
 0x427   : > { %v3374_v28 = vsub.f32 %v6591_v4, %v3352_v41  ;;  %v6740_v15 = vpop.xlane.xlu1 %2810 }
 0x428   : > { %v3356_v61 = vpop.xlane.xlu2 %3355 }
 0x429   : > { %v3399_v9 = vmul.f32 1.442695, %v3374_v28 }
 0x42a   : > { %v2308_v45 = vpop.f32.mrf.mxu2 }
 0x42b   : > { %v6742_v23 = vmul.f32 %v5264_v27, %v2308_v45  ;;  %5269 = vpow2.f32 %v3399_v9  ;;  %v3376_v45 = vsub.f32 %v6604_v0, %v3356_v61 }
 0x42d   : > { %v6744_v37 = vpop.f32.mrf.mxu0 }
 0x42e   : > { %v3354_v38 = vpop.xlane.xlu0 %3353 }
 0x42f   : > { %3419 = vadd.xlane.f32.xlu1 %v6688_v54  ;;  %v3375_v41 = vsub.f32 %v6598_v53, %v3354_v38  ;;  %v6757_v9 = vpop.xlane.xlu1 %2814  ;;  %v3403_v38 = vmul.f32 1.442695, %v3376_v45 }
 0x430   : > { %v2813_v43 = vpop.xlane.xlu2 %2812 }
 0x431   : > { %v6749_v4 = vpop.eup %5269  ;;  %v3401_v25 = vmul.f32 1.442695, %v3375_v41  ;;  %5271 = vrcp.f32 %v2813_v43 }
 0x432   : > { %v2310_v49 = vpop.f32.mrf.mxu2  ;;  %v3449_v27 = vpack.c.bf16 %v6749_v4, %v6746_v19 }
 0x433   : > { %v6752_v28 = vmul.f32 %v5268_v62, %v2310_v49 }
 0x434   : > { %3425 = vadd.xlane.f32.xlu0 %v5262_v11  ;;  %3545 = vmatmul.bf16.gmra.mxu2 %v3449_v27 }
 0x435   : > { %v6759_v54 = vpop.f32.mrf.mxu0  ;;  %3421 = vadd.xlane.f32.xlu2 %v6703_v60 }
 0x436   : > { %v2196_v53 = vpop.xlane.xlu0 %2195 }
 0x437   : > { %5273 = vrcp.f32 %v2196_v53  ;;  %3423 = vadd.xlane.f32.xlu1 %v6709_v36  ;;  %v5272_v61 = vpop.eup %5271  ;;  %v3360_v62 = vpop.xlane.xlu1 %3359 }
 0x438   : > { %5275 = vrcp.f32 %v6701_v10  ;;  %v3358_v27 = vpop.xlane.xlu2 %3357  ;;  %v3378_v36 = vsub.f32 %v6618_v21, %v3360_v62 }
 0x439   : > { %5277 = vpow2.f32 %v3401_v25  ;;  %v3377_v25 = vsub.f32 %v6611_v29, %v3358_v27 }
 0x43a   : > { %v2313_v0 = vpop.f32.mrf.mxu2  ;;  %5279 = vrcp.f32 %v2198_v58 }
 0x43b   : > { %5281 = vpow2.f32 %v3403_v38 }
 0x43c   : > { %5283 = vrcp.f32 %v6683_v44 }
 0x43d   : > { %v5274_v11 = vpop.eup %5273  ;;  %v2929_v41 = vpop.f32.mrf.mxu0 }
 0x43e   : > { %v5276_v49 = vpop.eup %5275  ;;  %v6764_v42 = vmul.f32 %v5274_v11, %v2313_v0  ;;  %v6766_v60 = vmul.f32 %v5272_v61, %v2929_v41  ;;  %v3407_v61 = vmul.f32 1.442695, %v3378_v36  ;;  %v3405_v11 = vmul.f32 1.442695, %v3377_v25 }
 0x43f   : > { %v6768_v45 = vpop.eup %5277  ;;  %v2966_v53 = vmul.f32 %v5276_v49, %v6715_v5  ;;  %v2362_v5 = vpack.c.bf16 %v6685_v14, %v6685_v14  ;;  %v3362_v49 = vpop.xlane.xlu1 %3361 }
 0x440   : > { %v5280_v43 = vpop.eup %5279  ;;  %5285 = vpow2.f32 %v3407_v61  ;;  %v3379_v25 = vsub.f32 %v6631_v55, %v3362_v49 }
 0x441   : > { %v6771_v10 = vpop.eup %5281  ;;  %v2982_v41 = vpack.c.bf16 %v2966_v53, %v2966_v53  ;;  %5287 = vpow2.f32 %v3405_v11 }
 0x442   : > { %v2315_v58 = vpop.f32.mrf.mxu2  ;;  %v3450_v0 = vpack.c.bf16 %v6771_v10, %v6768_v45  ;;  %v5284_v21 = vpop.eup %5283  ;;  %5289 = vrcp.f32 %v6692_v24  ;;  %v3409_v53 = vmul.f32 1.442695, %v3379_v25 }
 0x443   : > { %v6775_v38 = vmul.f32 %v5280_v43, %v2315_v58  ;;  %v2965_v29 = vmul.f32 %v5284_v21, %v6698_v22  ;;  %v3364_v43 = vpop.xlane.xlu0 %3363 }
 0x444   : > { %3550 = vmatmul.bf16.gmra.mxu2 %v3450_v0  ;;  %v3380_v14 = vsub.f32 %v6644_v6, %v3364_v43  ;;  %5291 = vpow2.f32 %v3409_v53 }
 0x445   : > { %v2981_v27 = vpack.c.bf16 %v2965_v29, %v2965_v29 }
 0x446   : > { %v6788_v44 = vpop.eup %5285  ;;  %v3411_v0 = vmul.f32 1.442695, %v3380_v14 }
 0x447   : > { %v6790_v36 = vpop.eup %5287 }
 0x448   : > { %3017 = vrot.lane.b32.xlu0 %v2982_v41, %s5649_s26  ;;  %v5290_v22 = vpop.eup %5289  ;;  %v3451_v58 = vpack.c.bf16 %v6788_v44, %v6790_v36  ;;  %5293 = vpow2.f32 %v3411_v0 }
 0x449   : > { %v2967_v24 = vmul.f32 %v5290_v22, %v6719_v32 }
 0x44a   : > { %v6785_v62 = vpop.f32.mrf.mxu2  ;;  %v6801_v55 = vpop.eup %5291 }
 0x44b   : > { %v2983_v11 = vpack.c.bf16 %v2967_v24, %v2967_v24 }
 0x44d   : > { %2396 = vrot.lane.b32.xlu2 %v2362_v5, %s5647_s11 }
 0x44e   : > { %v6803_v41 = vpop.eup %5293 }
 0x44f   : > { %v3452_v21 = vpack.c.bf16 %v6803_v41, %v6801_v55 }
 0x450   : > { %3015 = vrot.lane.b32.xlu1 %v2981_v27, %s5649_s26 }
 0x452   : > { %v6798_v61 = vpop.f32.mrf.mxu2 }
 0x454   : > { %3555 = vmatmul.bf16.gmra.mxu2 %v3451_v58 }
 0x455   : > { %v3414_v29 = vpop.xlane.xlu2 %3413 }
 0x458   : > { %3019 = vrot.lane.b32.xlu1 %v2983_v11, %s5649_s26 }
 0x45a   : > { %v6805_v6 = vpop.f32.mrf.mxu2 }
 0x45f   : > { %v3416_v27 = vpop.xlane.xlu1 %3415 }
 0x460   : > { %v2395_v32 = vpop.permute.xlu0 %2394  ;;  %5295 = vrcp.f32 %v3416_v27 }
 0x461   : > { %2442 = vst.msk [vmem:[#allocation3 + $0x4] sm:$0xf] %vm2440_vm2, %v2395_v32 }
 0x462   : > { %v6810_v5 = vpop.f32.mrf.mxu2 }
 0x464   : > { %3560 = vmatmul.bf16.gmra.mxu2 %v3452_v21  ;;  %v2364_v21 = vpack.c.bf16 %v6696_v46, %v6696_v46 }
 0x466   : > { %v5296_v24 = vpop.eup %5295 }
 0x467   : > { %v3418_v49 = vpop.xlane.xlu2 %3417 }
 0x468   : > { %5297 = vrcp.f32 %v3418_v49 }
 0x46f   : > { %v3012_v14 = vpop.permute.xlu2 %3011 }
 0x471   : > { %v3526_v43 = vpop.f32.mrf.mxu2 }
 0x472   : > { %3429 = vadd.xlane.f32.xlu0 %v6746_v19  ;;  %v5298_v19 = vpop.eup %5297 }
 0x474   : > { %v3014_v25 = vpop.permute.xlu0 %3013 }
 0x475   : > { %3061 = vst.msk [vmem:[#allocation3 + $0x4] sm:$0xf] %vm3059_vm3, %v3014_v25 }
 0x476   : > { %2816 = vadd.xlane.f32.xlu2 %v6628_v18  ;;  %v2365_v18 = vpack.c.bf16 %v6707_v59, %v6707_v59 }
 0x477   : > { %v2393_v22 = vpop.permute.xlu1 %2392 }
 0x478   : > { %2441 = vst.msk [vmem:[#allocation3] sm:$0xf] %vm2440_vm2, %v2393_v22 }
 0x479   : > { %3060 = vst.msk [vmem:[#allocation3] sm:$0xf] %vm3059_vm3, %v3012_v14  ;;  %v3528_v58 = vpop.f32.mrf.mxu2 }
 0x47a   : > { %v6817_v53 = vmul.f32 %v5296_v24, %v3528_v58 }
 0x47c   : > { %v2399_v0 = vpop.permute.xlu0 %2398 }
 0x47d   : > { %2444 = vst.msk [vmem:[#allocation3 + $0xc] sm:$0xf] %vm2440_vm2, %v2399_v0 }
 0x47e   : > { %3427 = vadd.xlane.f32.xlu2 %v6723_v2 }
 0x481   : > { %v3531_v11 = vpop.f32.mrf.mxu2 }
 0x482   : > { %v3584_v32 = vmul.f32 %v5298_v19, %v3531_v11  ;;  %3431 = vadd.xlane.f32.xlu1 %v6749_v4 }
 0x486   : > { %2402 = vrot.lane.b32.xlu0 %v2365_v18, %s5647_s11 }
 0x489   : > { %v3533_v49 = vpop.f32.mrf.mxu2 }
 0x48a   : > { %3435 = vadd.xlane.f32.xlu1 %v6771_v10 }
 0x492   : > { %2199 = vadd.xlane.f32.xlu1 %v6625_v56  ;;  %v3536_v56 = vpop.f32.mrf.mxu2 }
 0x496   : > { %2400 = vrot.lane.b32.xlu2 %v2364_v21, %s5647_s11 }
 0x49a   : > { %2820 = vadd.xlane.f32.xlu1 %v6658_v30  ;;  %v3538_v0 = vpop.f32.mrf.mxu2 }
 0x4a2   : > { %v3420_v2 = vpop.xlane.xlu1 %3419 }
 0x4a3   : > { %5299 = vrcp.f32 %v3420_v2 }
 0x4a4   : > { %5301 = vrcp.f32 %v3414_v29  ;;  %v2366_v29 = vpack.c.bf16 %v6727_v13, %v6727_v13  ;;  %v3541_v13 = vpop.f32.mrf.mxu2 }
 0x4a7   : > { %v3426_v30 = vpop.xlane.xlu0 %3425 }
 0x4a8   : > { %v3422_v4 = vpop.xlane.xlu2 %3421 }
 0x4a9   : > { %v5300_v27 = vpop.eup %5299  ;;  %5303 = vrcp.f32 %v3422_v4 }
 0x4aa   : > { %v6831_v59 = vmul.f32 %v5300_v27, %v3533_v49  ;;  %v5302_v25 = vpop.eup %5301  ;;  %v3424_v58 = vpop.xlane.xlu1 %3423 }
 0x4ab   : > { %v3582_v10 = vmul.f32 %v5302_v25, %v3526_v43  ;;  %5305 = vrcp.f32 %v3424_v58  ;;  %v3600_v25 = vpack.c.bf16 %v3584_v32, %v3584_v32 }
 0x4ac   : > { %5307 = vrcp.f32 %v6721_v16 }
 0x4ad   : > { %v3598_v24 = vpack.c.bf16 %v3582_v10, %v3582_v10  ;;  %5309 = vrcp.f32 %v3426_v30 }
 0x4ae   : > { %5311 = vrcp.f32 %v6725_v31 }
 0x4af   : > { %v5304_v22 = vpop.eup %5303 }
 0x4b0   : > { %v3586_v14 = vmul.f32 %v5304_v22, %v3536_v56  ;;  %3433 = vadd.xlane.f32.xlu0 %v6768_v45  ;;  %v2397_v46 = vpop.permute.xlu2 %2396 }
 0x4b1   : > { %2443 = vst.msk [vmem:[#allocation3 + $0x8] sm:$0xf] %vm2440_vm2, %v2397_v46  ;;  %v5306_v43 = vpop.eup %5305 }
 0x4b2   : > { %v5308_v11 = vpop.eup %5307  ;;  %v3587_v45 = vmul.f32 %v5306_v43, %v3538_v0  ;;  %v3601_v43 = vpack.c.bf16 %v6831_v59, %v6831_v59  ;;  %v5009_v0 = vld [vmem:[#allocation12 + $0x38] sm:$0xff]  ;;  %v5006_v59 = vld [vmem:[#allocation12 + $0x20] sm:$0xff] }
 0x4b3   : > { %3630 = vrot.lane.b32.xlu1 %v3598_v24, %s5648_s16  ;;  %v2968_v18 = vmul.f32 %v5308_v11, %v6730_v47  ;;  %v5310_v2 = vpop.eup %5309  ;;  %3827 = vmatpush.bf16.msrb.mxu3 %v5009_v0  ;;  %v5008_v11 = vld [vmem:[#allocation12 + $0x30] sm:$0xff] }
 0x4b4   : > { %v3603_v21 = vpack.c.bf16 %v3587_v45, %v3587_v45  ;;  %v3588_v4 = vmul.f32 %v5310_v2, %v3541_v13  ;;  %v5007_v2 = vld [vmem:[#allocation12 + $0x28] sm:$0xff]  ;;  %v5004_v13 = vld [vmem:[#allocation12 + $0x10] sm:$0xff] }
 0x4b5   : > { %v2984_v16 = vpack.c.bf16 %v2968_v18, %v2968_v18 }
 0x4b6   : > { %v3604_v27 = vpack.c.bf16 %v3588_v4, %v3588_v4  ;;  %v2370_v4 = vpack.c.bf16 %v6764_v42, %v6764_v42 }
 0x4b7   : > { %3828 = vmatpush.bf16.msrb.mxu3 %v5008_v11 }
 0x4ba   : > { %v3018_v19 = vpop.permute.xlu0 %3017 }
 0x4bb   : > { %3063 = vst.msk [vmem:[#allocation3 + $0xc] sm:$0xf] %vm3059_vm3, %v3018_v19  ;;  %2404 = vrot.lane.b32.xlu1 %v2366_v29, %s5647_s11  ;;  %3829 = vmatpush.bf16.msrb.mxu3 %v5007_v2  ;;  %v2988_v2 = vpack.c.bf16 %v6766_v60, %v6766_v60 }
 0x4bf   : > { %1650 = vadd.xlane.f32.xlu2 %v6403_v12  ;;  %v3599_v12 = vpack.c.bf16 %v6817_v53, %v6817_v53  ;;  %3830 = vmatpush.bf16.msrb.mxu3 %v5006_v59  ;;  %v7184_v59 = vld [vmem:[#allocation25_spill] sm:$0xff] }
 0x4c2   : > { %v3016_v49 = vpop.permute.xlu1 %3015 }
 0x4c3   : > { %3062 = vst.msk [vmem:[#allocation3 + $0x8] sm:$0xf] %vm3059_vm3, %v3016_v49  ;;  %3640 = vrot.lane.b32.xlu1 %v3603_v21, %s5648_s16 }
 0x4c4   : > { %3021 = vrot.lane.b32.xlu0 %v2984_v16, %s5649_s26 }
 0x4c7   : > { %2818 = vadd.xlane.f32.xlu2 %v6654_v3  ;;  %v5312_v3 = vpop.eup %5311 }
 0x4c8   : > { %v2969_v22 = vmul.f32 %v5312_v3, %v6737_v34  ;;  %v3602_v34 = vpack.c.bf16 %v3586_v14, %v3586_v14 }
 0x4ca   : > { %v2985_v56 = vpack.c.bf16 %v2969_v22, %v2969_v22  ;;  %v3020_v53 = vpop.permute.xlu1 %3019  ;;  %v5002_v22 = vld [vmem:[#allocation12] sm:$0xff] }
 0x4cb   : > { %3642 = vrot.lane.b32.xlu1 %v3604_v27, %s5648_s16 }
 0x4cf   : > { %3439 = vadd.xlane.f32.xlu2 %v6788_v44 }
 0x4e5   : > { %v6857_v10 = vpop.xlane.xlu0 %3429 }
 0x4e7   : > { %3632 = vrot.lane.b32.xlu2 %v3599_v12, %s5648_s16 }
 0x4e9   : > { %v6852_v47 = vpop.xlane.xlu2 %2816 }
 0x4ee   : > { %1648 = vadd.xlane.f32.xlu0 %v6401_v1 }
 0x4ef   : > { %3634 = vrot.lane.b32.xlu2 %v3600_v25, %s5648_s16  ;;  %v5003_v25 = vld [vmem:[#allocation12 + $0x8] sm:$0xff] }
 0x4f1   : > { %v3428_v44 = vpop.xlane.xlu2 %3427 }
 0x4f2   : > { %5313 = vrcp.f32 %v3428_v44  ;;  %v2371_v44 = vpack.c.bf16 %v6775_v38, %v6775_v38 }
 0x4f3   : > { %5315 = vrcp.f32 %v6717_v17 }
 0x4f4   : > { %5317 = vrcp.f32 %v6740_v15 }
 0x4f5   : > { %1654 = vadd.xlane.f32.xlu1 %v6427_v26  ;;  %v3432_v26 = vpop.xlane.xlu1 %3431  ;;  %5319 = vrcp.f32 %v6732_v48 }
 0x4f6   : > { %2201 = vadd.xlane.f32.xlu0 %v6623_v57  ;;  %v3543_v57 = vpop.f32.mrf.mxu2  ;;  %5321 = vrcp.f32 %v3432_v26 }
 0x4f7   : > { %3023 = vrot.lane.b32.xlu2 %v2985_v56, %s5649_s26  ;;  %5323 = vrcp.f32 %v6757_v9  ;;  %v2932_v56 = vpop.f32.mrf.mxu0 }
 0x4f8   : > { %v2403_v31 = vpop.permute.xlu0 %2402  ;;  %v5314_v32 = vpop.eup %5313 }
 0x4f9   : > { %2446 = vst.msk [vmem:[#allocation3 + $0x14] sm:$0xf] %vm2440_vm2, %v2403_v31  ;;  %v2401_v1 = vpop.permute.xlu2 %2400  ;;  %v3589_v46 = vmul.f32 %v5314_v32, %v3543_v57  ;;  %v5316_v30 = vpop.eup %5315 }
 0x4fa   : > { %2445 = vst.msk [vmem:[#allocation3 + $0x10] sm:$0xf] %vm2440_vm2, %v2401_v1 }
 0x4fb   : > { %3064 = vst.msk [vmem:[#allocation3 + $0x10] sm:$0xf] %vm3059_vm3, %v3020_v53  ;;  %v3605_v24 = vpack.c.bf16 %v3589_v46, %v3589_v46 }
 0x4fd   : > { %2822 = vadd.xlane.f32.xlu1 %v6674_v7  ;;  %v6872_v58 = vpop.xlane.xlu1 %3435  ;;  %v2351_v7 = vmul.f32 %v5316_v30, %v6735_v50 }
 0x4fe   : > { %3437 = vadd.xlane.f32.xlu0 %v6790_v36  ;;  %v6880_v17 = vpop.f32.mrf.mxu2 }
 0x4ff   : > { %3638 = vrot.lane.b32.xlu2 %v3602_v34, %s5648_s16  ;;  %v2367_v14 = vpack.c.bf16 %v2351_v7, %v2351_v7 }
 0x505   : > { %3443 = vadd.xlane.f32.xlu1 %v6803_v41  ;;  %v6877_v36 = vpop.xlane.xlu1 %2199  ;;  %v5318_v41 = vpop.eup %5317 }
 0x506   : > { %v2971_v29 = vmul.f32 %v5318_v41, %v6759_v54  ;;  %v5320_v50 = vpop.eup %5319  ;;  %v3548_v18 = vpop.f32.mrf.mxu2  ;;  %v2368_v41 = vpack.c.bf16 %v6742_v23, %v6742_v23 }
 0x507   : > { %3644 = vrot.lane.b32.xlu2 %v3605_v24, %s5648_s16  ;;  %v2970_v15 = vmul.f32 %v5320_v50, %v6744_v37  ;;  %v5322_v45 = vpop.eup %5321  ;;  %v5005_v37 = vld [vmem:[#allocation12 + $0x18] sm:$0xff] }
 0x508   : > { %v2987_v19 = vpack.c.bf16 %v2971_v29, %v2971_v29  ;;  %v3591_v21 = vmul.f32 %v5322_v45, %v3548_v18  ;;  %3831 = vmatpush.bf16.msrb.mxu3 %v5005_v37  ;;  %v5324_v31 = vpop.eup %5323 }
 0x509   : > { %v2986_v54 = vpack.c.bf16 %v2970_v15, %v2970_v15 }
 0x50a   : > { %v3607_v16 = vpack.c.bf16 %v3591_v21, %v3591_v21 }
 0x50c   : > { %3832 = vmatpush.bf16.msrb.mxu3 %v5004_v13 }
 0x50d   : > { %v6887_v48 = vpop.xlane.xlu1 %2820 }
 0x510   : > { %3833 = vmatpush.bf16.msrb.mxu3 %v5003_v25 }
 0x512   : > { %2406 = vrot.lane.b32.xlu0 %v2367_v14, %s5647_s11 }
 0x514   : > { %3834 = vmatpush.bf16.msrb.mxu3 %v5002_v22 }
 0x51a   : > { %3636 = vrot.lane.b32.xlu0 %v3601_v43, %s5648_s16 }
 0x51e   : > { %3027 = vrot.lane.b32.xlu1 %v2987_v19, %s5649_s26 }
 0x522   : > { %3025 = vrot.lane.b32.xlu0 %v2986_v54, %s5649_s26 }
 0x523   : > { %v3434_v12 = vpop.xlane.xlu0 %3433 }
 0x525   : > { %v3631_v49 = vpop.permute.xlu1 %3630 }
 0x526   : > { %3679 = vst.msk [vmem:[#allocation3] sm:$0xf] %vm3678_vm4, %v3631_v49  ;;  %3648 = vrot.lane.b32.xlu1 %v3607_v16, %s5648_s16  ;;  %v7185_v16 = vld [vmem:[#allocation29_spill] sm:$0xff] }
 0x52d   : > { %v6895_v27 = vpop.permute.xlu1 %2404 }
 0x52e   : > { %2412 = vrot.lane.b32.xlu1 %v2370_v4, %s5647_s11 }
 0x530   : > { %2203 = vadd.xlane.f32.xlu2 %v6650_v39  ;;  %v2973_v39 = vmul.f32 %v5324_v31, %v2932_v56  ;;  %v7186_v56 = vld [vmem:[#allocation27_spill] sm:$0xff] }
 0x532   : > { %v1651_v3 = vpop.xlane.xlu2 %1650  ;;  %v2989_v34 = vpack.c.bf16 %v2973_v39, %v2973_v39 }
 0x533   : > { %5325 = vrcp.f32 %v1651_v3 }
 0x534   : > { %5327 = vrcp.f32 %v6852_v47  ;;  %v2934_v47 = vpop.f32.mrf.mxu0 }
 0x535   : > { %v3641_v42 = vpop.permute.xlu1 %3640  ;;  %5329 = vrcp.f32 %v3434_v12 }
 0x536   : > { %v3022_v53 = vpop.permute.xlu0 %3021  ;;  %2414 = vrot.lane.b32.xlu1 %v2371_v44, %s5647_s11  ;;  %5331 = vrcp.f32 %v6857_v10 }
 0x537   : > { %3065 = vst.msk [vmem:[#allocation3 + $0x14] sm:$0xf] %vm3059_vm3, %v3022_v53 }
 0x538   : > { %3684 = vst.msk [vmem:[#allocation3 + $0x14] sm:$0xf] %vm3678_vm4, %v3641_v42  ;;  %2824 = vadd.xlane.f32.xlu2 %v6670_v35  ;;  %v3551_v35 = vpop.f32.mrf.mxu2 }
 0x539   : > { %v5326_v9 = vpop.eup %5325 }
 0x53a   : > { %v1796_v1 = vmul.f32 %v5326_v9, %v6594_v52  ;;  %v6908_v38 = vpop.xlane.xlu2 %2818  ;;  %v5328_v26 = vpop.eup %5327 }
 0x53b   : > { %v2974_v57 = vmul.f32 %v5328_v26, %v2934_v47  ;;  %v5330_v30 = vpop.eup %5329 }
 0x53c   : > { %v1812_v32 = vpack.c.bf16 %v1796_v1, %v1796_v1  ;;  %v3592_v52 = vmul.f32 %v5330_v30, %v3551_v35  ;;  %v5332_v29 = vpop.eup %5331 }
 0x53d   : > { %v2990_v24 = vpack.c.bf16 %v2974_v57, %v2974_v57  ;;  %v3590_v43 = vmul.f32 %v5332_v29, %v6880_v17  ;;  %v3643_v23 = vpop.permute.xlu1 %3642 }
 0x53e   : > { %1829 = vst.msk [vmem:[#allocation3 + $0x1c] sm:$0xf] %vm1821_vm1, %v1812_v32  ;;  %3031 = vrot.lane.b32.xlu1 %v2989_v34, %s5649_s26  ;;  %v3608_v14 = vpack.c.bf16 %v3592_v52, %v3592_v52 }
 0x53f   : > { %v3606_v10 = vpack.c.bf16 %v3590_v43, %v3590_v43 }
 0x540   : > { %v3553_v4 = vpop.f32.mrf.mxu2 }
 0x542   : > { %v6912_v46 = vpop.xlane.xlu2 %3439 }
 0x546   : > { %3033 = vrot.lane.b32.xlu1 %v2990_v24, %s5649_s26 }
 0x548   : > { %v3556_v22 = vpop.f32.mrf.mxu2 }
 0x54a   : > { %v3633_v7 = vpop.permute.xlu2 %3632 }
 0x54b   : > { %3680 = vst.msk [vmem:[#allocation3 + $0x4] sm:$0xf] %vm3678_vm4, %v3633_v7 }
 0x54c   : > { %1652 = vadd.xlane.f32.xlu0 %v6424_v40 }
 0x54e   : > { %3650 = vrot.lane.b32.xlu1 %v3608_v14, %s5648_s16 }
 0x550   : > { %2408 = vrot.lane.b32.xlu2 %v2368_v41, %s5647_s11  ;;  %v3558_v9 = vpop.f32.mrf.mxu2 }
 0x552   : > { %v3635_v0 = vpop.permute.xlu2 %3634  ;;  %v4994_v50 = vld [vmem:[#allocation3] sm:$0xff] }
 0x553   : > { %3681 = vst.msk [vmem:[#allocation3 + $0x8] sm:$0xf] %vm3678_vm4, %v3635_v0  ;;  %3835 = vmatmul.bf16.vlgmr.msrb.gmra.mxu3 %v4994_v50 }
 0x554   : > { %2205 = vadd.xlane.f32.xlu0 %v6652_v33  ;;  %v2369_v33 = vpack.c.bf16 %v6752_v28, %v6752_v28 }
 0x558   : > { %3646 = vrot.lane.b32.xlu2 %v3606_v10, %s5648_s16 }
 0x55a   : > { %v3024_v40 = vpop.permute.xlu2 %3023 }
 0x55c   : > { %3441 = vadd.xlane.f32.xlu0 %v6801_v55 }
 0x561   : > { %v1649_v15 = vpop.xlane.xlu0 %1648 }
 0x562   : > { %5333 = vrcp.f32 %v1649_v15  ;;  %v3639_v19 = vpop.permute.xlu2 %3638 }
 0x563   : > { %3683 = vst.msk [vmem:[#allocation3 + $0x10] sm:$0xf] %vm3678_vm4, %v3639_v19 }
 0x568   : > { %v5334_v17 = vpop.eup %5333  ;;  %v1655_v11 = vpop.xlane.xlu1 %1654 }
 0x569   : > { %v1795_v45 = vmul.f32 %v5334_v17, %v6586_v51  ;;  %5335 = vrcp.f32 %v1655_v11  ;;  %v2202_v51 = vpop.xlane.xlu0 %2201 }
 0x56a   : > { %5337 = vrcp.f32 %v6877_v36  ;;  %v3645_v13 = vpop.permute.xlu2 %3644  ;;  %v4996_v53 = vld [vmem:[#allocation3 + $0x10] sm:$0xff] }
 0x56b   : > { %v1811_v18 = vpack.c.bf16 %v1795_v45, %v1795_v45  ;;  %5339 = vrcp.f32 %v6887_v48 }
 0x56c   : > { %5341 = vrcp.f32 %v6912_v46 }
 0x56d   : > { %1828 = vst.msk [vmem:[#allocation3 + $0x18] sm:$0xf] %vm1821_vm1, %v1811_v18  ;;  %5343 = vrcp.f32 %v6872_v58  ;;  %v7187_v18 = vld [vmem:[#allocation21_spill] sm:$0xff] }
 0x56e   : > { %2447 = vst.msk [vmem:[#allocation3 + $0x18] sm:$0xf] %vm2440_vm2, %v6895_v27  ;;  %v2937_v27 = vpop.f32.mrf.mxu0 }
 0x56f   : > { %v5336_v55 = vpop.eup %5335  ;;  %3066 = vst.msk [vmem:[#allocation3 + $0x18] sm:$0xf] %vm3059_vm3, %v3024_v40 }
 0x570   : > { %3685 = vst.msk [vmem:[#allocation3 + $0x18] sm:$0xf] %vm3678_vm4, %v3643_v23  ;;  %v1798_v54 = vmul.f32 %v5336_v55, %v6607_v20  ;;  %2410 = vrot.lane.b32.xlu0 %v2369_v33, %s5647_s11 }
 0x571   : > { %v6943_v28 = vpop.xlane.xlu0 %3437 }
 0x572   : > { %v1814_v21 = vpack.c.bf16 %v1798_v54, %v1798_v54 }
 0x574   : > { %1831 = vst.msk [vmem:[#allocation3 + $0x24] sm:$0xf] %vm1821_vm1, %v1814_v21 }
 0x576   : > { %v2939_v44 = vpop.f32.mrf.mxu0 }
 0x578   : > { %3029 = vrot.lane.b32.xlu0 %v2988_v2, %s5649_s26  ;;  %1662 = vadd.xlane.f32.xlu1 %v6472_v8  ;;  %v2823_v8 = vpop.xlane.xlu1 %2822  ;;  %v3561_v2 = vpop.f32.mrf.mxu2 }
 0x57e   : > { %v2942_v14 = vpop.f32.mrf.mxu0 }
 0x580   : > { %1666 = vadd.xlane.f32.xlu1 %v6542_v63  ;;  %v5338_v63 = vpop.eup %5337  ;;  %v6955_v25 = vpop.xlane.xlu1 %3443 }
 0x581   : > { %1658 = vadd.xlane.f32.xlu2 %v7184_v59  ;;  %v2356_v12 = vmul.f32 %v5338_v63, %v6785_v62  ;;  %v5340_v36 = vpop.eup %5339 }
 0x582   : > { %v2976_v42 = vmul.f32 %v5340_v36, %v2939_v44  ;;  %v5342_v39 = vpop.eup %5341 }
 0x583   : > { %v2372_v3 = vpack.c.bf16 %v2356_v12, %v2356_v12  ;;  %v3595_v1 = vmul.f32 %v5342_v39, %v3558_v9  ;;  %v5344_v34 = vpop.eup %5343  ;;  %v7188_v39 = vld [vmem:[#allocation26_spill] sm:$0xff] }
 0x584   : > { %v2407_v20 = vpop.permute.xlu0 %2406  ;;  %v2992_v31 = vpack.c.bf16 %v2976_v42, %v2976_v42  ;;  %v3593_v47 = vmul.f32 %v5344_v34, %v3553_v4  ;;  %v6996_v4 = vld [vmem:[%s7130_s6] ss:$0 sm:$0xff] }
 0x585   : > { %2448 = vst.msk [vmem:[#allocation3 + $0x1c] sm:$0xf] %vm2440_vm2, %v2407_v20  ;;  %v3611_v32 = vpack.c.bf16 %v3595_v1, %v3595_v1 }
 0x586   : > { %v3609_v46 = vpack.c.bf16 %v3593_v47, %v3593_v47  ;;  %v7189_v47 = vld [vmem:[#allocation28_spill] sm:$0xff] }
 0x589   : > { %1660 = vadd.xlane.f32.xlu2 %v7185_v16 }
 0x58c   : > { %v3637_v49 = vpop.permute.xlu0 %3636 }
 0x58d   : > { %3682 = vst.msk [vmem:[#allocation3 + $0xc] sm:$0xf] %vm3678_vm4, %v3637_v49 }
 0x590   : > { %v6961_v48 = vpop.permute.xlu1 %3027 }
 0x594   : > { %v3026_v60 = vpop.permute.xlu0 %3025  ;;  %v4995_v37 = vld [vmem:[#allocation3 + $0x8] sm:$0xff] }
 0x595   : > { %3067 = vst.msk [vmem:[#allocation3 + $0x1c] sm:$0xf] %vm3059_vm3, %v3026_v60  ;;  %3840 = vmatmul.bf16.gmra.mxu3 %v4995_v37 }
 0x596   : > { %3686 = vst.msk [vmem:[#allocation3 + $0x1c] sm:$0xf] %vm3678_vm4, %v3645_v13 }
 0x598   : > { %v6964_v57 = vpop.permute.xlu1 %3648 }
 0x59d   : > { %v4997_v24 = vld [vmem:[#allocation3 + $0x18] sm:$0xff] }
 0x5a0   : > { %v6972_v43 = vpop.permute.xlu1 %2412 }
 0x5a1   : > { %2416 = vrot.lane.b32.xlu2 %v2372_v3, %s5647_s11 }
 0x5a2   : > { %1656 = vadd.xlane.f32.xlu0 %v7186_v56 }
 0x5a3   : > { %v2204_v62 = vpop.xlane.xlu2 %2203 }
 0x5a4   : > { %5345 = vrcp.f32 %v2204_v62 }
 0x5a5   : > { %3845 = vmatmul.bf16.gmra.mxu3 %v4996_v53  ;;  %5347 = vrcp.f32 %v2202_v51 }
 0x5a6   : > { %5349 = vrcp.f32 %v2823_v8  ;;  %v3563_v8 = vpop.f32.mrf.mxu2 }
 0x5a7   : > { %5351 = vrcp.f32 %v6908_v38 }
 0x5a8   : > { %v6977_v11 = vpop.permute.xlu1 %2414 }
 0x5a9   : > { %3037 = vrot.lane.b32.xlu2 %v2992_v31, %s5649_s26 }
 0x5aa   : > { %v5346_v26 = vpop.eup %5345 }
 0x5ab   : > { %v2358_v58 = vmul.f32 %v5346_v26, %v6805_v6  ;;  %v5348_v30 = vpop.eup %5347  ;;  %v2825_v35 = vpop.xlane.xlu2 %2824 }
 0x5ac   : > { %v5350_v7 = vpop.eup %5349  ;;  %v2357_v41 = vmul.f32 %v5348_v30, %v6798_v61  ;;  %5353 = vrcp.f32 %v2825_v35  ;;  %v2944_v61 = vpop.f32.mrf.mxu0 }
 0x5ad   : > { %v2374_v52 = vpack.c.bf16 %v2358_v58, %v2358_v58  ;;  %v2977_v29 = vmul.f32 %v5350_v7, %v2942_v14  ;;  %v5352_v0 = vpop.eup %5351  ;;  %5355 = vrcp.f32 %v6943_v28 }
 0x5ae   : > { %v2373_v6 = vpack.c.bf16 %v2357_v41, %v2357_v41  ;;  %v2975_v40 = vmul.f32 %v5352_v0, %v2937_v27 }
 0x5af   : > { %v2993_v38 = vpack.c.bf16 %v2977_v29, %v2977_v29  ;;  %v7192_v29 = vld [vmem:[#allocation24_spill] sm:$0xff] }
 0x5b0   : > { %v2991_v19 = vpack.c.bf16 %v2975_v40, %v2975_v40  ;;  %v6989_v16 = vpop.permute.xlu1 %3031 }
 0x5b1   : > { %3656 = vrot.lane.b32.xlu2 %v3611_v32, %s5648_s16 }
 0x5b2   : > { %v5354_v10 = vpop.eup %5353 }
 0x5b3   : > { %v2978_v23 = vmul.f32 %v5354_v10, %v2944_v61  ;;  %v2409_v15 = vpop.permute.xlu2 %2408  ;;  %v5356_v17 = vpop.eup %5355 }
 0x5b4   : > { %v3594_v51 = vmul.f32 %v5356_v17, %v3556_v22 }
 0x5b5   : > { %3850 = vmatmul.bf16.gmra.mxu3 %v4997_v24  ;;  %v2994_v54 = vpack.c.bf16 %v2978_v23, %v2978_v23  ;;  %v7190_v24 = vld [vmem:[#allocation31_spill] sm:$0xff]  ;;  %v7193_v23 = vld [vmem:[#allocation22_spill] sm:$0xff] }
 0x5b6   : > { %3652 = vrot.lane.b32.xlu0 %v3609_v46, %s5648_s16  ;;  %v3610_v28 = vpack.c.bf16 %v3594_v51, %v3594_v51 }
 0x5b9   : > { %2420 = vrot.lane.b32.xlu2 %v2374_v52, %s5647_s11 }
 0x5bb   : > { %v3647_v59 = vpop.permute.xlu2 %3646 }
 0x5be   : > { %2418 = vrot.lane.b32.xlu0 %v2373_v6, %s5647_s11 }
 0x5bf   : > { %v1653_v50 = vpop.xlane.xlu0 %1652 }
 0x5c0   : > { %5357 = vrcp.f32 %v1653_v50 }
 0x5c1   : > { %3039 = vrot.lane.b32.xlu2 %v2993_v38, %s5649_s26 }
 0x5c6   : > { %v5358_v45 = vpop.eup %5357  ;;  %3035 = vrot.lane.b32.xlu0 %v2991_v19, %s5649_s26 }
 0x5c7   : > { %v1797_v33 = vmul.f32 %v5358_v45, %v7187_v18  ;;  %v2206_v55 = vpop.xlane.xlu0 %2205 }
 0x5c8   : > { %5359 = vrcp.f32 %v2206_v55 }
 0x5c9   : > { %v1813_v21 = vpack.c.bf16 %v1797_v33, %v1797_v33  ;;  %3041 = vrot.lane.b32.xlu2 %v2994_v54, %s5649_s26  ;;  %5361 = vrcp.f32 %v6955_v25  ;;  %s3898_s26 = scalar_lea.sflag [#allocation15], %s5813_s18 }
 0x5cb   : > { %1830 = vst.msk [vmem:[#allocation3 + $0x20] sm:$0xf] %vm1821_vm1, %v1813_v21 }
 0x5cc   : > { %2449 = vst.msk [vmem:[#allocation3 + $0x20] sm:$0xf] %vm2440_vm2, %v2409_v15 }
 0x5cd   : > { %3068 = vst.msk [vmem:[#allocation3 + $0x20] sm:$0xf] %vm3059_vm3, %v6961_v48 }
 0x5ce   : > { %v5360_v20 = vpop.eup %5359  ;;  %3687 = vst.msk [vmem:[#allocation3 + $0x20] sm:$0xf] %vm3678_vm4, %v3647_v59  ;;  %3654 = vrot.lane.b32.xlu0 %v3610_v28, %s5648_s16 }
 0x5cf   : > { %v2359_v49 = vmul.f32 %v5360_v20, %v6810_v5  ;;  %v3442_v60 = vpop.xlane.xlu0 %3441  ;;  %v5362_v13 = vpop.eup %5361 }
 0x5d0   : > { %5363 = vrcp.f32 %v3442_v60  ;;  %v3597_v63 = vmul.f32 %v5362_v13, %v3563_v8  ;;  %v3034_v5 = vpop.permute.xlu1 %3033 }
 0x5d1   : > { %v2375_v37 = vpack.c.bf16 %v2359_v49, %v2359_v49 }
 0x5d2   : > { %v3613_v22 = vpack.c.bf16 %v3597_v63, %v3597_v63 }
 0x5d3   : > { %2422 = vrot.lane.b32.xlu1 %v2375_v37, %s5647_s11  ;;  %s3927_s11 = sshll.u32 %s6014_s23, 4  ;;  %s3928_s11 = int_to_ptr.vmem [resolvable:$true] %s3927_s11 }
 0x5d6   : > { %v5364_v27 = vpop.eup %5363  ;;  %v3836_v25 = vpop.f32.mrf.mxu3 }
 0x5d7   : > { %v3596_v12 = vmul.f32 %v5364_v27, %v3561_v2  ;;  %v3837_v3 = vadd.f32 %v6996_v4, %v3836_v25 }
 0x5d8   : > { %v3651_v53 = vpop.permute.xlu1 %3650 }
 0x5d9   : > { %v3612_v36 = vpack.c.bf16 %v3596_v12, %v3596_v12  ;;  %3876 = vst [vmem:[%s7001_s15] sm:$0xff] %v3837_v3 }
 0x5db   : > { %3658 = vrot.lane.b32.xlu2 %v3612_v36, %s5648_s16  ;;  %3660 = vrot.lane.b32.xlu1 %v3613_v22, %s5648_s16  ;;  %s3929_s16 = sshll.u32 %s3926_s19, 4  ;;  %s3930_s16 = int_to_ptr.hbm [resolvable:$true] %s3929_s16 }
 0x5dc   : > { %s5541_s10 = sshra.s32 %s3930_s16, 4  ;;  %s5542_s10 = int_to_ptr.hbm [resolvable:$true] %s5541_s10 }
 0x5dd   : > { %s5543_s14 = scalar_lea.hbm %s5542_s10, 192  ;;  %p5548_p11 = scmp.lt.s32.totalorder %s5542_s10, %s7132_s8 }
 0x5de   : > { %v3838_v44 = vpop.f32.mrf.mxu3  ;;  %p5544_p1 = scmp.ne.s32.totalorder %s5542_s10, %s5543_s14  ;;  %p5549_p9 = scmp.lt.s32.totalorder %s5547_s22, %s5543_s14 }
 0x5df   : > { %v3839_v56 = vadd.f32 %v6996_v4, %v3838_v44 }
 0x5e0   : > { %p5545_p4 = pnand %p5544_p1, %p5786_p5  ;;  %p5550_p2 = por %p5549_p9, %p5548_p11 }
 0x5e1   : > { %3877 = vst [vmem:[%s7001_s15 + $0x8] sm:$0xff] %v3839_v56 }
 0x5e2   : > { %v2411_v42 = vpop.permute.xlu0 %2410  ;;  %p5546_p8 = pneg %p5545_p4 }
 0x5e3   : > { %2450 = vst.msk [vmem:[#allocation3 + $0x24] sm:$0xf] %vm2440_vm2, %v2411_v42 }
 0x5e4   : > { %p5551_p10 = pnand %p5550_p2, %p5546_p8 }
 0x5ea   : > { %v3030_v48 = vpop.permute.xlu0 %3029 }
 0x5eb   : > { %3069 = vst.msk [vmem:[#allocation3 + $0x24] sm:$0xf] %vm3059_vm3, %v3030_v48  ;;  %v1663_v62 = vpop.xlane.xlu1 %1662 }
 0x5ec   : > { %3688 = vst.msk [vmem:[#allocation3 + $0x24] sm:$0xf] %vm3678_vm4, %v6964_v57  ;;  %5365 = vrcp.f32 %v1663_v62  ;;  %v7191_v57 = vld [vmem:[#allocation23_spill] sm:$0xff] }
 0x5f2   : > { %v5366_v31 = vpop.eup %5365 }
 0x5f3   : > { %v1802_v9 = vmul.f32 %v5366_v31, %v7188_v39  ;;  %v1667_v1 = vpop.xlane.xlu1 %1666  ;;  %v4998_v34 = vld [vmem:[#allocation3 + $0x20] sm:$0xff] }
 0x5f4   : > { %5367 = vrcp.f32 %v1667_v1  ;;  %v1659_v32 = vpop.xlane.xlu2 %1658  ;;  %3855 = vmatmul.bf16.gmra.mxu3 %v4998_v34 }
 0x5f5   : > { %v1818_v26 = vpack.c.bf16 %v1802_v9, %v1802_v9  ;;  %5369 = vrcp.f32 %v1659_v32 }
 0x5f7   : > { %1835 = vst.msk [vmem:[#allocation3 + $0x34] sm:$0xf] %vm1821_vm1, %v1818_v26 }
 0x5f8   : > { %1664 = vadd.xlane.f32.xlu0 %v7189_v47 }
 0x5fa   : > { %v5368_v58 = vpop.eup %5367 }
 0x5fb   : > { %v5370_v46 = vpop.eup %5369  ;;  %v1804_v30 = vmul.f32 %v5368_v58, %v7190_v24 }
 0x5fc   : > { %v1800_v35 = vmul.f32 %v5370_v46, %v7191_v57  ;;  %v1661_v52 = vpop.xlane.xlu2 %1660 }
 0x5fd   : > { %v1820_v7 = vpack.c.bf16 %v1804_v30, %v1804_v30  ;;  %5371 = vrcp.f32 %v1661_v52 }
 0x5fe   : > { %v1816_v14 = vpack.c.bf16 %v1800_v35, %v1800_v35 }
 0x5ff   : > { %1837 = vst.msk [vmem:[#allocation3 + $0x3c] sm:$0xf] %vm1821_vm1, %v1820_v7 }
 0x600   : > { %1833 = vst.msk [vmem:[#allocation3 + $0x2c] sm:$0xf] %vm1821_vm1, %v1816_v14 }
 0x601   : > { %2452 = vst.msk [vmem:[#allocation3 + $0x2c] sm:$0xf] %vm2440_vm2, %v6977_v11 }
 0x602   : > { %3071 = vst.msk [vmem:[#allocation3 + $0x2c] sm:$0xf] %vm3059_vm3, %v3034_v5  ;;  %v7194_v5 = vld [vmem:[#allocation30_spill] sm:$0xff] }
 0x603   : > { %v5372_v41 = vpop.eup %5371 }
 0x604   : > { %v1801_v6 = vmul.f32 %v5372_v41, %v7192_v29  ;;  %v2417_v50 = vpop.permute.xlu2 %2416 }
 0x606   : > { %v1817_v0 = vpack.c.bf16 %v1801_v6, %v1801_v6 }
 0x608   : > { %1834 = vst.msk [vmem:[#allocation3 + $0x30] sm:$0xf] %vm1821_vm1, %v1817_v0 }
 0x609   : > { %2453 = vst.msk [vmem:[#allocation3 + $0x30] sm:$0xf] %vm2440_vm2, %v2417_v50 }
 0x60c   : > { %v3038_v19 = vpop.permute.xlu2 %3037 }
 0x614   : > { %v3657_v18 = vpop.permute.xlu2 %3656 }
 0x615   : > { %v1657_v38 = vpop.xlane.xlu0 %1656 }
 0x616   : > { %5373 = vrcp.f32 %v1657_v38 }
 0x618   : > { %v3841_v10 = vpop.f32.mrf.mxu3 }
 0x619   : > { %v3842_v40 = vadd.f32 %v6996_v4, %v3841_v10 }
 0x61b   : > { %3878 = vst [vmem:[%s7001_s15 + $0x10] sm:$0xff] %v3842_v40 }
 0x61c   : > { %v5374_v61 = vpop.eup %5373  ;;  %v2421_v2 = vpop.permute.xlu2 %2420 }
 0x61d   : > { %v1799_v15 = vmul.f32 %v5374_v61, %v7193_v23 }
 0x61f   : > { %v1815_v17 = vpack.c.bf16 %v1799_v15, %v1799_v15 }
 0x620   : > { %v3843_v11 = vpop.f32.mrf.mxu3 }
 0x621   : > { %1832 = vst.msk [vmem:[#allocation3 + $0x28] sm:$0xf] %vm1821_vm1, %v1815_v17  ;;  %v3844_v45 = vadd.f32 %v6996_v4, %v3843_v11 }
 0x622   : > { %2451 = vst.msk [vmem:[#allocation3 + $0x28] sm:$0xf] %vm2440_vm2, %v6972_v43 }
 0x623   : > { %3070 = vst.msk [vmem:[#allocation3 + $0x28] sm:$0xf] %vm3059_vm3, %v6989_v16 }
 0x624   : > { %3689 = vst.msk [vmem:[#allocation3 + $0x28] sm:$0xf] %vm3678_vm4, %v3651_v53  ;;  %v3040_v49 = vpop.permute.xlu2 %3039 }
 0x625   : > { %3879 = vst [vmem:[%s7001_s15 + $0x18] sm:$0xff] %v3844_v45 }
 0x628   : > { %v3653_v33 = vpop.permute.xlu0 %3652  ;;  %v3846_v55 = vpop.f32.mrf.mxu3 }
 0x629   : > { %3690 = vst.msk [vmem:[#allocation3 + $0x2c] sm:$0xf] %vm3678_vm4, %v3653_v33  ;;  %v3847_v54 = vadd.f32 %v6996_v4, %v3846_v55 }
 0x62b   : > { %3880 = vst [vmem:[%s7001_s15 + $0x20] sm:$0xff] %v3847_v54 }
 0x62c   : > { %v3042_v63 = vpop.permute.xlu2 %3041 }
 0x630   : > { %v2419_v51 = vpop.permute.xlu0 %2418  ;;  %v4999_v43 = vld [vmem:[#allocation3 + $0x28] sm:$0xff]  ;;  %v3848_v21 = vpop.f32.mrf.mxu3 }
 0x631   : > { %2454 = vst.msk [vmem:[#allocation3 + $0x34] sm:$0xf] %vm2440_vm2, %v2419_v51  ;;  %v3849_v28 = vadd.f32 %v6996_v4, %v3848_v21  ;;  %3860 = vmatmul.bf16.gmra.mxu3 %v4999_v43 }
 0x632   : > { %3073 = vst.msk [vmem:[#allocation3 + $0x34] sm:$0xf] %vm3059_vm3, %v3038_v19 }
 0x633   : > { %3692 = vst.msk [vmem:[#allocation3 + $0x34] sm:$0xf] %vm3678_vm4, %v3657_v18 }
 0x634   : > { %3881 = vst [vmem:[%s7001_s15 + $0x28] sm:$0xff] %v3849_v28 }
 0x635   : > { %v3659_v56 = vpop.permute.xlu2 %3658 }
 0x638   : > { %v3036_v59 = vpop.permute.xlu0 %3035  ;;  %v3851_v20 = vpop.f32.mrf.mxu3 }
 0x639   : > { %3072 = vst.msk [vmem:[#allocation3 + $0x30] sm:$0xf] %vm3059_vm3, %v3036_v59  ;;  %v3852_v16 = vadd.f32 %v6996_v4, %v3851_v20 }
 0x63b   : > { %3882 = vst [vmem:[%s7001_s15 + $0x30] sm:$0xff] %v3852_v16 }
 0x640   : > { %v3655_v60 = vpop.permute.xlu0 %3654  ;;  %v3853_v37 = vpop.f32.mrf.mxu3 }
 0x641   : > { %3691 = vst.msk [vmem:[#allocation3 + $0x30] sm:$0xf] %vm3678_vm4, %v3655_v60  ;;  %v3854_v13 = vadd.f32 %v6996_v4, %v3853_v37 }
 0x643   : > { %3883 = vst [vmem:[%s7001_s15 + $0x38] sm:$0xff] %v3854_v13 }
 0x645   : > { %v2423_v8 = vpop.permute.xlu1 %2422 }
 0x646   : > { %2456 = vst.msk [vmem:[#allocation3 + $0x3c] sm:$0xf] %vm2440_vm2, %v2423_v8 }
 0x647   : > { %3075 = vst.msk [vmem:[#allocation3 + $0x3c] sm:$0xf] %vm3059_vm3, %v3042_v63 }
 0x648   : > { %v5000_v27 = vld [vmem:[#allocation3 + $0x30] sm:$0xff] }
 0x649   : > { %3865 = vmatmul.bf16.gmra.mxu3 %v5000_v27 }
 0x64d   : > { %v3661_v12 = vpop.permute.xlu1 %3660 }
 0x64e   : > { %3694 = vst.msk [vmem:[#allocation3 + $0x3c] sm:$0xf] %vm3678_vm4, %v3661_v12 }
 0x66b   : > { %v1665_v25 = vpop.xlane.xlu0 %1664 }
 0x66c   : > { %5375 = vrcp.f32 %v1665_v25 }
 0x672   : > { %v5376_v3 = vpop.eup %5375 }
 0x673   : > { %v1803_v36 = vmul.f32 %v5376_v3, %v7194_v5 }
 0x675   : > { %v1819_v22 = vpack.c.bf16 %v1803_v36, %v1803_v36 }
 0x677   : > { %1836 = vst.msk [vmem:[#allocation3 + $0x38] sm:$0xf] %vm1821_vm1, %v1819_v22  ;;  %v3856_v44 = vpop.f32.mrf.mxu3 }
 0x678   : > { %2455 = vst.msk [vmem:[#allocation3 + $0x38] sm:$0xf] %vm2440_vm2, %v2421_v2  ;;  %v3857_v42 = vadd.f32 %v6996_v4, %v3856_v44 }
 0x679   : > { %3074 = vst.msk [vmem:[#allocation3 + $0x38] sm:$0xf] %vm3059_vm3, %v3040_v49 }
 0x67a   : > { %3693 = vst.msk [vmem:[#allocation3 + $0x38] sm:$0xf] %vm3678_vm4, %v3659_v56 }
 0x67b   : > { %3884 = vst [vmem:[%s7001_s15 + $0x40] sm:$0xff] %v3857_v42 }
 0x67f   : > { %v3858_v53 = vpop.f32.mrf.mxu3 }
 0x680   : > { %v3859_v48 = vadd.f32 %v6996_v4, %v3858_v53 }
 0x681   : > { %v5001_v62 = vld [vmem:[#allocation3 + $0x38] sm:$0xff] }
 0x682   : > { %3885 = vst [vmem:[%s7001_s15 + $0x48] sm:$0xff] %v3859_v48  ;;  %3870 = vmatmul.bf16.gmra.mxu3 %v5001_v62 }
 0x683   : > { %5554 = shalt.err (!%p5551_p10)
}
 0x684   : > { %s5650_s23 = smov 192   ;;  %s5651_s25 = smov 12  }
 0x685   : > { %5032 = dma.vmem_to_hbm [thread:$0]  (%p5786_p5), %s3928_s11, 3072, %s3930_s16, %s3898_s26, %s5650_s23, %s5650_s23, %s5651_s25  }
 0x686   : > { %s5010_s0 = sshll.u32 %s5720_s9, 7  ;;  %s3910_s19 = sshll.u32 %s7001_s15, 4  ;;  %s3911_s19 = int_to_ptr.vmem [resolvable:$true] %s3910_s19 }
 0x687   : > { %s3909_s2 = scalar_lea.hbm %s7131_s7, %s5010_s0  ;;  %s3893_s16 = scalar_lea.sflag [#allocation6], %s5813_s18 }
 0x688   : > { %s3912_s11 = sshll.u32 %s3909_s2, 4  ;;  %s5575_s17 = scalar_lea.hbm %s7131_s7, 256  ;;  %s3913_s11 = int_to_ptr.hbm [resolvable:$true] %s3912_s11 }
 0x689   : > { %s5569_s26 = sshra.s32 %s3913_s11, 4  ;;  %s5570_s26 = int_to_ptr.hbm [resolvable:$true] %s5569_s26 }
 0x68a   : > { %s5571_s9 = scalar_lea.hbm %s5570_s26, 128  ;;  %p5576_p3 = scmp.lt.s32.totalorder %s5570_s26, %s7131_s7 }
 0x68b   : > { %p5572_p12 = scmp.ne.s32.totalorder %s5570_s26, %s5571_s9  ;;  %p5577_p7 = scmp.lt.s32.totalorder %s5575_s17, %s5571_s9 }
 0x68d   : > { %p5573_p13 = pnand %p5572_p12, %p5786_p5  ;;  %p5578_p1 = por %p5577_p7, %p5576_p3 }
 0x68f   : > { %p5574_p0 = pneg %p5573_p13 }
 0x691   : > { %p5579_p4 = pnand %p5578_p1, %p5574_p0 }
 0x6b4   : > { %v3861_v31 = vpop.f32.mrf.mxu3 }
 0x6b5   : > { %v3862_v39 = vadd.f32 %v6996_v4, %v3861_v31 }
 0x6b7   : > { %3886 = vst [vmem:[%s7001_s15 + $0x50] sm:$0xff] %v3862_v39 }
 0x6bc   : > { %v3863_v9 = vpop.f32.mrf.mxu3 }
 0x6bd   : > { %v3864_v1 = vadd.f32 %v6996_v4, %v3863_v9 }
 0x6bf   : > { %3887 = vst [vmem:[%s7001_s15 + $0x58] sm:$0xff] %v3864_v1 }
 0x6cc   : > { %v3866_v34 = vpop.f32.mrf.mxu3 }
 0x6cd   : > { %v3867_v32 = vadd.f32 %v6996_v4, %v3866_v34 }
 0x6cf   : > { %3888 = vst [vmem:[%s7001_s15 + $0x60] sm:$0xff] %v3867_v32 }
 0x6d4   : > { %v3868_v26 = vpop.f32.mrf.mxu3 }
 0x6d5   : > { %v3869_v47 = vadd.f32 %v6996_v4, %v3868_v26 }
 0x6d7   : > { %3889 = vst [vmem:[%s7001_s15 + $0x68] sm:$0xff] %v3869_v47 }
 0x705   : > { %v3871_v58 = vpop.f32.mrf.mxu3 }
 0x706   : > { %v3872_v46 = vadd.f32 %v6996_v4, %v3871_v58 }
 0x708   : > { %3890 = vst [vmem:[%s7001_s15 + $0x70] sm:$0xff] %v3872_v46 }
 0x70d   : > { %v3873_v24 = vpop.f32.mrf.mxu3 }
 0x70e   : > { %v3874_v30 = vadd.f32 %v6996_v4, %v3873_v24 }
 0x710   : > { %3891 = vst [vmem:[%s7001_s15 + $0x78] sm:$0xff] %v3874_v30 }
 0x711   : > { %5582 = shalt.err (!%p5579_p4)
}
 0x712   : > { %s5652_s18 = smov 128   ;;  %s5653_s15 = smov 8  }
 0x713   : > { %5031 = dma.vmem_to_hbm [thread:$0]  (%p5786_p5), %s3911_s19, 2048, %s3913_s11, %s3893_s16, %s5652_s18, %s5652_s18, %s5653_s15  }
 0x714 PF: > { %s3944_s23 = sand.u32 1, %s5621_s27   ;;  %p7195_p8 = scmp.ge.s32.totalorder %s5633_s30, 2 }
 0x715   : > { %s3945_s25 = scalar_lea.sflag [#allocation6], %s3944_s23 }
 0x716   : > { %p5053_p11 = pnand %p7195_p8, %p5734_p6 }
 0x718   : > { %p5054_p9 = pneg %p5053_p11 }
 0x71a   : > { %5612 = dma.done.wait (%p5054_p9), %s3945_s25, 2048  }
 0x71b   : > { %5614 = vsyncadd (%p5054_p9), %s3945_s25, 4294965248  ;;  %s3955_s0 = scalar_lea.sflag [#allocation15], %s3944_s23 }
 0x71c   : > { %5616 = dma.done.wait (%p5054_p9), %s3955_s0, 3072  }
 0x71d   : > { %5618 = vsyncadd (%p5054_p9), %s3955_s0, 4294964224  ;;  %p27_p5 = scmp.ge.s32.totalorder %s5773_s13, 4   ;;  %s7196_s27 = smov %s5625_s28 }
 0x71e   : > { %s7197_s28 = smov %s5629_s29  ;;  %s7198_s29 = smov %s5782_s20 }
 0x71f   : > { %s7199_s30 = smov %s5773_s13  ;;  %29 = sbr.rel (!%p27_p5) target bundleno = 14 (0xe), region = 126 }
 0x724   :  { %3961 = vsyncpa [#allocation5], 1 }
 0x725   :  { %3963 = vsyncpa [#allocation5 + $0x1], 1 }
 0x726   :  { %3964 = vsyncpa [#allocation8], 1 }
 0x727   :  { %3965 = vsyncpa [#allocation11], 1 }
 0x728   :  { %3966 = vsyncpa [#allocation6], 1 }
 0x729   :  { %3968 = vsyncpa [#allocation6 + $0x1], 1 }
 0x72a   :  { %3969 = vsyncpa [#allocation15], 1 }
 0x72b   :  { %3971 = vsyncpa [#allocation15 + $0x1], 1 }

</bundles_post_ra>
